<compile_context>
chip_gen: v5e
topology: v5e:2x2
jax: 0.10.0
libtpu: 0.0.40
codegen_flags: <defaults>
</compile_context>

<pallas_src>
import functools

import jax
import jax.numpy as jnp
from jax.experimental import pallas as pl
from jax.experimental.pallas import tpu as pltpu

K = 7   # SpatialAttention kernel size
P = 3   # padding for kernel_size == 7


# -----------------------------------------------------------------------------
# Fused per-stage kernel:
#   sa = sigmoid(conv7x7(cat([mean_c(x), max_c(x)])))
#   x1 = sa * x ; x2 = CrossAttention(x1) * x1 ; out = ReLU(BN(conv1x1(x2)))
# -----------------------------------------------------------------------------
def _sca_stage_kernel(x_ref, wsa_ref, wqkv_ref, bqkv_ref, wt_ref, bt_ref, o_ref,
                      pad_ref, feat_ref, conv_ref, sa_ref, *, Cq, H, W):
    # x_ref    : (1, C, HW)   channel-major batch element (lane axis = HW)
    # wsa_ref  : (2*K*K,)     flattened OIHW 7x7 conv weight, SMEM
    # wqkv_ref : (2*Cq+C, C)  bf16 fused [wq_pad; wk_pad; wv] 1x1-conv weight
    # bqkv_ref : (2*Cq+C, 1)  f32 fused bias (zero rows in the padding)
    # wt_ref   : (C, C)       bf16 Translayer weight with BN folded in
    # bt_ref   : (C, 1)       f32 folded Translayer bias
    # o_ref    : (1, C, HW)   output block
    # pad_ref  : (2, H+2P, W+2P) f32 zero-padded [avg, max] spatial maps
    # feat_ref : (2, HW)      f32 flattened [avg, max] maps
    # conv_ref : (H, W)       f32 sigmoid(conv) result
    # sa_ref   : (1, HW)      f32 flattened spatial-attention map
    HW = H * W
    f32 = jnp.float32
    bf16 = jnp.bfloat16

    x = x_ref[0].astype(f32)                                  # (C, HW) lane-dense

    # ---- SpatialAttention prologue ----------------------------------------
    # Channel mean/max are lane-dense sublane reductions over C.
    feat_ref[pl.ds(0, 1), :] = jnp.mean(x, axis=0, keepdims=True)
    feat_ref[pl.ds(1, 1), :] = jnp.max(x, axis=0, keepdims=True)

    # Scatter the flattened (HW,) maps into the zero-padded 2-D scratch row by
    # row (ref->ref row copies; avoids unsupported in-register lane reshapes).
    pad_ref[...] = jnp.zeros_like(pad_ref)
    for y in range(H):
        pad_ref[0, P + y, pl.ds(P, W)] = feat_ref[0, pl.ds(y * W, W)]
        pad_ref[1, P + y, pl.ds(P, W)] = feat_ref[1, pl.ds(y * W, W)]

    # 7x7 "same" conv = 98 scalar*window VPU FMAs over static windows of the
    # padded scratch (one-shot prologue per batch element -> negligible cost),
    # split over 4 partial accumulators to break the FMA dependence chain.
    accs = [jnp.zeros((H, W), f32) for _ in range(4)]
    for c in range(2):
        for ky in range(K):
            for kx in range(K):
                w_s = wsa_ref[c * K * K + ky * K + kx]
                win = pad_ref[c, pl.ds(ky, H), pl.ds(kx, W)]
                a = (c << 1) | (ky & 1)
                accs[a] = accs[a] + w_s * win
    conv_ref[...] = jax.nn.sigmoid((accs[0] + accs[1]) + (accs[2] + accs[3]))

    # Gather the (H, W) map back to flattened (1, HW) layout row by row.
    for y in range(H):
        sa_ref[0, pl.ds(y * W, W)] = conv_ref[y, :]
    sa = sa_ref[...]                                          # (1, HW)

    # ---- x1 = sa * x ; fused padded [q; k; v] projection (one NN MXU dot) --
    x1 = sa * x                                               # (C, HW)
    qkv = jnp.dot(wqkv_ref[...], x1.astype(bf16),
                  preferred_element_type=f32) + bqkv_ref[...]  # (2Cq+C, HW)
    q = qkv[0:Cq, :]          # (Cq, HW)  rows >= C8 are exactly zero
    k = qkv[Cq:2 * Cq, :]     # (Cq, HW)  rows >= C8 are exactly zero
    v = qkv[2 * Cq:, :]       # (C,  HW)

    # ---- attention: logits[l, m] = sum_o q[o, l] * k[o, m]  (f32, tiny K) --
    logits = jax.lax.dot_general(q, k, (((0,), (0,)), ((), ())),
                                 preferred_element_type=f32)   # (HW, HW)
    m = jnp.max(logits, axis=-1, keepdims=True)
    e = jnp.exp(logits - m)
    denom = jnp.sum(e, axis=-1, keepdims=True)
    att = e * pl.reciprocal(denom, approx=True)                # EUP reciprocal

    # out[c, l] = sum_m v[c, m] * att[l, m]   (NT dot, bf16 operands)
    out = jax.lax.dot_general(v.astype(bf16), att.astype(bf16),
                              (((1,), (1,)), ((), ())),
                              preferred_element_type=f32)      # (C, HW)

    # ---- x2 = cross(x1) * x1 ; Translayer (folded BN) + ReLU ---------------
    x2 = out * x1
    t = jnp.dot(wt_ref[...], x2.astype(bf16),
                preferred_element_type=f32) + bt_ref[...]      # (C, HW)
    o_ref[0] = jnp.maximum(t, 0.0).astype(o_ref.dtype)         # lane-dense store


# -----------------------------------------------------------------------------
# Host-side wrapper (per stage)
# -----------------------------------------------------------------------------
def _fold_bn(wt, gamma, beta, mean, var, eps=1e-5):
    scale = gamma / jnp.sqrt(var + eps)
    return wt * scale[:, None], beta - mean * scale


def sca_stage(x, p):
    """One SCA stage: x (N, C, H, W) + params dict -> (N, C, H, W)."""
    N, C, H, W = x.shape
    HW = H * W
    C8 = p["wq"].shape[0]
    Cq = max(8, ((C8 + 7) // 8) * 8)          # pad q/k rows to vreg boundary
    f32, bf16 = jnp.float32, jnp.bfloat16

    wt_f, bt_f = _fold_bn(p["wt"], p["bn_g"], p["bn_b"], p["bn_m"], p["bn_v"])

    def _pad_rows(w_, b_):
        pad = Cq - C8
        return (jnp.pad(w_.astype(f32), ((0, pad), (0, 0))),
                jnp.pad(b_.astype(f32), (0, pad)))

    wq_p, bq_p = _pad_rows(p["wq"], p["bq"])
    wk_p, bk_p = _pad_rows(p["wk"], p["bk"])
    wqkv = jnp.concatenate([wq_p, wk_p, p["wv"].astype(f32)], axis=0).astype(bf16)
    bqkv = jnp.concatenate([bq_p, bk_p, p["bv"].astype(f32)]).reshape(-1, 1)
    wt_bf = wt_f.astype(bf16)
    bt_col = bt_f.reshape(-1, 1).astype(f32)
    wsa_flat = p["w_sa"].reshape(-1).astype(f32)

    M = 2 * Cq + C
    kernel = functools.partial(_sca_stage_kernel, Cq=Cq, H=H, W=W)

    out = pl.pallas_call(
        kernel,
        out_shape=jax.ShapeDtypeStruct((N, C, HW), x.dtype),
        grid=(N,),
        in_specs=[
            pl.BlockSpec((1, C, HW), lambda n: (n, 0, 0)),     # x (channel-major)
            pl.BlockSpec(memory_space=pltpu.SMEM),             # 7x7 conv weight
            pl.BlockSpec((M, C), lambda n: (0, 0)),            # fused qkv weight
            pl.BlockSpec((M, 1), lambda n: (0, 0)),            # fused qkv bias
            pl.BlockSpec((C, C), lambda n: (0, 0)),            # folded translayer W
            pl.BlockSpec((C, 1), lambda n: (0, 0)),            # folded translayer b
        ],
        out_specs=pl.BlockSpec((1, C, HW), lambda n: (n, 0, 0)),
        scratch_shapes=[
            pltpu.VMEM((2, H + 2 * P, W + 2 * P), f32),        # padded [avg, max]
            pltpu.VMEM((2, HW), f32),                          # flat [avg, max]
            pltpu.VMEM((H, W), f32),                           # sigmoid(conv)
            pltpu.VMEM((1, HW), f32),                          # flat SA map
        ],
        compiler_params=pltpu.CompilerParams(
            dimension_semantics=("parallel",),
            vmem_limit_bytes=32 * 1024 * 1024,
        ),
    )(x.reshape(N, C, HW), wsa_flat, wqkv, bqkv, wt_bf, bt_col)
    return out.reshape(N, C, H, W)


def sca_forward(fas, params):
    return tuple(sca_stage(x, p) for x, p in zip(fas, params))


# -----------------------------------------------------------------------------
# Pure-JAX reference of the PyTorch forward (for the correctness check)
# -----------------------------------------------------------------------------
def sca_reference(fas, params):
    prec = jax.lax.Precision.HIGHEST
    outs = []
    for x, p in zip(fas, params):
        avg = jnp.mean(x, axis=1, keepdims=True)
        mx = jnp.max(x, axis=1, keepdims=True)
        feat = jnp.concatenate([avg, mx], axis=1)
        sa = jax.nn.sigmoid(jax.lax.conv_general_dilated(
            feat, p["w_sa"], window_strides=(1, 1), padding=[(P, P), (P, P)],
            dimension_numbers=("NCHW", "OIHW", "NCHW"), precision=prec))
        x1 = sa * x
        n, c, h, w = x1.shape
        xf = x1.reshape(n, c, h * w)
        q = jnp.einsum("oc,ncl->nol", p["wq"], xf, precision=prec) + p["bq"][None, :, None]
        k = jnp.einsum("oc,ncl->nol", p["wk"], xf, precision=prec) + p["bk"][None, :, None]
        v = jnp.einsum("oc,ncl->nol", p["wv"], xf, precision=prec) + p["bv"][None, :, None]
        att = jax.nn.softmax(jnp.einsum("nol,nom->nlm", q, k, precision=prec), axis=-1)
        co = jnp.einsum("ncm,nlm->ncl", v, att, precision=prec).reshape(n, c, h, w)
        x2 = co * x1
        t = jnp.einsum("oc,nchw->nohw", p["wt"], x2, precision=prec)
        scale = p["bn_g"] / jnp.sqrt(p["bn_v"] + 1e-5)
        t = t * scale[None, :, None, None] + (p["bn_b"] - p["bn_m"] * scale)[None, :, None, None]
        outs.append(jnp.maximum(t, 0.0))
    return outs


if __name__ == "__main__":
    N, inplanes, H, W = 2, 16, 16, 16
    keys = iter(jax.random.split(jax.random.PRNGKey(0), 72))

    fas, params = [], []
    for i in range(4):
        C = inplanes * (2 ** i)
        C8 = C // 8
        b_sa = 1.0 / (2 * K * K) ** 0.5
        b_c = 1.0 / C ** 0.5
        fas.append(jax.random.normal(next(keys), (N, C, H, W), jnp.float32))
        params.append(dict(
            w_sa=jax.random.uniform(next(keys), (1, 2, K, K), jnp.float32, -b_sa, b_sa),
            wq=jax.random.uniform(next(keys), (C8, C), jnp.float32, -b_c, b_c),
            bq=jax.random.uniform(next(keys), (C8,), jnp.float32, -b_c, b_c),
            wk=jax.random.uniform(next(keys), (C8, C), jnp.float32, -b_c, b_c),
            bk=jax.random.uniform(next(keys), (C8,), jnp.float32, -b_c, b_c),
            wv=jax.random.uniform(next(keys), (C, C), jnp.float32, -b_c, b_c),
            bv=jax.random.uniform(next(keys), (C,), jnp.float32, -b_c, b_c),
            wt=jax.random.uniform(next(keys), (C, C), jnp.float32, -b_c, b_c),
            bn_g=jax.random.uniform(next(keys), (C,), jnp.float32, 0.5, 1.5),
            bn_b=0.1 * jax.random.normal(next(keys), (C,), jnp.float32),
            bn_m=0.1 * jax.random.normal(next(keys), (C,), jnp.float32),
            bn_v=jax.random.uniform(next(keys), (C,), jnp.float32, 0.5, 1.5),
        ))

    outs = sca_forward(fas, params)
    outs = jax.block_until_ready(outs)

    refs = sca_reference(fas, params)
    for i, (o, r) in enumerate(zip(outs, refs)):
        assert o.shape == r.shape, (o.shape, r.shape)
        err = float(jnp.max(jnp.abs(o - r)))
        # bf16 matmul operands + approx-reciprocal softmax => slightly looser
        # tolerance than a pure-f32 kernel.
        assert jnp.allclose(o, r, atol=2e-2, rtol=2e-2), (i, err)

    print("KERNEL_OK")
</pallas_src>

<mosaic_0001>
module attributes {stable_mosaic.version = 11 : i64} {
  func.func @_sca_stage_kernel(%arg0: i32, %arg1: memref<1x16x256xf32, #tpu.memory_space<vmem>>, %arg2: memref<98xf32, #tpu.memory_space<smem>>, %arg3: memref<32x16xbf16, #tpu.memory_space<vmem>>, %arg4: memref<32x1xf32, #tpu.memory_space<vmem>>, %arg5: memref<16x16xbf16, #tpu.memory_space<vmem>>, %arg6: memref<16x1xf32, #tpu.memory_space<vmem>>, %arg7: memref<1x16x256xf32, #tpu.memory_space<vmem>>, %arg8: memref<2x22x22xf32, #tpu.memory_space<vmem>>, %arg9: memref<2x256xf32, #tpu.memory_space<vmem>>, %arg10: memref<16x16xf32, #tpu.memory_space<vmem>>, %arg11: memref<1x256xf32, #tpu.memory_space<vmem>>) attributes {dimension_semantics = [#tpu.dimension_semantics<parallel>], iteration_bounds = array<i64: 2>, scalar_prefetch = 0 : i64, scratch_operands = 4 : i64, tpu.core_type = #tpu.core_type<tc>, window_params = [{transform_indices = @transform_0, window_bounds = array<i64: 1, 16, 256>}, {transform_indices = @transform_1, window_bounds = array<i64: 98>}, {pipeline_mode = #tpu.pipeline_mode<synchronous>, transform_indices = @transform_2, window_bounds = array<i64: 32, 16>}, {pipeline_mode = #tpu.pipeline_mode<synchronous>, transform_indices = @transform_3, window_bounds = array<i64: 32, 1>}, {pipeline_mode = #tpu.pipeline_mode<synchronous>, transform_indices = @transform_4, window_bounds = array<i64: 16, 16>}, {pipeline_mode = #tpu.pipeline_mode<synchronous>, transform_indices = @transform_5, window_bounds = array<i64: 16, 1>}, {transform_indices = @transform_6, window_bounds = array<i64: 1, 16, 256>}]} {
    %c0 = arith.constant 0 : index
    %c0_0 = arith.constant 0 : index
    %c0_1 = arith.constant 0 : index
    %0 = vector.load %arg1[%c0, %c0_0, %c0_1] : memref<1x16x256xf32, #tpu.memory_space<vmem>>, vector<1x16x256xf32>
    %1 = vector.shape_cast %0 : vector<1x16x256xf32> to vector<16x256xf32>
    %cst = arith.constant dense<0.000000e+00> : vector<256xf32>
    %2 = vector.multi_reduction <add>, %1, %cst [0] : vector<16x256xf32> to vector<256xf32>
    %3 = vector.shape_cast %2 : vector<256xf32> to vector<1x256xf32>
    %cst_2 = arith.constant 1.600000e+01 : f32
    %4 = vector.broadcast %cst_2 : f32 to vector<1x256xf32>
    %5 = arith.divf %3, %4 : vector<1x256xf32>
    %c0_3 = arith.constant 0 : index
    %c0_4 = arith.constant 0 : index
    %6 = vector.load %arg9[%c0_3, %c0_4] : memref<2x256xf32, #tpu.memory_space<vmem>>, vector<1x256xf32>
    tpu.vector_store %arg9[%c0_3, %c0_4], %5 {strides = array<i32>} : memref<2x256xf32, #tpu.memory_space<vmem>>, vector<1x256xf32>,
    %cst_5 = arith.constant dense<0xFF800000> : vector<256xf32>
    %7 = vector.multi_reduction <maximumf>, %1, %cst_5 [0] : vector<16x256xf32> to vector<256xf32>
    %8 = vector.shape_cast %7 : vector<256xf32> to vector<1x256xf32>
    %c1 = arith.constant 1 : index
    %c0_6 = arith.constant 0 : index
    %9 = vector.load %arg9[%c1, %c0_6] : memref<2x256xf32, #tpu.memory_space<vmem>>, vector<1x256xf32>
    tpu.vector_store %arg9[%c1, %c0_6], %8 {strides = array<i32>} : memref<2x256xf32, #tpu.memory_space<vmem>>, vector<1x256xf32>,
    %cst_7 = arith.constant 0.000000e+00 : f32
    %10 = vector.broadcast %cst_7 : f32 to vector<2x22x22xf32>
    %c0_8 = arith.constant 0 : index
    %c0_9 = arith.constant 0 : index
    %c0_10 = arith.constant 0 : index
    %11 = vector.load %arg8[%c0_8, %c0_9, %c0_10] : memref<2x22x22xf32, #tpu.memory_space<vmem>>, vector<2x22x22xf32>
    tpu.vector_store %arg8[%c0_8, %c0_9, %c0_10], %10 {strides = array<i32>} : memref<2x22x22xf32, #tpu.memory_space<vmem>>, vector<2x22x22xf32>,
    %c0_11 = arith.constant 0 : index
    %c0_12 = arith.constant 0 : index
    %12 = vector.load %arg9[%c0_11, %c0_12] : memref<2x256xf32, #tpu.memory_space<vmem>>, vector<1x16xf32>
    %13 = vector.shape_cast %12 : vector<1x16xf32> to vector<16xf32>
    %c0_13 = arith.constant 0 : index
    %c3 = arith.constant 3 : index
    %c3_14 = arith.constant 3 : index
    %14 = vector.load %arg8[%c0_13, %c3, %c3_14] : memref<2x22x22xf32, #tpu.memory_space<vmem>>, vector<1x1x16xf32>
    %15 = vector.shape_cast %14 : vector<1x1x16xf32> to vector<16xf32>
    %16 = vector.shape_cast %13 : vector<16xf32> to vector<1x1x16xf32>
    tpu.vector_store %arg8[%c0_13, %c3, %c3_14], %16 {strides = array<i32>} : memref<2x22x22xf32, #tpu.memory_space<vmem>>, vector<1x1x16xf32>,
    %c1_15 = arith.constant 1 : index
    %c0_16 = arith.constant 0 : index
    %17 = vector.load %arg9[%c1_15, %c0_16] : memref<2x256xf32, #tpu.memory_space<vmem>>, vector<1x16xf32>
    %18 = vector.shape_cast %17 : vector<1x16xf32> to vector<16xf32>
    %c1_17 = arith.constant 1 : index
    %c3_18 = arith.constant 3 : index
    %c3_19 = arith.constant 3 : index
    %19 = vector.load %arg8[%c1_17, %c3_18, %c3_19] : memref<2x22x22xf32, #tpu.memory_space<vmem>>, vector<1x1x16xf32>
    %20 = vector.shape_cast %19 : vector<1x1x16xf32> to vector<16xf32>
    %21 = vector.shape_cast %18 : vector<16xf32> to vector<1x1x16xf32>
    tpu.vector_store %arg8[%c1_17, %c3_18, %c3_19], %21 {strides = array<i32>} : memref<2x22x22xf32, #tpu.memory_space<vmem>>, vector<1x1x16xf32>,
    %c0_20 = arith.constant 0 : index
    %c16 = arith.constant 16 : index
    %22 = vector.load %arg9[%c0_20, %c16] : memref<2x256xf32, #tpu.memory_space<vmem>>, vector<1x16xf32>
    %23 = vector.shape_cast %22 : vector<1x16xf32> to vector<16xf32>
    %c0_21 = arith.constant 0 : index
    %c4 = arith.constant 4 : index
    %c3_22 = arith.constant 3 : index
    %24 = vector.load %arg8[%c0_21, %c4, %c3_22] : memref<2x22x22xf32, #tpu.memory_space<vmem>>, vector<1x1x16xf32>
    %25 = vector.shape_cast %24 : vector<1x1x16xf32> to vector<16xf32>
    %26 = vector.shape_cast %23 : vector<16xf32> to vector<1x1x16xf32>
    tpu.vector_store %arg8[%c0_21, %c4, %c3_22], %26 {strides = array<i32>} : memref<2x22x22xf32, #tpu.memory_space<vmem>>, vector<1x1x16xf32>,
    %c1_23 = arith.constant 1 : index
    %c16_24 = arith.constant 16 : index
    %27 = vector.load %arg9[%c1_23, %c16_24] : memref<2x256xf32, #tpu.memory_space<vmem>>, vector<1x16xf32>
    %28 = vector.shape_cast %27 : vector<1x16xf32> to vector<16xf32>
    %c1_25 = arith.constant 1 : index
    %c4_26 = arith.constant 4 : index
    %c3_27 = arith.constant 3 : index
    %29 = vector.load %arg8[%c1_25, %c4_26, %c3_27] : memref<2x22x22xf32, #tpu.memory_space<vmem>>, vector<1x1x16xf32>
    %30 = vector.shape_cast %29 : vector<1x1x16xf32> to vector<16xf32>
    %31 = vector.shape_cast %28 : vector<16xf32> to vector<1x1x16xf32>
    tpu.vector_store %arg8[%c1_25, %c4_26, %c3_27], %31 {strides = array<i32>} : memref<2x22x22xf32, #tpu.memory_space<vmem>>, vector<1x1x16xf32>,
    %c0_28 = arith.constant 0 : index
    %c32 = arith.constant 32 : index
    %32 = vector.load %arg9[%c0_28, %c32] : memref<2x256xf32, #tpu.memory_space<vmem>>, vector<1x16xf32>
    %33 = vector.shape_cast %32 : vector<1x16xf32> to vector<16xf32>
    %c0_29 = arith.constant 0 : index
    %c5 = arith.constant 5 : index
    %c3_30 = arith.constant 3 : index
    %34 = vector.load %arg8[%c0_29, %c5, %c3_30] : memref<2x22x22xf32, #tpu.memory_space<vmem>>, vector<1x1x16xf32>
    %35 = vector.shape_cast %34 : vector<1x1x16xf32> to vector<16xf32>
    %36 = vector.shape_cast %33 : vector<16xf32> to vector<1x1x16xf32>
    tpu.vector_store %arg8[%c0_29, %c5, %c3_30], %36 {strides = array<i32>} : memref<2x22x22xf32, #tpu.memory_space<vmem>>, vector<1x1x16xf32>,
    %c1_31 = arith.constant 1 : index
    %c32_32 = arith.constant 32 : index
    %37 = vector.load %arg9[%c1_31, %c32_32] : memref<2x256xf32, #tpu.memory_space<vmem>>, vector<1x16xf32>
    %38 = vector.shape_cast %37 : vector<1x16xf32> to vector<16xf32>
    %c1_33 = arith.constant 1 : index
    %c5_34 = arith.constant 5 : index
    %c3_35 = arith.constant 3 : index
    %39 = vector.load %arg8[%c1_33, %c5_34, %c3_35] : memref<2x22x22xf32, #tpu.memory_space<vmem>>, vector<1x1x16xf32>
    %40 = vector.shape_cast %39 : vector<1x1x16xf32> to vector<16xf32>
    %41 = vector.shape_cast %38 : vector<16xf32> to vector<1x1x16xf32>
    tpu.vector_store %arg8[%c1_33, %c5_34, %c3_35], %41 {strides = array<i32>} : memref<2x22x22xf32, #tpu.memory_space<vmem>>, vector<1x1x16xf32>,
    %c0_36 = arith.constant 0 : index
    %c48 = arith.constant 48 : index
    %42 = vector.load %arg9[%c0_36, %c48] : memref<2x256xf32, #tpu.memory_space<vmem>>, vector<1x16xf32>
    %43 = vector.shape_cast %42 : vector<1x16xf32> to vector<16xf32>
    %c0_37 = arith.constant 0 : index
    %c6 = arith.constant 6 : index
    %c3_38 = arith.constant 3 : index
    %44 = vector.load %arg8[%c0_37, %c6, %c3_38] : memref<2x22x22xf32, #tpu.memory_space<vmem>>, vector<1x1x16xf32>
    %45 = vector.shape_cast %44 : vector<1x1x16xf32> to vector<16xf32>
    %46 = vector.shape_cast %43 : vector<16xf32> to vector<1x1x16xf32>
    tpu.vector_store %arg8[%c0_37, %c6, %c3_38], %46 {strides = array<i32>} : memref<2x22x22xf32, #tpu.memory_space<vmem>>, vector<1x1x16xf32>,
    %c1_39 = arith.constant 1 : index
    %c48_40 = arith.constant 48 : index
    %47 = vector.load %arg9[%c1_39, %c48_40] : memref<2x256xf32, #tpu.memory_space<vmem>>, vector<1x16xf32>
    %48 = vector.shape_cast %47 : vector<1x16xf32> to vector<16xf32>
    %c1_41 = arith.constant 1 : index
    %c6_42 = arith.constant 6 : index
    %c3_43 = arith.constant 3 : index
    %49 = vector.load %arg8[%c1_41, %c6_42, %c3_43] : memref<2x22x22xf32, #tpu.memory_space<vmem>>, vector<1x1x16xf32>
    %50 = vector.shape_cast %49 : vector<1x1x16xf32> to vector<16xf32>
    %51 = vector.shape_cast %48 : vector<16xf32> to vector<1x1x16xf32>
    tpu.vector_store %arg8[%c1_41, %c6_42, %c3_43], %51 {strides = array<i32>} : memref<2x22x22xf32, #tpu.memory_space<vmem>>, vector<1x1x16xf32>,
    %c0_44 = arith.constant 0 : index
    %c64 = arith.constant 64 : index
    %52 = vector.load %arg9[%c0_44, %c64] : memref<2x256xf32, #tpu.memory_space<vmem>>, vector<1x16xf32>
    %53 = vector.shape_cast %52 : vector<1x16xf32> to vector<16xf32>
    %c0_45 = arith.constant 0 : index
    %c7 = arith.constant 7 : index
    %c3_46 = arith.constant 3 : index
    %54 = vector.load %arg8[%c0_45, %c7, %c3_46] : memref<2x22x22xf32, #tpu.memory_space<vmem>>, vector<1x1x16xf32>
    %55 = vector.shape_cast %54 : vector<1x1x16xf32> to vector<16xf32>
    %56 = vector.shape_cast %53 : vector<16xf32> to vector<1x1x16xf32>
    tpu.vector_store %arg8[%c0_45, %c7, %c3_46], %56 {strides = array<i32>} : memref<2x22x22xf32, #tpu.memory_space<vmem>>, vector<1x1x16xf32>,
    %c1_47 = arith.constant 1 : index
    %c64_48 = arith.constant 64 : index
    %57 = vector.load %arg9[%c1_47, %c64_48] : memref<2x256xf32, #tpu.memory_space<vmem>>, vector<1x16xf32>
    %58 = vector.shape_cast %57 : vector<1x16xf32> to vector<16xf32>
    %c1_49 = arith.constant 1 : index
    %c7_50 = arith.constant 7 : index
    %c3_51 = arith.constant 3 : index
    %59 = vector.load %arg8[%c1_49, %c7_50, %c3_51] : memref<2x22x22xf32, #tpu.memory_space<vmem>>, vector<1x1x16xf32>
    %60 = vector.shape_cast %59 : vector<1x1x16xf32> to vector<16xf32>
    %61 = vector.shape_cast %58 : vector<16xf32> to vector<1x1x16xf32>
    tpu.vector_store %arg8[%c1_49, %c7_50, %c3_51], %61 {strides = array<i32>} : memref<2x22x22xf32, #tpu.memory_space<vmem>>, vector<1x1x16xf32>,
    %c0_52 = arith.constant 0 : index
    %c80 = arith.constant 80 : index
    %62 = vector.load %arg9[%c0_52, %c80] : memref<2x256xf32, #tpu.memory_space<vmem>>, vector<1x16xf32>
    %63 = vector.shape_cast %62 : vector<1x16xf32> to vector<16xf32>
    %c0_53 = arith.constant 0 : index
    %c8 = arith.constant 8 : index
    %c3_54 = arith.constant 3 : index
    %64 = vector.load %arg8[%c0_53, %c8, %c3_54] : memref<2x22x22xf32, #tpu.memory_space<vmem>>, vector<1x1x16xf32>
    %65 = vector.shape_cast %64 : vector<1x1x16xf32> to vector<16xf32>
    %66 = vector.shape_cast %63 : vector<16xf32> to vector<1x1x16xf32>
    tpu.vector_store %arg8[%c0_53, %c8, %c3_54], %66 {strides = array<i32>} : memref<2x22x22xf32, #tpu.memory_space<vmem>>, vector<1x1x16xf32>,
    %c1_55 = arith.constant 1 : index
    %c80_56 = arith.constant 80 : index
    %67 = vector.load %arg9[%c1_55, %c80_56] : memref<2x256xf32, #tpu.memory_space<vmem>>, vector<1x16xf32>
    %68 = vector.shape_cast %67 : vector<1x16xf32> to vector<16xf32>
    %c1_57 = arith.constant 1 : index
    %c8_58 = arith.constant 8 : index
    %c3_59 = arith.constant 3 : index
    %69 = vector.load %arg8[%c1_57, %c8_58, %c3_59] : memref<2x22x22xf32, #tpu.memory_space<vmem>>, vector<1x1x16xf32>
    %70 = vector.shape_cast %69 : vector<1x1x16xf32> to vector<16xf32>
    %71 = vector.shape_cast %68 : vector<16xf32> to vector<1x1x16xf32>
    tpu.vector_store %arg8[%c1_57, %c8_58, %c3_59], %71 {strides = array<i32>} : memref<2x22x22xf32, #tpu.memory_space<vmem>>, vector<1x1x16xf32>,
    %c0_60 = arith.constant 0 : index
    %c96 = arith.constant 96 : index
    %72 = vector.load %arg9[%c0_60, %c96] : memref<2x256xf32, #tpu.memory_space<vmem>>, vector<1x16xf32>
    %73 = vector.shape_cast %72 : vector<1x16xf32> to vector<16xf32>
    %c0_61 = arith.constant 0 : index
    %c9 = arith.constant 9 : index
    %c3_62 = arith.constant 3 : index
    %74 = vector.load %arg8[%c0_61, %c9, %c3_62] : memref<2x22x22xf32, #tpu.memory_space<vmem>>, vector<1x1x16xf32>
    %75 = vector.shape_cast %74 : vector<1x1x16xf32> to vector<16xf32>
    %76 = vector.shape_cast %73 : vector<16xf32> to vector<1x1x16xf32>
    tpu.vector_store %arg8[%c0_61, %c9, %c3_62], %76 {strides = array<i32>} : memref<2x22x22xf32, #tpu.memory_space<vmem>>, vector<1x1x16xf32>,
    %c1_63 = arith.constant 1 : index
    %c96_64 = arith.constant 96 : index
    %77 = vector.load %arg9[%c1_63, %c96_64] : memref<2x256xf32, #tpu.memory_space<vmem>>, vector<1x16xf32>
    %78 = vector.shape_cast %77 : vector<1x16xf32> to vector<16xf32>
    %c1_65 = arith.constant 1 : index
    %c9_66 = arith.constant 9 : index
    %c3_67 = arith.constant 3 : index
    %79 = vector.load %arg8[%c1_65, %c9_66, %c3_67] : memref<2x22x22xf32, #tpu.memory_space<vmem>>, vector<1x1x16xf32>
    %80 = vector.shape_cast %79 : vector<1x1x16xf32> to vector<16xf32>
    %81 = vector.shape_cast %78 : vector<16xf32> to vector<1x1x16xf32>
    tpu.vector_store %arg8[%c1_65, %c9_66, %c3_67], %81 {strides = array<i32>} : memref<2x22x22xf32, #tpu.memory_space<vmem>>, vector<1x1x16xf32>,
    %c0_68 = arith.constant 0 : index
    %c112 = arith.constant 112 : index
    %82 = vector.load %arg9[%c0_68, %c112] : memref<2x256xf32, #tpu.memory_space<vmem>>, vector<1x16xf32>
    %83 = vector.shape_cast %82 : vector<1x16xf32> to vector<16xf32>
    %c0_69 = arith.constant 0 : index
    %c10 = arith.constant 10 : index
    %c3_70 = arith.constant 3 : index
    %84 = vector.load %arg8[%c0_69, %c10, %c3_70] : memref<2x22x22xf32, #tpu.memory_space<vmem>>, vector<1x1x16xf32>
    %85 = vector.shape_cast %84 : vector<1x1x16xf32> to vector<16xf32>
    %86 = vector.shape_cast %83 : vector<16xf32> to vector<1x1x16xf32>
    tpu.vector_store %arg8[%c0_69, %c10, %c3_70], %86 {strides = array<i32>} : memref<2x22x22xf32, #tpu.memory_space<vmem>>, vector<1x1x16xf32>,
    %c1_71 = arith.constant 1 : index
    %c112_72 = arith.constant 112 : index
    %87 = vector.load %arg9[%c1_71, %c112_72] : memref<2x256xf32, #tpu.memory_space<vmem>>, vector<1x16xf32>
    %88 = vector.shape_cast %87 : vector<1x16xf32> to vector<16xf32>
    %c1_73 = arith.constant 1 : index
    %c10_74 = arith.constant 10 : index
    %c3_75 = arith.constant 3 : index
    %89 = vector.load %arg8[%c1_73, %c10_74, %c3_75] : memref<2x22x22xf32, #tpu.memory_space<vmem>>, vector<1x1x16xf32>
    %90 = vector.shape_cast %89 : vector<1x1x16xf32> to vector<16xf32>
    %91 = vector.shape_cast %88 : vector<16xf32> to vector<1x1x16xf32>
    tpu.vector_store %arg8[%c1_73, %c10_74, %c3_75], %91 {strides = array<i32>} : memref<2x22x22xf32, #tpu.memory_space<vmem>>, vector<1x1x16xf32>,
    %c0_76 = arith.constant 0 : index
    %c128 = arith.constant 128 : index
    %92 = vector.load %arg9[%c0_76, %c128] : memref<2x256xf32, #tpu.memory_space<vmem>>, vector<1x16xf32>
    %93 = vector.shape_cast %92 : vector<1x16xf32> to vector<16xf32>
    %c0_77 = arith.constant 0 : index
    %c11 = arith.constant 11 : index
    %c3_78 = arith.constant 3 : index
    %94 = vector.load %arg8[%c0_77, %c11, %c3_78] : memref<2x22x22xf32, #tpu.memory_space<vmem>>, vector<1x1x16xf32>
    %95 = vector.shape_cast %94 : vector<1x1x16xf32> to vector<16xf32>
    %96 = vector.shape_cast %93 : vector<16xf32> to vector<1x1x16xf32>
    tpu.vector_store %arg8[%c0_77, %c11, %c3_78], %96 {strides = array<i32>} : memref<2x22x22xf32, #tpu.memory_space<vmem>>, vector<1x1x16xf32>,
    %c1_79 = arith.constant 1 : index
    %c128_80 = arith.constant 128 : index
    %97 = vector.load %arg9[%c1_79, %c128_80] : memref<2x256xf32, #tpu.memory_space<vmem>>, vector<1x16xf32>
    %98 = vector.shape_cast %97 : vector<1x16xf32> to vector<16xf32>
    %c1_81 = arith.constant 1 : index
    %c11_82 = arith.constant 11 : index
    %c3_83 = arith.constant 3 : index
    %99 = vector.load %arg8[%c1_81, %c11_82, %c3_83] : memref<2x22x22xf32, #tpu.memory_space<vmem>>, vector<1x1x16xf32>
    %100 = vector.shape_cast %99 : vector<1x1x16xf32> to vector<16xf32>
    %101 = vector.shape_cast %98 : vector<16xf32> to vector<1x1x16xf32>
    tpu.vector_store %arg8[%c1_81, %c11_82, %c3_83], %101 {strides = array<i32>} : memref<2x22x22xf32, #tpu.memory_space<vmem>>, vector<1x1x16xf32>,
    %c0_84 = arith.constant 0 : index
    %c144 = arith.constant 144 : index
    %102 = vector.load %arg9[%c0_84, %c144] : memref<2x256xf32, #tpu.memory_space<vmem>>, vector<1x16xf32>
    %103 = vector.shape_cast %102 : vector<1x16xf32> to vector<16xf32>
    %c0_85 = arith.constant 0 : index
    %c12 = arith.constant 12 : index
    %c3_86 = arith.constant 3 : index
    %104 = vector.load %arg8[%c0_85, %c12, %c3_86] : memref<2x22x22xf32, #tpu.memory_space<vmem>>, vector<1x1x16xf32>
    %105 = vector.shape_cast %104 : vector<1x1x16xf32> to vector<16xf32>
    %106 = vector.shape_cast %103 : vector<16xf32> to vector<1x1x16xf32>
    tpu.vector_store %arg8[%c0_85, %c12, %c3_86], %106 {strides = array<i32>} : memref<2x22x22xf32, #tpu.memory_space<vmem>>, vector<1x1x16xf32>,
    %c1_87 = arith.constant 1 : index
    %c144_88 = arith.constant 144 : index
    %107 = vector.load %arg9[%c1_87, %c144_88] : memref<2x256xf32, #tpu.memory_space<vmem>>, vector<1x16xf32>
    %108 = vector.shape_cast %107 : vector<1x16xf32> to vector<16xf32>
    %c1_89 = arith.constant 1 : index
    %c12_90 = arith.constant 12 : index
    %c3_91 = arith.constant 3 : index
    %109 = vector.load %arg8[%c1_89, %c12_90, %c3_91] : memref<2x22x22xf32, #tpu.memory_space<vmem>>, vector<1x1x16xf32>
    %110 = vector.shape_cast %109 : vector<1x1x16xf32> to vector<16xf32>
    %111 = vector.shape_cast %108 : vector<16xf32> to vector<1x1x16xf32>
    tpu.vector_store %arg8[%c1_89, %c12_90, %c3_91], %111 {strides = array<i32>} : memref<2x22x22xf32, #tpu.memory_space<vmem>>, vector<1x1x16xf32>,
    %c0_92 = arith.constant 0 : index
    %c160 = arith.constant 160 : index
    %112 = vector.load %arg9[%c0_92, %c160] : memref<2x256xf32, #tpu.memory_space<vmem>>, vector<1x16xf32>
    %113 = vector.shape_cast %112 : vector<1x16xf32> to vector<16xf32>
    %c0_93 = arith.constant 0 : index
    %c13 = arith.constant 13 : index
    %c3_94 = arith.constant 3 : index
    %114 = vector.load %arg8[%c0_93, %c13, %c3_94] : memref<2x22x22xf32, #tpu.memory_space<vmem>>, vector<1x1x16xf32>
    %115 = vector.shape_cast %114 : vector<1x1x16xf32> to vector<16xf32>
    %116 = vector.shape_cast %113 : vector<16xf32> to vector<1x1x16xf32>
    tpu.vector_store %arg8[%c0_93, %c13, %c3_94], %116 {strides = array<i32>} : memref<2x22x22xf32, #tpu.memory_space<vmem>>, vector<1x1x16xf32>,
    %c1_95 = arith.constant 1 : index
    %c160_96 = arith.constant 160 : index
    %117 = vector.load %arg9[%c1_95, %c160_96] : memref<2x256xf32, #tpu.memory_space<vmem>>, vector<1x16xf32>
    %118 = vector.shape_cast %117 : vector<1x16xf32> to vector<16xf32>
    %c1_97 = arith.constant 1 : index
    %c13_98 = arith.constant 13 : index
    %c3_99 = arith.constant 3 : index
    %119 = vector.load %arg8[%c1_97, %c13_98, %c3_99] : memref<2x22x22xf32, #tpu.memory_space<vmem>>, vector<1x1x16xf32>
    %120 = vector.shape_cast %119 : vector<1x1x16xf32> to vector<16xf32>
    %121 = vector.shape_cast %118 : vector<16xf32> to vector<1x1x16xf32>
    tpu.vector_store %arg8[%c1_97, %c13_98, %c3_99], %121 {strides = array<i32>} : memref<2x22x22xf32, #tpu.memory_space<vmem>>, vector<1x1x16xf32>,
    %c0_100 = arith.constant 0 : index
    %c176 = arith.constant 176 : index
    %122 = vector.load %arg9[%c0_100, %c176] : memref<2x256xf32, #tpu.memory_space<vmem>>, vector<1x16xf32>
    %123 = vector.shape_cast %122 : vector<1x16xf32> to vector<16xf32>
    %c0_101 = arith.constant 0 : index
    %c14 = arith.constant 14 : index
    %c3_102 = arith.constant 3 : index
    %124 = vector.load %arg8[%c0_101, %c14, %c3_102] : memref<2x22x22xf32, #tpu.memory_space<vmem>>, vector<1x1x16xf32>
    %125 = vector.shape_cast %124 : vector<1x1x16xf32> to vector<16xf32>
    %126 = vector.shape_cast %123 : vector<16xf32> to vector<1x1x16xf32>
    tpu.vector_store %arg8[%c0_101, %c14, %c3_102], %126 {strides = array<i32>} : memref<2x22x22xf32, #tpu.memory_space<vmem>>, vector<1x1x16xf32>,
    %c1_103 = arith.constant 1 : index
    %c176_104 = arith.constant 176 : index
    %127 = vector.load %arg9[%c1_103, %c176_104] : memref<2x256xf32, #tpu.memory_space<vmem>>, vector<1x16xf32>
    %128 = vector.shape_cast %127 : vector<1x16xf32> to vector<16xf32>
    %c1_105 = arith.constant 1 : index
    %c14_106 = arith.constant 14 : index
    %c3_107 = arith.constant 3 : index
    %129 = vector.load %arg8[%c1_105, %c14_106, %c3_107] : memref<2x22x22xf32, #tpu.memory_space<vmem>>, vector<1x1x16xf32>
    %130 = vector.shape_cast %129 : vector<1x1x16xf32> to vector<16xf32>
    %131 = vector.shape_cast %128 : vector<16xf32> to vector<1x1x16xf32>
    tpu.vector_store %arg8[%c1_105, %c14_106, %c3_107], %131 {strides = array<i32>} : memref<2x22x22xf32, #tpu.memory_space<vmem>>, vector<1x1x16xf32>,
    %c0_108 = arith.constant 0 : index
    %c192 = arith.constant 192 : index
    %132 = vector.load %arg9[%c0_108, %c192] : memref<2x256xf32, #tpu.memory_space<vmem>>, vector<1x16xf32>
    %133 = vector.shape_cast %132 : vector<1x16xf32> to vector<16xf32>
    %c0_109 = arith.constant 0 : index
    %c15 = arith.constant 15 : index
    %c3_110 = arith.constant 3 : index
    %134 = vector.load %arg8[%c0_109, %c15, %c3_110] : memref<2x22x22xf32, #tpu.memory_space<vmem>>, vector<1x1x16xf32>
    %135 = vector.shape_cast %134 : vector<1x1x16xf32> to vector<16xf32>
    %136 = vector.shape_cast %133 : vector<16xf32> to vector<1x1x16xf32>
    tpu.vector_store %arg8[%c0_109, %c15, %c3_110], %136 {strides = array<i32>} : memref<2x22x22xf32, #tpu.memory_space<vmem>>, vector<1x1x16xf32>,
    %c1_111 = arith.constant 1 : index
    %c192_112 = arith.constant 192 : index
    %137 = vector.load %arg9[%c1_111, %c192_112] : memref<2x256xf32, #tpu.memory_space<vmem>>, vector<1x16xf32>
    %138 = vector.shape_cast %137 : vector<1x16xf32> to vector<16xf32>
    %c1_113 = arith.constant 1 : index
    %c15_114 = arith.constant 15 : index
    %c3_115 = arith.constant 3 : index
    %139 = vector.load %arg8[%c1_113, %c15_114, %c3_115] : memref<2x22x22xf32, #tpu.memory_space<vmem>>, vector<1x1x16xf32>
    %140 = vector.shape_cast %139 : vector<1x1x16xf32> to vector<16xf32>
    %141 = vector.shape_cast %138 : vector<16xf32> to vector<1x1x16xf32>
    tpu.vector_store %arg8[%c1_113, %c15_114, %c3_115], %141 {strides = array<i32>} : memref<2x22x22xf32, #tpu.memory_space<vmem>>, vector<1x1x16xf32>,
    %c0_116 = arith.constant 0 : index
    %c208 = arith.constant 208 : index
    %142 = vector.load %arg9[%c0_116, %c208] : memref<2x256xf32, #tpu.memory_space<vmem>>, vector<1x16xf32>
    %143 = vector.shape_cast %142 : vector<1x16xf32> to vector<16xf32>
    %c0_117 = arith.constant 0 : index
    %c16_118 = arith.constant 16 : index
    %c3_119 = arith.constant 3 : index
    %144 = vector.load %arg8[%c0_117, %c16_118, %c3_119] : memref<2x22x22xf32, #tpu.memory_space<vmem>>, vector<1x1x16xf32>
    %145 = vector.shape_cast %144 : vector<1x1x16xf32> to vector<16xf32>
    %146 = vector.shape_cast %143 : vector<16xf32> to vector<1x1x16xf32>
    tpu.vector_store %arg8[%c0_117, %c16_118, %c3_119], %146 {strides = array<i32>} : memref<2x22x22xf32, #tpu.memory_space<vmem>>, vector<1x1x16xf32>,
    %c1_120 = arith.constant 1 : index
    %c208_121 = arith.constant 208 : index
    %147 = vector.load %arg9[%c1_120, %c208_121] : memref<2x256xf32, #tpu.memory_space<vmem>>, vector<1x16xf32>
    %148 = vector.shape_cast %147 : vector<1x16xf32> to vector<16xf32>
    %c1_122 = arith.constant 1 : index
    %c16_123 = arith.constant 16 : index
    %c3_124 = arith.constant 3 : index
    %149 = vector.load %arg8[%c1_122, %c16_123, %c3_124] : memref<2x22x22xf32, #tpu.memory_space<vmem>>, vector<1x1x16xf32>
    %150 = vector.shape_cast %149 : vector<1x1x16xf32> to vector<16xf32>
    %151 = vector.shape_cast %148 : vector<16xf32> to vector<1x1x16xf32>
    tpu.vector_store %arg8[%c1_122, %c16_123, %c3_124], %151 {strides = array<i32>} : memref<2x22x22xf32, #tpu.memory_space<vmem>>, vector<1x1x16xf32>,
    %c0_125 = arith.constant 0 : index
    %c224 = arith.constant 224 : index
    %152 = vector.load %arg9[%c0_125, %c224] : memref<2x256xf32, #tpu.memory_space<vmem>>, vector<1x16xf32>
    %153 = vector.shape_cast %152 : vector<1x16xf32> to vector<16xf32>
    %c0_126 = arith.constant 0 : index
    %c17 = arith.constant 17 : index
    %c3_127 = arith.constant 3 : index
    %154 = vector.load %arg8[%c0_126, %c17, %c3_127] : memref<2x22x22xf32, #tpu.memory_space<vmem>>, vector<1x1x16xf32>
    %155 = vector.shape_cast %154 : vector<1x1x16xf32> to vector<16xf32>
    %156 = vector.shape_cast %153 : vector<16xf32> to vector<1x1x16xf32>
    tpu.vector_store %arg8[%c0_126, %c17, %c3_127], %156 {strides = array<i32>} : memref<2x22x22xf32, #tpu.memory_space<vmem>>, vector<1x1x16xf32>,
    %c1_128 = arith.constant 1 : index
    %c224_129 = arith.constant 224 : index
    %157 = vector.load %arg9[%c1_128, %c224_129] : memref<2x256xf32, #tpu.memory_space<vmem>>, vector<1x16xf32>
    %158 = vector.shape_cast %157 : vector<1x16xf32> to vector<16xf32>
    %c1_130 = arith.constant 1 : index
    %c17_131 = arith.constant 17 : index
    %c3_132 = arith.constant 3 : index
    %159 = vector.load %arg8[%c1_130, %c17_131, %c3_132] : memref<2x22x22xf32, #tpu.memory_space<vmem>>, vector<1x1x16xf32>
    %160 = vector.shape_cast %159 : vector<1x1x16xf32> to vector<16xf32>
    %161 = vector.shape_cast %158 : vector<16xf32> to vector<1x1x16xf32>
    tpu.vector_store %arg8[%c1_130, %c17_131, %c3_132], %161 {strides = array<i32>} : memref<2x22x22xf32, #tpu.memory_space<vmem>>, vector<1x1x16xf32>,
    %c0_133 = arith.constant 0 : index
    %c240 = arith.constant 240 : index
    %162 = vector.load %arg9[%c0_133, %c240] : memref<2x256xf32, #tpu.memory_space<vmem>>, vector<1x16xf32>
    %163 = vector.shape_cast %162 : vector<1x16xf32> to vector<16xf32>
    %c0_134 = arith.constant 0 : index
    %c18 = arith.constant 18 : index
    %c3_135 = arith.constant 3 : index
    %164 = vector.load %arg8[%c0_134, %c18, %c3_135] : memref<2x22x22xf32, #tpu.memory_space<vmem>>, vector<1x1x16xf32>
    %165 = vector.shape_cast %164 : vector<1x1x16xf32> to vector<16xf32>
    %166 = vector.shape_cast %163 : vector<16xf32> to vector<1x1x16xf32>
    tpu.vector_store %arg8[%c0_134, %c18, %c3_135], %166 {strides = array<i32>} : memref<2x22x22xf32, #tpu.memory_space<vmem>>, vector<1x1x16xf32>,
    %c1_136 = arith.constant 1 : index
    %c240_137 = arith.constant 240 : index
    %167 = vector.load %arg9[%c1_136, %c240_137] : memref<2x256xf32, #tpu.memory_space<vmem>>, vector<1x16xf32>
    %168 = vector.shape_cast %167 : vector<1x16xf32> to vector<16xf32>
    %c1_138 = arith.constant 1 : index
    %c18_139 = arith.constant 18 : index
    %c3_140 = arith.constant 3 : index
    %169 = vector.load %arg8[%c1_138, %c18_139, %c3_140] : memref<2x22x22xf32, #tpu.memory_space<vmem>>, vector<1x1x16xf32>
    %170 = vector.shape_cast %169 : vector<1x1x16xf32> to vector<16xf32>
    %171 = vector.shape_cast %168 : vector<16xf32> to vector<1x1x16xf32>
    tpu.vector_store %arg8[%c1_138, %c18_139, %c3_140], %171 {strides = array<i32>} : memref<2x22x22xf32, #tpu.memory_space<vmem>>, vector<1x1x16xf32>,
    %cst_141 = arith.constant 0.000000e+00 : f32
    %172 = vector.broadcast %cst_141 : f32 to vector<16x16xf32>
    %cst_142 = arith.constant 0.000000e+00 : f32
    %173 = vector.broadcast %cst_142 : f32 to vector<16x16xf32>
    %cst_143 = arith.constant 0.000000e+00 : f32
    %174 = vector.broadcast %cst_143 : f32 to vector<16x16xf32>
    %cst_144 = arith.constant 0.000000e+00 : f32
    %175 = vector.broadcast %cst_144 : f32 to vector<16x16xf32>
    %c0_145 = arith.constant 0 : index
    %176 = memref.load %arg2[%c0_145] : memref<98xf32, #tpu.memory_space<smem>>
    %c0_146 = arith.constant 0 : index
    %c0_147 = arith.constant 0 : index
    %c0_148 = arith.constant 0 : index
    %177 = vector.load %arg8[%c0_146, %c0_147, %c0_148] : memref<2x22x22xf32, #tpu.memory_space<vmem>>, vector<1x16x16xf32>
    %178 = vector.shape_cast %177 : vector<1x16x16xf32> to vector<16x16xf32>
    %179 = vector.broadcast %176 : f32 to vector<16x16xf32>
    %180 = arith.mulf %179, %178 : vector<16x16xf32>
    %181 = arith.addf %172, %180 : vector<16x16xf32>
    %c1_149 = arith.constant 1 : index
    %182 = memref.load %arg2[%c1_149] : memref<98xf32, #tpu.memory_space<smem>>
    %c0_150 = arith.constant 0 : index
    %c0_151 = arith.constant 0 : index
    %c1_152 = arith.constant 1 : index
    %183 = vector.load %arg8[%c0_150, %c0_151, %c1_152] : memref<2x22x22xf32, #tpu.memory_space<vmem>>, vector<1x16x16xf32>
    %184 = vector.shape_cast %183 : vector<1x16x16xf32> to vector<16x16xf32>
    %185 = vector.broadcast %182 : f32 to vector<16x16xf32>
    %186 = arith.mulf %185, %184 : vector<16x16xf32>
    %187 = arith.addf %181, %186 : vector<16x16xf32>
    %c2 = arith.constant 2 : index
    %188 = memref.load %arg2[%c2] : memref<98xf32, #tpu.memory_space<smem>>
    %c0_153 = arith.constant 0 : index
    %c0_154 = arith.constant 0 : index
    %c2_155 = arith.constant 2 : index
    %189 = vector.load %arg8[%c0_153, %c0_154, %c2_155] : memref<2x22x22xf32, #tpu.memory_space<vmem>>, vector<1x16x16xf32>
    %190 = vector.shape_cast %189 : vector<1x16x16xf32> to vector<16x16xf32>
    %191 = vector.broadcast %188 : f32 to vector<16x16xf32>
    %192 = arith.mulf %191, %190 : vector<16x16xf32>
    %193 = arith.addf %187, %192 : vector<16x16xf32>
    %c3_156 = arith.constant 3 : index
    %194 = memref.load %arg2[%c3_156] : memref<98xf32, #tpu.memory_space<smem>>
    %c0_157 = arith.constant 0 : index
    %c0_158 = arith.constant 0 : index
    %c3_159 = arith.constant 3 : index
    %195 = vector.load %arg8[%c0_157, %c0_158, %c3_159] : memref<2x22x22xf32, #tpu.memory_space<vmem>>, vector<1x16x16xf32>
    %196 = vector.shape_cast %195 : vector<1x16x16xf32> to vector<16x16xf32>
    %197 = vector.broadcast %194 : f32 to vector<16x16xf32>
    %198 = arith.mulf %197, %196 : vector<16x16xf32>
    %199 = arith.addf %193, %198 : vector<16x16xf32>
    %c4_160 = arith.constant 4 : index
    %200 = memref.load %arg2[%c4_160] : memref<98xf32, #tpu.memory_space<smem>>
    %c0_161 = arith.constant 0 : index
    %c0_162 = arith.constant 0 : index
    %c4_163 = arith.constant 4 : index
    %201 = vector.load %arg8[%c0_161, %c0_162, %c4_163] : memref<2x22x22xf32, #tpu.memory_space<vmem>>, vector<1x16x16xf32>
    %202 = vector.shape_cast %201 : vector<1x16x16xf32> to vector<16x16xf32>
    %203 = vector.broadcast %200 : f32 to vector<16x16xf32>
    %204 = arith.mulf %203, %202 : vector<16x16xf32>
    %205 = arith.addf %199, %204 : vector<16x16xf32>
    %c5_164 = arith.constant 5 : index
    %206 = memref.load %arg2[%c5_164] : memref<98xf32, #tpu.memory_space<smem>>
    %c0_165 = arith.constant 0 : index
    %c0_166 = arith.constant 0 : index
    %c5_167 = arith.constant 5 : index
    %207 = vector.load %arg8[%c0_165, %c0_166, %c5_167] : memref<2x22x22xf32, #tpu.memory_space<vmem>>, vector<1x16x16xf32>
    %208 = vector.shape_cast %207 : vector<1x16x16xf32> to vector<16x16xf32>
    %209 = vector.broadcast %206 : f32 to vector<16x16xf32>
    %210 = arith.mulf %209, %208 : vector<16x16xf32>
    %211 = arith.addf %205, %210 : vector<16x16xf32>
    %c6_168 = arith.constant 6 : index
    %212 = memref.load %arg2[%c6_168] : memref<98xf32, #tpu.memory_space<smem>>
    %c0_169 = arith.constant 0 : index
    %c0_170 = arith.constant 0 : index
    %c6_171 = arith.constant 6 : index
    %213 = vector.load %arg8[%c0_169, %c0_170, %c6_171] : memref<2x22x22xf32, #tpu.memory_space<vmem>>, vector<1x16x16xf32>
    %214 = vector.shape_cast %213 : vector<1x16x16xf32> to vector<16x16xf32>
    %215 = vector.broadcast %212 : f32 to vector<16x16xf32>
    %216 = arith.mulf %215, %214 : vector<16x16xf32>
    %217 = arith.addf %211, %216 : vector<16x16xf32>
    %c7_172 = arith.constant 7 : index
    %218 = memref.load %arg2[%c7_172] : memref<98xf32, #tpu.memory_space<smem>>
    %c0_173 = arith.constant 0 : index
    %c1_174 = arith.constant 1 : index
    %c0_175 = arith.constant 0 : index
    %219 = vector.load %arg8[%c0_173, %c1_174, %c0_175] : memref<2x22x22xf32, #tpu.memory_space<vmem>>, vector<1x16x16xf32>
    %220 = vector.shape_cast %219 : vector<1x16x16xf32> to vector<16x16xf32>
    %221 = vector.broadcast %218 : f32 to vector<16x16xf32>
    %222 = arith.mulf %221, %220 : vector<16x16xf32>
    %223 = arith.addf %173, %222 : vector<16x16xf32>
    %c8_176 = arith.constant 8 : index
    %224 = memref.load %arg2[%c8_176] : memref<98xf32, #tpu.memory_space<smem>>
    %c0_177 = arith.constant 0 : index
    %c1_178 = arith.constant 1 : index
    %c1_179 = arith.constant 1 : index
    %225 = vector.load %arg8[%c0_177, %c1_178, %c1_179] : memref<2x22x22xf32, #tpu.memory_space<vmem>>, vector<1x16x16xf32>
    %226 = vector.shape_cast %225 : vector<1x16x16xf32> to vector<16x16xf32>
    %227 = vector.broadcast %224 : f32 to vector<16x16xf32>
    %228 = arith.mulf %227, %226 : vector<16x16xf32>
    %229 = arith.addf %223, %228 : vector<16x16xf32>
    %c9_180 = arith.constant 9 : index
    %230 = memref.load %arg2[%c9_180] : memref<98xf32, #tpu.memory_space<smem>>
    %c0_181 = arith.constant 0 : index
    %c1_182 = arith.constant 1 : index
    %c2_183 = arith.constant 2 : index
    %231 = vector.load %arg8[%c0_181, %c1_182, %c2_183] : memref<2x22x22xf32, #tpu.memory_space<vmem>>, vector<1x16x16xf32>
    %232 = vector.shape_cast %231 : vector<1x16x16xf32> to vector<16x16xf32>
    %233 = vector.broadcast %230 : f32 to vector<16x16xf32>
    %234 = arith.mulf %233, %232 : vector<16x16xf32>
    %235 = arith.addf %229, %234 : vector<16x16xf32>
    %c10_184 = arith.constant 10 : index
    %236 = memref.load %arg2[%c10_184] : memref<98xf32, #tpu.memory_space<smem>>
    %c0_185 = arith.constant 0 : index
    %c1_186 = arith.constant 1 : index
    %c3_187 = arith.constant 3 : index
    %237 = vector.load %arg8[%c0_185, %c1_186, %c3_187] : memref<2x22x22xf32, #tpu.memory_space<vmem>>, vector<1x16x16xf32>
    %238 = vector.shape_cast %237 : vector<1x16x16xf32> to vector<16x16xf32>
    %239 = vector.broadcast %236 : f32 to vector<16x16xf32>
    %240 = arith.mulf %239, %238 : vector<16x16xf32>
    %241 = arith.addf %235, %240 : vector<16x16xf32>
    %c11_188 = arith.constant 11 : index
    %242 = memref.load %arg2[%c11_188] : memref<98xf32, #tpu.memory_space<smem>>
    %c0_189 = arith.constant 0 : index
    %c1_190 = arith.constant 1 : index
    %c4_191 = arith.constant 4 : index
    %243 = vector.load %arg8[%c0_189, %c1_190, %c4_191] : memref<2x22x22xf32, #tpu.memory_space<vmem>>, vector<1x16x16xf32>
    %244 = vector.shape_cast %243 : vector<1x16x16xf32> to vector<16x16xf32>
    %245 = vector.broadcast %242 : f32 to vector<16x16xf32>
    %246 = arith.mulf %245, %244 : vector<16x16xf32>
    %247 = arith.addf %241, %246 : vector<16x16xf32>
    %c12_192 = arith.constant 12 : index
    %248 = memref.load %arg2[%c12_192] : memref<98xf32, #tpu.memory_space<smem>>
    %c0_193 = arith.constant 0 : index
    %c1_194 = arith.constant 1 : index
    %c5_195 = arith.constant 5 : index
    %249 = vector.load %arg8[%c0_193, %c1_194, %c5_195] : memref<2x22x22xf32, #tpu.memory_space<vmem>>, vector<1x16x16xf32>
    %250 = vector.shape_cast %249 : vector<1x16x16xf32> to vector<16x16xf32>
    %251 = vector.broadcast %248 : f32 to vector<16x16xf32>
    %252 = arith.mulf %251, %250 : vector<16x16xf32>
    %253 = arith.addf %247, %252 : vector<16x16xf32>
    %c13_196 = arith.constant 13 : index
    %254 = memref.load %arg2[%c13_196] : memref<98xf32, #tpu.memory_space<smem>>
    %c0_197 = arith.constant 0 : index
    %c1_198 = arith.constant 1 : index
    %c6_199 = arith.constant 6 : index
    %255 = vector.load %arg8[%c0_197, %c1_198, %c6_199] : memref<2x22x22xf32, #tpu.memory_space<vmem>>, vector<1x16x16xf32>
    %256 = vector.shape_cast %255 : vector<1x16x16xf32> to vector<16x16xf32>
    %257 = vector.broadcast %254 : f32 to vector<16x16xf32>
    %258 = arith.mulf %257, %256 : vector<16x16xf32>
    %259 = arith.addf %253, %258 : vector<16x16xf32>
    %c14_200 = arith.constant 14 : index
    %260 = memref.load %arg2[%c14_200] : memref<98xf32, #tpu.memory_space<smem>>
    %c0_201 = arith.constant 0 : index
    %c2_202 = arith.constant 2 : index
    %c0_203 = arith.constant 0 : index
    %261 = vector.load %arg8[%c0_201, %c2_202, %c0_203] : memref<2x22x22xf32, #tpu.memory_space<vmem>>, vector<1x16x16xf32>
    %262 = vector.shape_cast %261 : vector<1x16x16xf32> to vector<16x16xf32>
    %263 = vector.broadcast %260 : f32 to vector<16x16xf32>
    %264 = arith.mulf %263, %262 : vector<16x16xf32>
    %265 = arith.addf %217, %264 : vector<16x16xf32>
    %c15_204 = arith.constant 15 : index
    %266 = memref.load %arg2[%c15_204] : memref<98xf32, #tpu.memory_space<smem>>
    %c0_205 = arith.constant 0 : index
    %c2_206 = arith.constant 2 : index
    %c1_207 = arith.constant 1 : index
    %267 = vector.load %arg8[%c0_205, %c2_206, %c1_207] : memref<2x22x22xf32, #tpu.memory_space<vmem>>, vector<1x16x16xf32>
    %268 = vector.shape_cast %267 : vector<1x16x16xf32> to vector<16x16xf32>
    %269 = vector.broadcast %266 : f32 to vector<16x16xf32>
    %270 = arith.mulf %269, %268 : vector<16x16xf32>
    %271 = arith.addf %265, %270 : vector<16x16xf32>
    %c16_208 = arith.constant 16 : index
    %272 = memref.load %arg2[%c16_208] : memref<98xf32, #tpu.memory_space<smem>>
    %c0_209 = arith.constant 0 : index
    %c2_210 = arith.constant 2 : index
    %c2_211 = arith.constant 2 : index
    %273 = vector.load %arg8[%c0_209, %c2_210, %c2_211] : memref<2x22x22xf32, #tpu.memory_space<vmem>>, vector<1x16x16xf32>
    %274 = vector.shape_cast %273 : vector<1x16x16xf32> to vector<16x16xf32>
    %275 = vector.broadcast %272 : f32 to vector<16x16xf32>
    %276 = arith.mulf %275, %274 : vector<16x16xf32>
    %277 = arith.addf %271, %276 : vector<16x16xf32>
    %c17_212 = arith.constant 17 : index
    %278 = memref.load %arg2[%c17_212] : memref<98xf32, #tpu.memory_space<smem>>
    %c0_213 = arith.constant 0 : index
    %c2_214 = arith.constant 2 : index
    %c3_215 = arith.constant 3 : index
    %279 = vector.load %arg8[%c0_213, %c2_214, %c3_215] : memref<2x22x22xf32, #tpu.memory_space<vmem>>, vector<1x16x16xf32>
    %280 = vector.shape_cast %279 : vector<1x16x16xf32> to vector<16x16xf32>
    %281 = vector.broadcast %278 : f32 to vector<16x16xf32>
    %282 = arith.mulf %281, %280 : vector<16x16xf32>
    %283 = arith.addf %277, %282 : vector<16x16xf32>
    %c18_216 = arith.constant 18 : index
    %284 = memref.load %arg2[%c18_216] : memref<98xf32, #tpu.memory_space<smem>>
    %c0_217 = arith.constant 0 : index
    %c2_218 = arith.constant 2 : index
    %c4_219 = arith.constant 4 : index
    %285 = vector.load %arg8[%c0_217, %c2_218, %c4_219] : memref<2x22x22xf32, #tpu.memory_space<vmem>>, vector<1x16x16xf32>
    %286 = vector.shape_cast %285 : vector<1x16x16xf32> to vector<16x16xf32>
    %287 = vector.broadcast %284 : f32 to vector<16x16xf32>
    %288 = arith.mulf %287, %286 : vector<16x16xf32>
    %289 = arith.addf %283, %288 : vector<16x16xf32>
    %c19 = arith.constant 19 : index
    %290 = memref.load %arg2[%c19] : memref<98xf32, #tpu.memory_space<smem>>
    %c0_220 = arith.constant 0 : index
    %c2_221 = arith.constant 2 : index
    %c5_222 = arith.constant 5 : index
    %291 = vector.load %arg8[%c0_220, %c2_221, %c5_222] : memref<2x22x22xf32, #tpu.memory_space<vmem>>, vector<1x16x16xf32>
    %292 = vector.shape_cast %291 : vector<1x16x16xf32> to vector<16x16xf32>
    %293 = vector.broadcast %290 : f32 to vector<16x16xf32>
    %294 = arith.mulf %293, %292 : vector<16x16xf32>
    %295 = arith.addf %289, %294 : vector<16x16xf32>
    %c20 = arith.constant 20 : index
    %296 = memref.load %arg2[%c20] : memref<98xf32, #tpu.memory_space<smem>>
    %c0_223 = arith.constant 0 : index
    %c2_224 = arith.constant 2 : index
    %c6_225 = arith.constant 6 : index
    %297 = vector.load %arg8[%c0_223, %c2_224, %c6_225] : memref<2x22x22xf32, #tpu.memory_space<vmem>>, vector<1x16x16xf32>
    %298 = vector.shape_cast %297 : vector<1x16x16xf32> to vector<16x16xf32>
    %299 = vector.broadcast %296 : f32 to vector<16x16xf32>
    %300 = arith.mulf %299, %298 : vector<16x16xf32>
    %301 = arith.addf %295, %300 : vector<16x16xf32>
    %c21 = arith.constant 21 : index
    %302 = memref.load %arg2[%c21] : memref<98xf32, #tpu.memory_space<smem>>
    %c0_226 = arith.constant 0 : index
    %c3_227 = arith.constant 3 : index
    %c0_228 = arith.constant 0 : index
    %303 = vector.load %arg8[%c0_226, %c3_227, %c0_228] : memref<2x22x22xf32, #tpu.memory_space<vmem>>, vector<1x16x16xf32>
    %304 = vector.shape_cast %303 : vector<1x16x16xf32> to vector<16x16xf32>
    %305 = vector.broadcast %302 : f32 to vector<16x16xf32>
    %306 = arith.mulf %305, %304 : vector<16x16xf32>
    %307 = arith.addf %259, %306 : vector<16x16xf32>
    %c22 = arith.constant 22 : index
    %308 = memref.load %arg2[%c22] : memref<98xf32, #tpu.memory_space<smem>>
    %c0_229 = arith.constant 0 : index
    %c3_230 = arith.constant 3 : index
    %c1_231 = arith.constant 1 : index
    %309 = vector.load %arg8[%c0_229, %c3_230, %c1_231] : memref<2x22x22xf32, #tpu.memory_space<vmem>>, vector<1x16x16xf32>
    %310 = vector.shape_cast %309 : vector<1x16x16xf32> to vector<16x16xf32>
    %311 = vector.broadcast %308 : f32 to vector<16x16xf32>
    %312 = arith.mulf %311, %310 : vector<16x16xf32>
    %313 = arith.addf %307, %312 : vector<16x16xf32>
    %c23 = arith.constant 23 : index
    %314 = memref.load %arg2[%c23] : memref<98xf32, #tpu.memory_space<smem>>
    %c0_232 = arith.constant 0 : index
    %c3_233 = arith.constant 3 : index
    %c2_234 = arith.constant 2 : index
    %315 = vector.load %arg8[%c0_232, %c3_233, %c2_234] : memref<2x22x22xf32, #tpu.memory_space<vmem>>, vector<1x16x16xf32>
    %316 = vector.shape_cast %315 : vector<1x16x16xf32> to vector<16x16xf32>
    %317 = vector.broadcast %314 : f32 to vector<16x16xf32>
    %318 = arith.mulf %317, %316 : vector<16x16xf32>
    %319 = arith.addf %313, %318 : vector<16x16xf32>
    %c24 = arith.constant 24 : index
    %320 = memref.load %arg2[%c24] : memref<98xf32, #tpu.memory_space<smem>>
    %c0_235 = arith.constant 0 : index
    %c3_236 = arith.constant 3 : index
    %c3_237 = arith.constant 3 : index
    %321 = vector.load %arg8[%c0_235, %c3_236, %c3_237] : memref<2x22x22xf32, #tpu.memory_space<vmem>>, vector<1x16x16xf32>
    %322 = vector.shape_cast %321 : vector<1x16x16xf32> to vector<16x16xf32>
    %323 = vector.broadcast %320 : f32 to vector<16x16xf32>
    %324 = arith.mulf %323, %322 : vector<16x16xf32>
    %325 = arith.addf %319, %324 : vector<16x16xf32>
    %c25 = arith.constant 25 : index
    %326 = memref.load %arg2[%c25] : memref<98xf32, #tpu.memory_space<smem>>
    %c0_238 = arith.constant 0 : index
    %c3_239 = arith.constant 3 : index
    %c4_240 = arith.constant 4 : index
    %327 = vector.load %arg8[%c0_238, %c3_239, %c4_240] : memref<2x22x22xf32, #tpu.memory_space<vmem>>, vector<1x16x16xf32>
    %328 = vector.shape_cast %327 : vector<1x16x16xf32> to vector<16x16xf32>
    %329 = vector.broadcast %326 : f32 to vector<16x16xf32>
    %330 = arith.mulf %329, %328 : vector<16x16xf32>
    %331 = arith.addf %325, %330 : vector<16x16xf32>
    %c26 = arith.constant 26 : index
    %332 = memref.load %arg2[%c26] : memref<98xf32, #tpu.memory_space<smem>>
    %c0_241 = arith.constant 0 : index
    %c3_242 = arith.constant 3 : index
    %c5_243 = arith.constant 5 : index
    %333 = vector.load %arg8[%c0_241, %c3_242, %c5_243] : memref<2x22x22xf32, #tpu.memory_space<vmem>>, vector<1x16x16xf32>
    %334 = vector.shape_cast %333 : vector<1x16x16xf32> to vector<16x16xf32>
    %335 = vector.broadcast %332 : f32 to vector<16x16xf32>
    %336 = arith.mulf %335, %334 : vector<16x16xf32>
    %337 = arith.addf %331, %336 : vector<16x16xf32>
    %c27 = arith.constant 27 : index
    %338 = memref.load %arg2[%c27] : memref<98xf32, #tpu.memory_space<smem>>
    %c0_244 = arith.constant 0 : index
    %c3_245 = arith.constant 3 : index
    %c6_246 = arith.constant 6 : index
    %339 = vector.load %arg8[%c0_244, %c3_245, %c6_246] : memref<2x22x22xf32, #tpu.memory_space<vmem>>, vector<1x16x16xf32>
    %340 = vector.shape_cast %339 : vector<1x16x16xf32> to vector<16x16xf32>
    %341 = vector.broadcast %338 : f32 to vector<16x16xf32>
    %342 = arith.mulf %341, %340 : vector<16x16xf32>
    %343 = arith.addf %337, %342 : vector<16x16xf32>
    %c28 = arith.constant 28 : index
    %344 = memref.load %arg2[%c28] : memref<98xf32, #tpu.memory_space<smem>>
    %c0_247 = arith.constant 0 : index
    %c4_248 = arith.constant 4 : index
    %c0_249 = arith.constant 0 : index
    %345 = vector.load %arg8[%c0_247, %c4_248, %c0_249] : memref<2x22x22xf32, #tpu.memory_space<vmem>>, vector<1x16x16xf32>
    %346 = vector.shape_cast %345 : vector<1x16x16xf32> to vector<16x16xf32>
    %347 = vector.broadcast %344 : f32 to vector<16x16xf32>
    %348 = arith.mulf %347, %346 : vector<16x16xf32>
    %349 = arith.addf %301, %348 : vector<16x16xf32>
    %c29 = arith.constant 29 : index
    %350 = memref.load %arg2[%c29] : memref<98xf32, #tpu.memory_space<smem>>
    %c0_250 = arith.constant 0 : index
    %c4_251 = arith.constant 4 : index
    %c1_252 = arith.constant 1 : index
    %351 = vector.load %arg8[%c0_250, %c4_251, %c1_252] : memref<2x22x22xf32, #tpu.memory_space<vmem>>, vector<1x16x16xf32>
    %352 = vector.shape_cast %351 : vector<1x16x16xf32> to vector<16x16xf32>
    %353 = vector.broadcast %350 : f32 to vector<16x16xf32>
    %354 = arith.mulf %353, %352 : vector<16x16xf32>
    %355 = arith.addf %349, %354 : vector<16x16xf32>
    %c30 = arith.constant 30 : index
    %356 = memref.load %arg2[%c30] : memref<98xf32, #tpu.memory_space<smem>>
    %c0_253 = arith.constant 0 : index
    %c4_254 = arith.constant 4 : index
    %c2_255 = arith.constant 2 : index
    %357 = vector.load %arg8[%c0_253, %c4_254, %c2_255] : memref<2x22x22xf32, #tpu.memory_space<vmem>>, vector<1x16x16xf32>
    %358 = vector.shape_cast %357 : vector<1x16x16xf32> to vector<16x16xf32>
    %359 = vector.broadcast %356 : f32 to vector<16x16xf32>
    %360 = arith.mulf %359, %358 : vector<16x16xf32>
    %361 = arith.addf %355, %360 : vector<16x16xf32>
    %c31 = arith.constant 31 : index
    %362 = memref.load %arg2[%c31] : memref<98xf32, #tpu.memory_space<smem>>
    %c0_256 = arith.constant 0 : index
    %c4_257 = arith.constant 4 : index
    %c3_258 = arith.constant 3 : index
    %363 = vector.load %arg8[%c0_256, %c4_257, %c3_258] : memref<2x22x22xf32, #tpu.memory_space<vmem>>, vector<1x16x16xf32>
    %364 = vector.shape_cast %363 : vector<1x16x16xf32> to vector<16x16xf32>
    %365 = vector.broadcast %362 : f32 to vector<16x16xf32>
    %366 = arith.mulf %365, %364 : vector<16x16xf32>
    %367 = arith.addf %361, %366 : vector<16x16xf32>
    %c32_259 = arith.constant 32 : index
    %368 = memref.load %arg2[%c32_259] : memref<98xf32, #tpu.memory_space<smem>>
    %c0_260 = arith.constant 0 : index
    %c4_261 = arith.constant 4 : index
    %c4_262 = arith.constant 4 : index
    %369 = vector.load %arg8[%c0_260, %c4_261, %c4_262] : memref<2x22x22xf32, #tpu.memory_space<vmem>>, vector<1x16x16xf32>
    %370 = vector.shape_cast %369 : vector<1x16x16xf32> to vector<16x16xf32>
    %371 = vector.broadcast %368 : f32 to vector<16x16xf32>
    %372 = arith.mulf %371, %370 : vector<16x16xf32>
    %373 = arith.addf %367, %372 : vector<16x16xf32>
    %c33 = arith.constant 33 : index
    %374 = memref.load %arg2[%c33] : memref<98xf32, #tpu.memory_space<smem>>
    %c0_263 = arith.constant 0 : index
    %c4_264 = arith.constant 4 : index
    %c5_265 = arith.constant 5 : index
    %375 = vector.load %arg8[%c0_263, %c4_264, %c5_265] : memref<2x22x22xf32, #tpu.memory_space<vmem>>, vector<1x16x16xf32>
    %376 = vector.shape_cast %375 : vector<1x16x16xf32> to vector<16x16xf32>
    %377 = vector.broadcast %374 : f32 to vector<16x16xf32>
    %378 = arith.mulf %377, %376 : vector<16x16xf32>
    %379 = arith.addf %373, %378 : vector<16x16xf32>
    %c34 = arith.constant 34 : index
    %380 = memref.load %arg2[%c34] : memref<98xf32, #tpu.memory_space<smem>>
    %c0_266 = arith.constant 0 : index
    %c4_267 = arith.constant 4 : index
    %c6_268 = arith.constant 6 : index
    %381 = vector.load %arg8[%c0_266, %c4_267, %c6_268] : memref<2x22x22xf32, #tpu.memory_space<vmem>>, vector<1x16x16xf32>
    %382 = vector.shape_cast %381 : vector<1x16x16xf32> to vector<16x16xf32>
    %383 = vector.broadcast %380 : f32 to vector<16x16xf32>
    %384 = arith.mulf %383, %382 : vector<16x16xf32>
    %385 = arith.addf %379, %384 : vector<16x16xf32>
    %c35 = arith.constant 35 : index
    %386 = memref.load %arg2[%c35] : memref<98xf32, #tpu.memory_space<smem>>
    %c0_269 = arith.constant 0 : index
    %c5_270 = arith.constant 5 : index
    %c0_271 = arith.constant 0 : index
    %387 = vector.load %arg8[%c0_269, %c5_270, %c0_271] : memref<2x22x22xf32, #tpu.memory_space<vmem>>, vector<1x16x16xf32>
    %388 = vector.shape_cast %387 : vector<1x16x16xf32> to vector<16x16xf32>
    %389 = vector.broadcast %386 : f32 to vector<16x16xf32>
    %390 = arith.mulf %389, %388 : vector<16x16xf32>
    %391 = arith.addf %343, %390 : vector<16x16xf32>
    %c36 = arith.constant 36 : index
    %392 = memref.load %arg2[%c36] : memref<98xf32, #tpu.memory_space<smem>>
    %c0_272 = arith.constant 0 : index
    %c5_273 = arith.constant 5 : index
    %c1_274 = arith.constant 1 : index
    %393 = vector.load %arg8[%c0_272, %c5_273, %c1_274] : memref<2x22x22xf32, #tpu.memory_space<vmem>>, vector<1x16x16xf32>
    %394 = vector.shape_cast %393 : vector<1x16x16xf32> to vector<16x16xf32>
    %395 = vector.broadcast %392 : f32 to vector<16x16xf32>
    %396 = arith.mulf %395, %394 : vector<16x16xf32>
    %397 = arith.addf %391, %396 : vector<16x16xf32>
    %c37 = arith.constant 37 : index
    %398 = memref.load %arg2[%c37] : memref<98xf32, #tpu.memory_space<smem>>
    %c0_275 = arith.constant 0 : index
    %c5_276 = arith.constant 5 : index
    %c2_277 = arith.constant 2 : index
    %399 = vector.load %arg8[%c0_275, %c5_276, %c2_277] : memref<2x22x22xf32, #tpu.memory_space<vmem>>, vector<1x16x16xf32>
    %400 = vector.shape_cast %399 : vector<1x16x16xf32> to vector<16x16xf32>
    %401 = vector.broadcast %398 : f32 to vector<16x16xf32>
    %402 = arith.mulf %401, %400 : vector<16x16xf32>
    %403 = arith.addf %397, %402 : vector<16x16xf32>
    %c38 = arith.constant 38 : index
    %404 = memref.load %arg2[%c38] : memref<98xf32, #tpu.memory_space<smem>>
    %c0_278 = arith.constant 0 : index
    %c5_279 = arith.constant 5 : index
    %c3_280 = arith.constant 3 : index
    %405 = vector.load %arg8[%c0_278, %c5_279, %c3_280] : memref<2x22x22xf32, #tpu.memory_space<vmem>>, vector<1x16x16xf32>
    %406 = vector.shape_cast %405 : vector<1x16x16xf32> to vector<16x16xf32>
    %407 = vector.broadcast %404 : f32 to vector<16x16xf32>
    %408 = arith.mulf %407, %406 : vector<16x16xf32>
    %409 = arith.addf %403, %408 : vector<16x16xf32>
    %c39 = arith.constant 39 : index
    %410 = memref.load %arg2[%c39] : memref<98xf32, #tpu.memory_space<smem>>
    %c0_281 = arith.constant 0 : index
    %c5_282 = arith.constant 5 : index
    %c4_283 = arith.constant 4 : index
    %411 = vector.load %arg8[%c0_281, %c5_282, %c4_283] : memref<2x22x22xf32, #tpu.memory_space<vmem>>, vector<1x16x16xf32>
    %412 = vector.shape_cast %411 : vector<1x16x16xf32> to vector<16x16xf32>
    %413 = vector.broadcast %410 : f32 to vector<16x16xf32>
    %414 = arith.mulf %413, %412 : vector<16x16xf32>
    %415 = arith.addf %409, %414 : vector<16x16xf32>
    %c40 = arith.constant 40 : index
    %416 = memref.load %arg2[%c40] : memref<98xf32, #tpu.memory_space<smem>>
    %c0_284 = arith.constant 0 : index
    %c5_285 = arith.constant 5 : index
    %c5_286 = arith.constant 5 : index
    %417 = vector.load %arg8[%c0_284, %c5_285, %c5_286] : memref<2x22x22xf32, #tpu.memory_space<vmem>>, vector<1x16x16xf32>
    %418 = vector.shape_cast %417 : vector<1x16x16xf32> to vector<16x16xf32>
    %419 = vector.broadcast %416 : f32 to vector<16x16xf32>
    %420 = arith.mulf %419, %418 : vector<16x16xf32>
    %421 = arith.addf %415, %420 : vector<16x16xf32>
    %c41 = arith.constant 41 : index
    %422 = memref.load %arg2[%c41] : memref<98xf32, #tpu.memory_space<smem>>
    %c0_287 = arith.constant 0 : index
    %c5_288 = arith.constant 5 : index
    %c6_289 = arith.constant 6 : index
    %423 = vector.load %arg8[%c0_287, %c5_288, %c6_289] : memref<2x22x22xf32, #tpu.memory_space<vmem>>, vector<1x16x16xf32>
    %424 = vector.shape_cast %423 : vector<1x16x16xf32> to vector<16x16xf32>
    %425 = vector.broadcast %422 : f32 to vector<16x16xf32>
    %426 = arith.mulf %425, %424 : vector<16x16xf32>
    %427 = arith.addf %421, %426 : vector<16x16xf32>
    %c42 = arith.constant 42 : index
    %428 = memref.load %arg2[%c42] : memref<98xf32, #tpu.memory_space<smem>>
    %c0_290 = arith.constant 0 : index
    %c6_291 = arith.constant 6 : index
    %c0_292 = arith.constant 0 : index
    %429 = vector.load %arg8[%c0_290, %c6_291, %c0_292] : memref<2x22x22xf32, #tpu.memory_space<vmem>>, vector<1x16x16xf32>
    %430 = vector.shape_cast %429 : vector<1x16x16xf32> to vector<16x16xf32>
    %431 = vector.broadcast %428 : f32 to vector<16x16xf32>
    %432 = arith.mulf %431, %430 : vector<16x16xf32>
    %433 = arith.addf %385, %432 : vector<16x16xf32>
    %c43 = arith.constant 43 : index
    %434 = memref.load %arg2[%c43] : memref<98xf32, #tpu.memory_space<smem>>
    %c0_293 = arith.constant 0 : index
    %c6_294 = arith.constant 6 : index
    %c1_295 = arith.constant 1 : index
    %435 = vector.load %arg8[%c0_293, %c6_294, %c1_295] : memref<2x22x22xf32, #tpu.memory_space<vmem>>, vector<1x16x16xf32>
    %436 = vector.shape_cast %435 : vector<1x16x16xf32> to vector<16x16xf32>
    %437 = vector.broadcast %434 : f32 to vector<16x16xf32>
    %438 = arith.mulf %437, %436 : vector<16x16xf32>
    %439 = arith.addf %433, %438 : vector<16x16xf32>
    %c44 = arith.constant 44 : index
    %440 = memref.load %arg2[%c44] : memref<98xf32, #tpu.memory_space<smem>>
    %c0_296 = arith.constant 0 : index
    %c6_297 = arith.constant 6 : index
    %c2_298 = arith.constant 2 : index
    %441 = vector.load %arg8[%c0_296, %c6_297, %c2_298] : memref<2x22x22xf32, #tpu.memory_space<vmem>>, vector<1x16x16xf32>
    %442 = vector.shape_cast %441 : vector<1x16x16xf32> to vector<16x16xf32>
    %443 = vector.broadcast %440 : f32 to vector<16x16xf32>
    %444 = arith.mulf %443, %442 : vector<16x16xf32>
    %445 = arith.addf %439, %444 : vector<16x16xf32>
    %c45 = arith.constant 45 : index
    %446 = memref.load %arg2[%c45] : memref<98xf32, #tpu.memory_space<smem>>
    %c0_299 = arith.constant 0 : index
    %c6_300 = arith.constant 6 : index
    %c3_301 = arith.constant 3 : index
    %447 = vector.load %arg8[%c0_299, %c6_300, %c3_301] : memref<2x22x22xf32, #tpu.memory_space<vmem>>, vector<1x16x16xf32>
    %448 = vector.shape_cast %447 : vector<1x16x16xf32> to vector<16x16xf32>
    %449 = vector.broadcast %446 : f32 to vector<16x16xf32>
    %450 = arith.mulf %449, %448 : vector<16x16xf32>
    %451 = arith.addf %445, %450 : vector<16x16xf32>
    %c46 = arith.constant 46 : index
    %452 = memref.load %arg2[%c46] : memref<98xf32, #tpu.memory_space<smem>>
    %c0_302 = arith.constant 0 : index
    %c6_303 = arith.constant 6 : index
    %c4_304 = arith.constant 4 : index
    %453 = vector.load %arg8[%c0_302, %c6_303, %c4_304] : memref<2x22x22xf32, #tpu.memory_space<vmem>>, vector<1x16x16xf32>
    %454 = vector.shape_cast %453 : vector<1x16x16xf32> to vector<16x16xf32>
    %455 = vector.broadcast %452 : f32 to vector<16x16xf32>
    %456 = arith.mulf %455, %454 : vector<16x16xf32>
    %457 = arith.addf %451, %456 : vector<16x16xf32>
    %c47 = arith.constant 47 : index
    %458 = memref.load %arg2[%c47] : memref<98xf32, #tpu.memory_space<smem>>
    %c0_305 = arith.constant 0 : index
    %c6_306 = arith.constant 6 : index
    %c5_307 = arith.constant 5 : index
    %459 = vector.load %arg8[%c0_305, %c6_306, %c5_307] : memref<2x22x22xf32, #tpu.memory_space<vmem>>, vector<1x16x16xf32>
    %460 = vector.shape_cast %459 : vector<1x16x16xf32> to vector<16x16xf32>
    %461 = vector.broadcast %458 : f32 to vector<16x16xf32>
    %462 = arith.mulf %461, %460 : vector<16x16xf32>
    %463 = arith.addf %457, %462 : vector<16x16xf32>
    %c48_308 = arith.constant 48 : index
    %464 = memref.load %arg2[%c48_308] : memref<98xf32, #tpu.memory_space<smem>>
    %c0_309 = arith.constant 0 : index
    %c6_310 = arith.constant 6 : index
    %c6_311 = arith.constant 6 : index
    %465 = vector.load %arg8[%c0_309, %c6_310, %c6_311] : memref<2x22x22xf32, #tpu.memory_space<vmem>>, vector<1x16x16xf32>
    %466 = vector.shape_cast %465 : vector<1x16x16xf32> to vector<16x16xf32>
    %467 = vector.broadcast %464 : f32 to vector<16x16xf32>
    %468 = arith.mulf %467, %466 : vector<16x16xf32>
    %469 = arith.addf %463, %468 : vector<16x16xf32>
    %c49 = arith.constant 49 : index
    %470 = memref.load %arg2[%c49] : memref<98xf32, #tpu.memory_space<smem>>
    %c1_312 = arith.constant 1 : index
    %c0_313 = arith.constant 0 : index
    %c0_314 = arith.constant 0 : index
    %471 = vector.load %arg8[%c1_312, %c0_313, %c0_314] : memref<2x22x22xf32, #tpu.memory_space<vmem>>, vector<1x16x16xf32>
    %472 = vector.shape_cast %471 : vector<1x16x16xf32> to vector<16x16xf32>
    %473 = vector.broadcast %470 : f32 to vector<16x16xf32>
    %474 = arith.mulf %473, %472 : vector<16x16xf32>
    %475 = arith.addf %174, %474 : vector<16x16xf32>
    %c50 = arith.constant 50 : index
    %476 = memref.load %arg2[%c50] : memref<98xf32, #tpu.memory_space<smem>>
    %c1_315 = arith.constant 1 : index
    %c0_316 = arith.constant 0 : index
    %c1_317 = arith.constant 1 : index
    %477 = vector.load %arg8[%c1_315, %c0_316, %c1_317] : memref<2x22x22xf32, #tpu.memory_space<vmem>>, vector<1x16x16xf32>
    %478 = vector.shape_cast %477 : vector<1x16x16xf32> to vector<16x16xf32>
    %479 = vector.broadcast %476 : f32 to vector<16x16xf32>
    %480 = arith.mulf %479, %478 : vector<16x16xf32>
    %481 = arith.addf %475, %480 : vector<16x16xf32>
    %c51 = arith.constant 51 : index
    %482 = memref.load %arg2[%c51] : memref<98xf32, #tpu.memory_space<smem>>
    %c1_318 = arith.constant 1 : index
    %c0_319 = arith.constant 0 : index
    %c2_320 = arith.constant 2 : index
    %483 = vector.load %arg8[%c1_318, %c0_319, %c2_320] : memref<2x22x22xf32, #tpu.memory_space<vmem>>, vector<1x16x16xf32>
    %484 = vector.shape_cast %483 : vector<1x16x16xf32> to vector<16x16xf32>
    %485 = vector.broadcast %482 : f32 to vector<16x16xf32>
    %486 = arith.mulf %485, %484 : vector<16x16xf32>
    %487 = arith.addf %481, %486 : vector<16x16xf32>
    %c52 = arith.constant 52 : index
    %488 = memref.load %arg2[%c52] : memref<98xf32, #tpu.memory_space<smem>>
    %c1_321 = arith.constant 1 : index
    %c0_322 = arith.constant 0 : index
    %c3_323 = arith.constant 3 : index
    %489 = vector.load %arg8[%c1_321, %c0_322, %c3_323] : memref<2x22x22xf32, #tpu.memory_space<vmem>>, vector<1x16x16xf32>
    %490 = vector.shape_cast %489 : vector<1x16x16xf32> to vector<16x16xf32>
    %491 = vector.broadcast %488 : f32 to vector<16x16xf32>
    %492 = arith.mulf %491, %490 : vector<16x16xf32>
    %493 = arith.addf %487, %492 : vector<16x16xf32>
    %c53 = arith.constant 53 : index
    %494 = memref.load %arg2[%c53] : memref<98xf32, #tpu.memory_space<smem>>
    %c1_324 = arith.constant 1 : index
    %c0_325 = arith.constant 0 : index
    %c4_326 = arith.constant 4 : index
    %495 = vector.load %arg8[%c1_324, %c0_325, %c4_326] : memref<2x22x22xf32, #tpu.memory_space<vmem>>, vector<1x16x16xf32>
    %496 = vector.shape_cast %495 : vector<1x16x16xf32> to vector<16x16xf32>
    %497 = vector.broadcast %494 : f32 to vector<16x16xf32>
    %498 = arith.mulf %497, %496 : vector<16x16xf32>
    %499 = arith.addf %493, %498 : vector<16x16xf32>
    %c54 = arith.constant 54 : index
    %500 = memref.load %arg2[%c54] : memref<98xf32, #tpu.memory_space<smem>>
    %c1_327 = arith.constant 1 : index
    %c0_328 = arith.constant 0 : index
    %c5_329 = arith.constant 5 : index
    %501 = vector.load %arg8[%c1_327, %c0_328, %c5_329] : memref<2x22x22xf32, #tpu.memory_space<vmem>>, vector<1x16x16xf32>
    %502 = vector.shape_cast %501 : vector<1x16x16xf32> to vector<16x16xf32>
    %503 = vector.broadcast %500 : f32 to vector<16x16xf32>
    %504 = arith.mulf %503, %502 : vector<16x16xf32>
    %505 = arith.addf %499, %504 : vector<16x16xf32>
    %c55 = arith.constant 55 : index
    %506 = memref.load %arg2[%c55] : memref<98xf32, #tpu.memory_space<smem>>
    %c1_330 = arith.constant 1 : index
    %c0_331 = arith.constant 0 : index
    %c6_332 = arith.constant 6 : index
    %507 = vector.load %arg8[%c1_330, %c0_331, %c6_332] : memref<2x22x22xf32, #tpu.memory_space<vmem>>, vector<1x16x16xf32>
    %508 = vector.shape_cast %507 : vector<1x16x16xf32> to vector<16x16xf32>
    %509 = vector.broadcast %506 : f32 to vector<16x16xf32>
    %510 = arith.mulf %509, %508 : vector<16x16xf32>
    %511 = arith.addf %505, %510 : vector<16x16xf32>
    %c56 = arith.constant 56 : index
    %512 = memref.load %arg2[%c56] : memref<98xf32, #tpu.memory_space<smem>>
    %c1_333 = arith.constant 1 : index
    %c1_334 = arith.constant 1 : index
    %c0_335 = arith.constant 0 : index
    %513 = vector.load %arg8[%c1_333, %c1_334, %c0_335] : memref<2x22x22xf32, #tpu.memory_space<vmem>>, vector<1x16x16xf32>
    %514 = vector.shape_cast %513 : vector<1x16x16xf32> to vector<16x16xf32>
    %515 = vector.broadcast %512 : f32 to vector<16x16xf32>
    %516 = arith.mulf %515, %514 : vector<16x16xf32>
    %517 = arith.addf %175, %516 : vector<16x16xf32>
    %c57 = arith.constant 57 : index
    %518 = memref.load %arg2[%c57] : memref<98xf32, #tpu.memory_space<smem>>
    %c1_336 = arith.constant 1 : index
    %c1_337 = arith.constant 1 : index
    %c1_338 = arith.constant 1 : index
    %519 = vector.load %arg8[%c1_336, %c1_337, %c1_338] : memref<2x22x22xf32, #tpu.memory_space<vmem>>, vector<1x16x16xf32>
    %520 = vector.shape_cast %519 : vector<1x16x16xf32> to vector<16x16xf32>
    %521 = vector.broadcast %518 : f32 to vector<16x16xf32>
    %522 = arith.mulf %521, %520 : vector<16x16xf32>
    %523 = arith.addf %517, %522 : vector<16x16xf32>
    %c58 = arith.constant 58 : index
    %524 = memref.load %arg2[%c58] : memref<98xf32, #tpu.memory_space<smem>>
    %c1_339 = arith.constant 1 : index
    %c1_340 = arith.constant 1 : index
    %c2_341 = arith.constant 2 : index
    %525 = vector.load %arg8[%c1_339, %c1_340, %c2_341] : memref<2x22x22xf32, #tpu.memory_space<vmem>>, vector<1x16x16xf32>
    %526 = vector.shape_cast %525 : vector<1x16x16xf32> to vector<16x16xf32>
    %527 = vector.broadcast %524 : f32 to vector<16x16xf32>
    %528 = arith.mulf %527, %526 : vector<16x16xf32>
    %529 = arith.addf %523, %528 : vector<16x16xf32>
    %c59 = arith.constant 59 : index
    %530 = memref.load %arg2[%c59] : memref<98xf32, #tpu.memory_space<smem>>
    %c1_342 = arith.constant 1 : index
    %c1_343 = arith.constant 1 : index
    %c3_344 = arith.constant 3 : index
    %531 = vector.load %arg8[%c1_342, %c1_343, %c3_344] : memref<2x22x22xf32, #tpu.memory_space<vmem>>, vector<1x16x16xf32>
    %532 = vector.shape_cast %531 : vector<1x16x16xf32> to vector<16x16xf32>
    %533 = vector.broadcast %530 : f32 to vector<16x16xf32>
    %534 = arith.mulf %533, %532 : vector<16x16xf32>
    %535 = arith.addf %529, %534 : vector<16x16xf32>
    %c60 = arith.constant 60 : index
    %536 = memref.load %arg2[%c60] : memref<98xf32, #tpu.memory_space<smem>>
    %c1_345 = arith.constant 1 : index
    %c1_346 = arith.constant 1 : index
    %c4_347 = arith.constant 4 : index
    %537 = vector.load %arg8[%c1_345, %c1_346, %c4_347] : memref<2x22x22xf32, #tpu.memory_space<vmem>>, vector<1x16x16xf32>
    %538 = vector.shape_cast %537 : vector<1x16x16xf32> to vector<16x16xf32>
    %539 = vector.broadcast %536 : f32 to vector<16x16xf32>
    %540 = arith.mulf %539, %538 : vector<16x16xf32>
    %541 = arith.addf %535, %540 : vector<16x16xf32>
    %c61 = arith.constant 61 : index
    %542 = memref.load %arg2[%c61] : memref<98xf32, #tpu.memory_space<smem>>
    %c1_348 = arith.constant 1 : index
    %c1_349 = arith.constant 1 : index
    %c5_350 = arith.constant 5 : index
    %543 = vector.load %arg8[%c1_348, %c1_349, %c5_350] : memref<2x22x22xf32, #tpu.memory_space<vmem>>, vector<1x16x16xf32>
    %544 = vector.shape_cast %543 : vector<1x16x16xf32> to vector<16x16xf32>
    %545 = vector.broadcast %542 : f32 to vector<16x16xf32>
    %546 = arith.mulf %545, %544 : vector<16x16xf32>
    %547 = arith.addf %541, %546 : vector<16x16xf32>
    %c62 = arith.constant 62 : index
    %548 = memref.load %arg2[%c62] : memref<98xf32, #tpu.memory_space<smem>>
    %c1_351 = arith.constant 1 : index
    %c1_352 = arith.constant 1 : index
    %c6_353 = arith.constant 6 : index
    %549 = vector.load %arg8[%c1_351, %c1_352, %c6_353] : memref<2x22x22xf32, #tpu.memory_space<vmem>>, vector<1x16x16xf32>
    %550 = vector.shape_cast %549 : vector<1x16x16xf32> to vector<16x16xf32>
    %551 = vector.broadcast %548 : f32 to vector<16x16xf32>
    %552 = arith.mulf %551, %550 : vector<16x16xf32>
    %553 = arith.addf %547, %552 : vector<16x16xf32>
    %c63 = arith.constant 63 : index
    %554 = memref.load %arg2[%c63] : memref<98xf32, #tpu.memory_space<smem>>
    %c1_354 = arith.constant 1 : index
    %c2_355 = arith.constant 2 : index
    %c0_356 = arith.constant 0 : index
    %555 = vector.load %arg8[%c1_354, %c2_355, %c0_356] : memref<2x22x22xf32, #tpu.memory_space<vmem>>, vector<1x16x16xf32>
    %556 = vector.shape_cast %555 : vector<1x16x16xf32> to vector<16x16xf32>
    %557 = vector.broadcast %554 : f32 to vector<16x16xf32>
    %558 = arith.mulf %557, %556 : vector<16x16xf32>
    %559 = arith.addf %511, %558 : vector<16x16xf32>
    %c64_357 = arith.constant 64 : index
    %560 = memref.load %arg2[%c64_357] : memref<98xf32, #tpu.memory_space<smem>>
    %c1_358 = arith.constant 1 : index
    %c2_359 = arith.constant 2 : index
    %c1_360 = arith.constant 1 : index
    %561 = vector.load %arg8[%c1_358, %c2_359, %c1_360] : memref<2x22x22xf32, #tpu.memory_space<vmem>>, vector<1x16x16xf32>
    %562 = vector.shape_cast %561 : vector<1x16x16xf32> to vector<16x16xf32>
    %563 = vector.broadcast %560 : f32 to vector<16x16xf32>
    %564 = arith.mulf %563, %562 : vector<16x16xf32>
    %565 = arith.addf %559, %564 : vector<16x16xf32>
    %c65 = arith.constant 65 : index
    %566 = memref.load %arg2[%c65] : memref<98xf32, #tpu.memory_space<smem>>
    %c1_361 = arith.constant 1 : index
    %c2_362 = arith.constant 2 : index
    %c2_363 = arith.constant 2 : index
    %567 = vector.load %arg8[%c1_361, %c2_362, %c2_363] : memref<2x22x22xf32, #tpu.memory_space<vmem>>, vector<1x16x16xf32>
    %568 = vector.shape_cast %567 : vector<1x16x16xf32> to vector<16x16xf32>
    %569 = vector.broadcast %566 : f32 to vector<16x16xf32>
    %570 = arith.mulf %569, %568 : vector<16x16xf32>
    %571 = arith.addf %565, %570 : vector<16x16xf32>
    %c66 = arith.constant 66 : index
    %572 = memref.load %arg2[%c66] : memref<98xf32, #tpu.memory_space<smem>>
    %c1_364 = arith.constant 1 : index
    %c2_365 = arith.constant 2 : index
    %c3_366 = arith.constant 3 : index
    %573 = vector.load %arg8[%c1_364, %c2_365, %c3_366] : memref<2x22x22xf32, #tpu.memory_space<vmem>>, vector<1x16x16xf32>
    %574 = vector.shape_cast %573 : vector<1x16x16xf32> to vector<16x16xf32>
    %575 = vector.broadcast %572 : f32 to vector<16x16xf32>
    %576 = arith.mulf %575, %574 : vector<16x16xf32>
    %577 = arith.addf %571, %576 : vector<16x16xf32>
    %c67 = arith.constant 67 : index
    %578 = memref.load %arg2[%c67] : memref<98xf32, #tpu.memory_space<smem>>
    %c1_367 = arith.constant 1 : index
    %c2_368 = arith.constant 2 : index
    %c4_369 = arith.constant 4 : index
    %579 = vector.load %arg8[%c1_367, %c2_368, %c4_369] : memref<2x22x22xf32, #tpu.memory_space<vmem>>, vector<1x16x16xf32>
    %580 = vector.shape_cast %579 : vector<1x16x16xf32> to vector<16x16xf32>
    %581 = vector.broadcast %578 : f32 to vector<16x16xf32>
    %582 = arith.mulf %581, %580 : vector<16x16xf32>
    %583 = arith.addf %577, %582 : vector<16x16xf32>
    %c68 = arith.constant 68 : index
    %584 = memref.load %arg2[%c68] : memref<98xf32, #tpu.memory_space<smem>>
    %c1_370 = arith.constant 1 : index
    %c2_371 = arith.constant 2 : index
    %c5_372 = arith.constant 5 : index
    %585 = vector.load %arg8[%c1_370, %c2_371, %c5_372] : memref<2x22x22xf32, #tpu.memory_space<vmem>>, vector<1x16x16xf32>
    %586 = vector.shape_cast %585 : vector<1x16x16xf32> to vector<16x16xf32>
    %587 = vector.broadcast %584 : f32 to vector<16x16xf32>
    %588 = arith.mulf %587, %586 : vector<16x16xf32>
    %589 = arith.addf %583, %588 : vector<16x16xf32>
    %c69 = arith.constant 69 : index
    %590 = memref.load %arg2[%c69] : memref<98xf32, #tpu.memory_space<smem>>
    %c1_373 = arith.constant 1 : index
    %c2_374 = arith.constant 2 : index
    %c6_375 = arith.constant 6 : index
    %591 = vector.load %arg8[%c1_373, %c2_374, %c6_375] : memref<2x22x22xf32, #tpu.memory_space<vmem>>, vector<1x16x16xf32>
    %592 = vector.shape_cast %591 : vector<1x16x16xf32> to vector<16x16xf32>
    %593 = vector.broadcast %590 : f32 to vector<16x16xf32>
    %594 = arith.mulf %593, %592 : vector<16x16xf32>
    %595 = arith.addf %589, %594 : vector<16x16xf32>
    %c70 = arith.constant 70 : index
    %596 = memref.load %arg2[%c70] : memref<98xf32, #tpu.memory_space<smem>>
    %c1_376 = arith.constant 1 : index
    %c3_377 = arith.constant 3 : index
    %c0_378 = arith.constant 0 : index
    %597 = vector.load %arg8[%c1_376, %c3_377, %c0_378] : memref<2x22x22xf32, #tpu.memory_space<vmem>>, vector<1x16x16xf32>
    %598 = vector.shape_cast %597 : vector<1x16x16xf32> to vector<16x16xf32>
    %599 = vector.broadcast %596 : f32 to vector<16x16xf32>
    %600 = arith.mulf %599, %598 : vector<16x16xf32>
    %601 = arith.addf %553, %600 : vector<16x16xf32>
    %c71 = arith.constant 71 : index
    %602 = memref.load %arg2[%c71] : memref<98xf32, #tpu.memory_space<smem>>
    %c1_379 = arith.constant 1 : index
    %c3_380 = arith.constant 3 : index
    %c1_381 = arith.constant 1 : index
    %603 = vector.load %arg8[%c1_379, %c3_380, %c1_381] : memref<2x22x22xf32, #tpu.memory_space<vmem>>, vector<1x16x16xf32>
    %604 = vector.shape_cast %603 : vector<1x16x16xf32> to vector<16x16xf32>
    %605 = vector.broadcast %602 : f32 to vector<16x16xf32>
    %606 = arith.mulf %605, %604 : vector<16x16xf32>
    %607 = arith.addf %601, %606 : vector<16x16xf32>
    %c72 = arith.constant 72 : index
    %608 = memref.load %arg2[%c72] : memref<98xf32, #tpu.memory_space<smem>>
    %c1_382 = arith.constant 1 : index
    %c3_383 = arith.constant 3 : index
    %c2_384 = arith.constant 2 : index
    %609 = vector.load %arg8[%c1_382, %c3_383, %c2_384] : memref<2x22x22xf32, #tpu.memory_space<vmem>>, vector<1x16x16xf32>
    %610 = vector.shape_cast %609 : vector<1x16x16xf32> to vector<16x16xf32>
    %611 = vector.broadcast %608 : f32 to vector<16x16xf32>
    %612 = arith.mulf %611, %610 : vector<16x16xf32>
    %613 = arith.addf %607, %612 : vector<16x16xf32>
    %c73 = arith.constant 73 : index
    %614 = memref.load %arg2[%c73] : memref<98xf32, #tpu.memory_space<smem>>
    %c1_385 = arith.constant 1 : index
    %c3_386 = arith.constant 3 : index
    %c3_387 = arith.constant 3 : index
    %615 = vector.load %arg8[%c1_385, %c3_386, %c3_387] : memref<2x22x22xf32, #tpu.memory_space<vmem>>, vector<1x16x16xf32>
    %616 = vector.shape_cast %615 : vector<1x16x16xf32> to vector<16x16xf32>
    %617 = vector.broadcast %614 : f32 to vector<16x16xf32>
    %618 = arith.mulf %617, %616 : vector<16x16xf32>
    %619 = arith.addf %613, %618 : vector<16x16xf32>
    %c74 = arith.constant 74 : index
    %620 = memref.load %arg2[%c74] : memref<98xf32, #tpu.memory_space<smem>>
    %c1_388 = arith.constant 1 : index
    %c3_389 = arith.constant 3 : index
    %c4_390 = arith.constant 4 : index
    %621 = vector.load %arg8[%c1_388, %c3_389, %c4_390] : memref<2x22x22xf32, #tpu.memory_space<vmem>>, vector<1x16x16xf32>
    %622 = vector.shape_cast %621 : vector<1x16x16xf32> to vector<16x16xf32>
    %623 = vector.broadcast %620 : f32 to vector<16x16xf32>
    %624 = arith.mulf %623, %622 : vector<16x16xf32>
    %625 = arith.addf %619, %624 : vector<16x16xf32>
    %c75 = arith.constant 75 : index
    %626 = memref.load %arg2[%c75] : memref<98xf32, #tpu.memory_space<smem>>
    %c1_391 = arith.constant 1 : index
    %c3_392 = arith.constant 3 : index
    %c5_393 = arith.constant 5 : index
    %627 = vector.load %arg8[%c1_391, %c3_392, %c5_393] : memref<2x22x22xf32, #tpu.memory_space<vmem>>, vector<1x16x16xf32>
    %628 = vector.shape_cast %627 : vector<1x16x16xf32> to vector<16x16xf32>
    %629 = vector.broadcast %626 : f32 to vector<16x16xf32>
    %630 = arith.mulf %629, %628 : vector<16x16xf32>
    %631 = arith.addf %625, %630 : vector<16x16xf32>
    %c76 = arith.constant 76 : index
    %632 = memref.load %arg2[%c76] : memref<98xf32, #tpu.memory_space<smem>>
    %c1_394 = arith.constant 1 : index
    %c3_395 = arith.constant 3 : index
    %c6_396 = arith.constant 6 : index
    %633 = vector.load %arg8[%c1_394, %c3_395, %c6_396] : memref<2x22x22xf32, #tpu.memory_space<vmem>>, vector<1x16x16xf32>
    %634 = vector.shape_cast %633 : vector<1x16x16xf32> to vector<16x16xf32>
    %635 = vector.broadcast %632 : f32 to vector<16x16xf32>
    %636 = arith.mulf %635, %634 : vector<16x16xf32>
    %637 = arith.addf %631, %636 : vector<16x16xf32>
    %c77 = arith.constant 77 : index
    %638 = memref.load %arg2[%c77] : memref<98xf32, #tpu.memory_space<smem>>
    %c1_397 = arith.constant 1 : index
    %c4_398 = arith.constant 4 : index
    %c0_399 = arith.constant 0 : index
    %639 = vector.load %arg8[%c1_397, %c4_398, %c0_399] : memref<2x22x22xf32, #tpu.memory_space<vmem>>, vector<1x16x16xf32>
    %640 = vector.shape_cast %639 : vector<1x16x16xf32> to vector<16x16xf32>
    %641 = vector.broadcast %638 : f32 to vector<16x16xf32>
    %642 = arith.mulf %641, %640 : vector<16x16xf32>
    %643 = arith.addf %595, %642 : vector<16x16xf32>
    %c78 = arith.constant 78 : index
    %644 = memref.load %arg2[%c78] : memref<98xf32, #tpu.memory_space<smem>>
    %c1_400 = arith.constant 1 : index
    %c4_401 = arith.constant 4 : index
    %c1_402 = arith.constant 1 : index
    %645 = vector.load %arg8[%c1_400, %c4_401, %c1_402] : memref<2x22x22xf32, #tpu.memory_space<vmem>>, vector<1x16x16xf32>
    %646 = vector.shape_cast %645 : vector<1x16x16xf32> to vector<16x16xf32>
    %647 = vector.broadcast %644 : f32 to vector<16x16xf32>
    %648 = arith.mulf %647, %646 : vector<16x16xf32>
    %649 = arith.addf %643, %648 : vector<16x16xf32>
    %c79 = arith.constant 79 : index
    %650 = memref.load %arg2[%c79] : memref<98xf32, #tpu.memory_space<smem>>
    %c1_403 = arith.constant 1 : index
    %c4_404 = arith.constant 4 : index
    %c2_405 = arith.constant 2 : index
    %651 = vector.load %arg8[%c1_403, %c4_404, %c2_405] : memref<2x22x22xf32, #tpu.memory_space<vmem>>, vector<1x16x16xf32>
    %652 = vector.shape_cast %651 : vector<1x16x16xf32> to vector<16x16xf32>
    %653 = vector.broadcast %650 : f32 to vector<16x16xf32>
    %654 = arith.mulf %653, %652 : vector<16x16xf32>
    %655 = arith.addf %649, %654 : vector<16x16xf32>
    %c80_406 = arith.constant 80 : index
    %656 = memref.load %arg2[%c80_406] : memref<98xf32, #tpu.memory_space<smem>>
    %c1_407 = arith.constant 1 : index
    %c4_408 = arith.constant 4 : index
    %c3_409 = arith.constant 3 : index
    %657 = vector.load %arg8[%c1_407, %c4_408, %c3_409] : memref<2x22x22xf32, #tpu.memory_space<vmem>>, vector<1x16x16xf32>
    %658 = vector.shape_cast %657 : vector<1x16x16xf32> to vector<16x16xf32>
    %659 = vector.broadcast %656 : f32 to vector<16x16xf32>
    %660 = arith.mulf %659, %658 : vector<16x16xf32>
    %661 = arith.addf %655, %660 : vector<16x16xf32>
    %c81 = arith.constant 81 : index
    %662 = memref.load %arg2[%c81] : memref<98xf32, #tpu.memory_space<smem>>
    %c1_410 = arith.constant 1 : index
    %c4_411 = arith.constant 4 : index
    %c4_412 = arith.constant 4 : index
    %663 = vector.load %arg8[%c1_410, %c4_411, %c4_412] : memref<2x22x22xf32, #tpu.memory_space<vmem>>, vector<1x16x16xf32>
    %664 = vector.shape_cast %663 : vector<1x16x16xf32> to vector<16x16xf32>
    %665 = vector.broadcast %662 : f32 to vector<16x16xf32>
    %666 = arith.mulf %665, %664 : vector<16x16xf32>
    %667 = arith.addf %661, %666 : vector<16x16xf32>
    %c82 = arith.constant 82 : index
    %668 = memref.load %arg2[%c82] : memref<98xf32, #tpu.memory_space<smem>>
    %c1_413 = arith.constant 1 : index
    %c4_414 = arith.constant 4 : index
    %c5_415 = arith.constant 5 : index
    %669 = vector.load %arg8[%c1_413, %c4_414, %c5_415] : memref<2x22x22xf32, #tpu.memory_space<vmem>>, vector<1x16x16xf32>
    %670 = vector.shape_cast %669 : vector<1x16x16xf32> to vector<16x16xf32>
    %671 = vector.broadcast %668 : f32 to vector<16x16xf32>
    %672 = arith.mulf %671, %670 : vector<16x16xf32>
    %673 = arith.addf %667, %672 : vector<16x16xf32>
    %c83 = arith.constant 83 : index
    %674 = memref.load %arg2[%c83] : memref<98xf32, #tpu.memory_space<smem>>
    %c1_416 = arith.constant 1 : index
    %c4_417 = arith.constant 4 : index
    %c6_418 = arith.constant 6 : index
    %675 = vector.load %arg8[%c1_416, %c4_417, %c6_418] : memref<2x22x22xf32, #tpu.memory_space<vmem>>, vector<1x16x16xf32>
    %676 = vector.shape_cast %675 : vector<1x16x16xf32> to vector<16x16xf32>
    %677 = vector.broadcast %674 : f32 to vector<16x16xf32>
    %678 = arith.mulf %677, %676 : vector<16x16xf32>
    %679 = arith.addf %673, %678 : vector<16x16xf32>
    %c84 = arith.constant 84 : index
    %680 = memref.load %arg2[%c84] : memref<98xf32, #tpu.memory_space<smem>>
    %c1_419 = arith.constant 1 : index
    %c5_420 = arith.constant 5 : index
    %c0_421 = arith.constant 0 : index
    %681 = vector.load %arg8[%c1_419, %c5_420, %c0_421] : memref<2x22x22xf32, #tpu.memory_space<vmem>>, vector<1x16x16xf32>
    %682 = vector.shape_cast %681 : vector<1x16x16xf32> to vector<16x16xf32>
    %683 = vector.broadcast %680 : f32 to vector<16x16xf32>
    %684 = arith.mulf %683, %682 : vector<16x16xf32>
    %685 = arith.addf %637, %684 : vector<16x16xf32>
    %c85 = arith.constant 85 : index
    %686 = memref.load %arg2[%c85] : memref<98xf32, #tpu.memory_space<smem>>
    %c1_422 = arith.constant 1 : index
    %c5_423 = arith.constant 5 : index
    %c1_424 = arith.constant 1 : index
    %687 = vector.load %arg8[%c1_422, %c5_423, %c1_424] : memref<2x22x22xf32, #tpu.memory_space<vmem>>, vector<1x16x16xf32>
    %688 = vector.shape_cast %687 : vector<1x16x16xf32> to vector<16x16xf32>
    %689 = vector.broadcast %686 : f32 to vector<16x16xf32>
    %690 = arith.mulf %689, %688 : vector<16x16xf32>
    %691 = arith.addf %685, %690 : vector<16x16xf32>
    %c86 = arith.constant 86 : index
    %692 = memref.load %arg2[%c86] : memref<98xf32, #tpu.memory_space<smem>>
    %c1_425 = arith.constant 1 : index
    %c5_426 = arith.constant 5 : index
    %c2_427 = arith.constant 2 : index
    %693 = vector.load %arg8[%c1_425, %c5_426, %c2_427] : memref<2x22x22xf32, #tpu.memory_space<vmem>>, vector<1x16x16xf32>
    %694 = vector.shape_cast %693 : vector<1x16x16xf32> to vector<16x16xf32>
    %695 = vector.broadcast %692 : f32 to vector<16x16xf32>
    %696 = arith.mulf %695, %694 : vector<16x16xf32>
    %697 = arith.addf %691, %696 : vector<16x16xf32>
    %c87 = arith.constant 87 : index
    %698 = memref.load %arg2[%c87] : memref<98xf32, #tpu.memory_space<smem>>
    %c1_428 = arith.constant 1 : index
    %c5_429 = arith.constant 5 : index
    %c3_430 = arith.constant 3 : index
    %699 = vector.load %arg8[%c1_428, %c5_429, %c3_430] : memref<2x22x22xf32, #tpu.memory_space<vmem>>, vector<1x16x16xf32>
    %700 = vector.shape_cast %699 : vector<1x16x16xf32> to vector<16x16xf32>
    %701 = vector.broadcast %698 : f32 to vector<16x16xf32>
    %702 = arith.mulf %701, %700 : vector<16x16xf32>
    %703 = arith.addf %697, %702 : vector<16x16xf32>
    %c88 = arith.constant 88 : index
    %704 = memref.load %arg2[%c88] : memref<98xf32, #tpu.memory_space<smem>>
    %c1_431 = arith.constant 1 : index
    %c5_432 = arith.constant 5 : index
    %c4_433 = arith.constant 4 : index
    %705 = vector.load %arg8[%c1_431, %c5_432, %c4_433] : memref<2x22x22xf32, #tpu.memory_space<vmem>>, vector<1x16x16xf32>
    %706 = vector.shape_cast %705 : vector<1x16x16xf32> to vector<16x16xf32>
    %707 = vector.broadcast %704 : f32 to vector<16x16xf32>
    %708 = arith.mulf %707, %706 : vector<16x16xf32>
    %709 = arith.addf %703, %708 : vector<16x16xf32>
    %c89 = arith.constant 89 : index
    %710 = memref.load %arg2[%c89] : memref<98xf32, #tpu.memory_space<smem>>
    %c1_434 = arith.constant 1 : index
    %c5_435 = arith.constant 5 : index
    %c5_436 = arith.constant 5 : index
    %711 = vector.load %arg8[%c1_434, %c5_435, %c5_436] : memref<2x22x22xf32, #tpu.memory_space<vmem>>, vector<1x16x16xf32>
    %712 = vector.shape_cast %711 : vector<1x16x16xf32> to vector<16x16xf32>
    %713 = vector.broadcast %710 : f32 to vector<16x16xf32>
    %714 = arith.mulf %713, %712 : vector<16x16xf32>
    %715 = arith.addf %709, %714 : vector<16x16xf32>
    %c90 = arith.constant 90 : index
    %716 = memref.load %arg2[%c90] : memref<98xf32, #tpu.memory_space<smem>>
    %c1_437 = arith.constant 1 : index
    %c5_438 = arith.constant 5 : index
    %c6_439 = arith.constant 6 : index
    %717 = vector.load %arg8[%c1_437, %c5_438, %c6_439] : memref<2x22x22xf32, #tpu.memory_space<vmem>>, vector<1x16x16xf32>
    %718 = vector.shape_cast %717 : vector<1x16x16xf32> to vector<16x16xf32>
    %719 = vector.broadcast %716 : f32 to vector<16x16xf32>
    %720 = arith.mulf %719, %718 : vector<16x16xf32>
    %721 = arith.addf %715, %720 : vector<16x16xf32>
    %c91 = arith.constant 91 : index
    %722 = memref.load %arg2[%c91] : memref<98xf32, #tpu.memory_space<smem>>
    %c1_440 = arith.constant 1 : index
    %c6_441 = arith.constant 6 : index
    %c0_442 = arith.constant 0 : index
    %723 = vector.load %arg8[%c1_440, %c6_441, %c0_442] : memref<2x22x22xf32, #tpu.memory_space<vmem>>, vector<1x16x16xf32>
    %724 = vector.shape_cast %723 : vector<1x16x16xf32> to vector<16x16xf32>
    %725 = vector.broadcast %722 : f32 to vector<16x16xf32>
    %726 = arith.mulf %725, %724 : vector<16x16xf32>
    %727 = arith.addf %679, %726 : vector<16x16xf32>
    %c92 = arith.constant 92 : index
    %728 = memref.load %arg2[%c92] : memref<98xf32, #tpu.memory_space<smem>>
    %c1_443 = arith.constant 1 : index
    %c6_444 = arith.constant 6 : index
    %c1_445 = arith.constant 1 : index
    %729 = vector.load %arg8[%c1_443, %c6_444, %c1_445] : memref<2x22x22xf32, #tpu.memory_space<vmem>>, vector<1x16x16xf32>
    %730 = vector.shape_cast %729 : vector<1x16x16xf32> to vector<16x16xf32>
    %731 = vector.broadcast %728 : f32 to vector<16x16xf32>
    %732 = arith.mulf %731, %730 : vector<16x16xf32>
    %733 = arith.addf %727, %732 : vector<16x16xf32>
    %c93 = arith.constant 93 : index
    %734 = memref.load %arg2[%c93] : memref<98xf32, #tpu.memory_space<smem>>
    %c1_446 = arith.constant 1 : index
    %c6_447 = arith.constant 6 : index
    %c2_448 = arith.constant 2 : index
    %735 = vector.load %arg8[%c1_446, %c6_447, %c2_448] : memref<2x22x22xf32, #tpu.memory_space<vmem>>, vector<1x16x16xf32>
    %736 = vector.shape_cast %735 : vector<1x16x16xf32> to vector<16x16xf32>
    %737 = vector.broadcast %734 : f32 to vector<16x16xf32>
    %738 = arith.mulf %737, %736 : vector<16x16xf32>
    %739 = arith.addf %733, %738 : vector<16x16xf32>
    %c94 = arith.constant 94 : index
    %740 = memref.load %arg2[%c94] : memref<98xf32, #tpu.memory_space<smem>>
    %c1_449 = arith.constant 1 : index
    %c6_450 = arith.constant 6 : index
    %c3_451 = arith.constant 3 : index
    %741 = vector.load %arg8[%c1_449, %c6_450, %c3_451] : memref<2x22x22xf32, #tpu.memory_space<vmem>>, vector<1x16x16xf32>
    %742 = vector.shape_cast %741 : vector<1x16x16xf32> to vector<16x16xf32>
    %743 = vector.broadcast %740 : f32 to vector<16x16xf32>
    %744 = arith.mulf %743, %742 : vector<16x16xf32>
    %745 = arith.addf %739, %744 : vector<16x16xf32>
    %c95 = arith.constant 95 : index
    %746 = memref.load %arg2[%c95] : memref<98xf32, #tpu.memory_space<smem>>
    %c1_452 = arith.constant 1 : index
    %c6_453 = arith.constant 6 : index
    %c4_454 = arith.constant 4 : index
    %747 = vector.load %arg8[%c1_452, %c6_453, %c4_454] : memref<2x22x22xf32, #tpu.memory_space<vmem>>, vector<1x16x16xf32>
    %748 = vector.shape_cast %747 : vector<1x16x16xf32> to vector<16x16xf32>
    %749 = vector.broadcast %746 : f32 to vector<16x16xf32>
    %750 = arith.mulf %749, %748 : vector<16x16xf32>
    %751 = arith.addf %745, %750 : vector<16x16xf32>
    %c96_455 = arith.constant 96 : index
    %752 = memref.load %arg2[%c96_455] : memref<98xf32, #tpu.memory_space<smem>>
    %c1_456 = arith.constant 1 : index
    %c6_457 = arith.constant 6 : index
    %c5_458 = arith.constant 5 : index
    %753 = vector.load %arg8[%c1_456, %c6_457, %c5_458] : memref<2x22x22xf32, #tpu.memory_space<vmem>>, vector<1x16x16xf32>
    %754 = vector.shape_cast %753 : vector<1x16x16xf32> to vector<16x16xf32>
    %755 = vector.broadcast %752 : f32 to vector<16x16xf32>
    %756 = arith.mulf %755, %754 : vector<16x16xf32>
    %757 = arith.addf %751, %756 : vector<16x16xf32>
    %c97 = arith.constant 97 : index
    %758 = memref.load %arg2[%c97] : memref<98xf32, #tpu.memory_space<smem>>
    %c1_459 = arith.constant 1 : index
    %c6_460 = arith.constant 6 : index
    %c6_461 = arith.constant 6 : index
    %759 = vector.load %arg8[%c1_459, %c6_460, %c6_461] : memref<2x22x22xf32, #tpu.memory_space<vmem>>, vector<1x16x16xf32>
    %760 = vector.shape_cast %759 : vector<1x16x16xf32> to vector<16x16xf32>
    %761 = vector.broadcast %758 : f32 to vector<16x16xf32>
    %762 = arith.mulf %761, %760 : vector<16x16xf32>
    %763 = arith.addf %757, %762 : vector<16x16xf32>
    %764 = arith.addf %469, %427 : vector<16x16xf32>
    %765 = arith.addf %763, %721 : vector<16x16xf32>
    %766 = arith.addf %764, %765 : vector<16x16xf32>
    %767 = arith.negf %766 : vector<16x16xf32>
    %768 = math.exp %767 : vector<16x16xf32>
    %cst_462 = arith.constant 1.000000e+00 : f32
    %769 = vector.broadcast %cst_462 : f32 to vector<16x16xf32>
    %770 = arith.addf %769, %768 : vector<16x16xf32>
    %771 = arith.divf %769, %770 : vector<16x16xf32>
    %c0_463 = arith.constant 0 : index
    %c0_464 = arith.constant 0 : index
    %772 = vector.load %arg10[%c0_463, %c0_464] : memref<16x16xf32, #tpu.memory_space<vmem>>, vector<16x16xf32>
    tpu.vector_store %arg10[%c0_463, %c0_464], %771 {strides = array<i32>} : memref<16x16xf32, #tpu.memory_space<vmem>>, vector<16x16xf32>,
    %c0_465 = arith.constant 0 : index
    %c0_466 = arith.constant 0 : index
    %773 = vector.load %arg10[%c0_465, %c0_466] : memref<16x16xf32, #tpu.memory_space<vmem>>, vector<1x16xf32>
    %774 = vector.shape_cast %773 : vector<1x16xf32> to vector<16xf32>
    %c0_467 = arith.constant 0 : index
    %c0_468 = arith.constant 0 : index
    %775 = vector.load %arg11[%c0_467, %c0_468] : memref<1x256xf32, #tpu.memory_space<vmem>>, vector<1x16xf32>
    %776 = vector.shape_cast %775 : vector<1x16xf32> to vector<16xf32>
    %777 = vector.shape_cast %774 : vector<16xf32> to vector<1x16xf32>
    tpu.vector_store %arg11[%c0_467, %c0_468], %777 {strides = array<i32>} : memref<1x256xf32, #tpu.memory_space<vmem>>, vector<1x16xf32>,
    %c1_469 = arith.constant 1 : index
    %c0_470 = arith.constant 0 : index
    %778 = vector.load %arg10[%c1_469, %c0_470] : memref<16x16xf32, #tpu.memory_space<vmem>>, vector<1x16xf32>
    %779 = vector.shape_cast %778 : vector<1x16xf32> to vector<16xf32>
    %c0_471 = arith.constant 0 : index
    %c16_472 = arith.constant 16 : index
    %780 = vector.load %arg11[%c0_471, %c16_472] : memref<1x256xf32, #tpu.memory_space<vmem>>, vector<1x16xf32>
    %781 = vector.shape_cast %780 : vector<1x16xf32> to vector<16xf32>
    %782 = vector.shape_cast %779 : vector<16xf32> to vector<1x16xf32>
    tpu.vector_store %arg11[%c0_471, %c16_472], %782 {strides = array<i32>} : memref<1x256xf32, #tpu.memory_space<vmem>>, vector<1x16xf32>,
    %c2_473 = arith.constant 2 : index
    %c0_474 = arith.constant 0 : index
    %783 = vector.load %arg10[%c2_473, %c0_474] : memref<16x16xf32, #tpu.memory_space<vmem>>, vector<1x16xf32>
    %784 = vector.shape_cast %783 : vector<1x16xf32> to vector<16xf32>
    %c0_475 = arith.constant 0 : index
    %c32_476 = arith.constant 32 : index
    %785 = vector.load %arg11[%c0_475, %c32_476] : memref<1x256xf32, #tpu.memory_space<vmem>>, vector<1x16xf32>
    %786 = vector.shape_cast %785 : vector<1x16xf32> to vector<16xf32>
    %787 = vector.shape_cast %784 : vector<16xf32> to vector<1x16xf32>
    tpu.vector_store %arg11[%c0_475, %c32_476], %787 {strides = array<i32>} : memref<1x256xf32, #tpu.memory_space<vmem>>, vector<1x16xf32>,
    %c3_477 = arith.constant 3 : index
    %c0_478 = arith.constant 0 : index
    %788 = vector.load %arg10[%c3_477, %c0_478] : memref<16x16xf32, #tpu.memory_space<vmem>>, vector<1x16xf32>
    %789 = vector.shape_cast %788 : vector<1x16xf32> to vector<16xf32>
    %c0_479 = arith.constant 0 : index
    %c48_480 = arith.constant 48 : index
    %790 = vector.load %arg11[%c0_479, %c48_480] : memref<1x256xf32, #tpu.memory_space<vmem>>, vector<1x16xf32>
    %791 = vector.shape_cast %790 : vector<1x16xf32> to vector<16xf32>
    %792 = vector.shape_cast %789 : vector<16xf32> to vector<1x16xf32>
    tpu.vector_store %arg11[%c0_479, %c48_480], %792 {strides = array<i32>} : memref<1x256xf32, #tpu.memory_space<vmem>>, vector<1x16xf32>,
    %c4_481 = arith.constant 4 : index
    %c0_482 = arith.constant 0 : index
    %793 = vector.load %arg10[%c4_481, %c0_482] : memref<16x16xf32, #tpu.memory_space<vmem>>, vector<1x16xf32>
    %794 = vector.shape_cast %793 : vector<1x16xf32> to vector<16xf32>
    %c0_483 = arith.constant 0 : index
    %c64_484 = arith.constant 64 : index
    %795 = vector.load %arg11[%c0_483, %c64_484] : memref<1x256xf32, #tpu.memory_space<vmem>>, vector<1x16xf32>
    %796 = vector.shape_cast %795 : vector<1x16xf32> to vector<16xf32>
    %797 = vector.shape_cast %794 : vector<16xf32> to vector<1x16xf32>
    tpu.vector_store %arg11[%c0_483, %c64_484], %797 {strides = array<i32>} : memref<1x256xf32, #tpu.memory_space<vmem>>, vector<1x16xf32>,
    %c5_485 = arith.constant 5 : index
    %c0_486 = arith.constant 0 : index
    %798 = vector.load %arg10[%c5_485, %c0_486] : memref<16x16xf32, #tpu.memory_space<vmem>>, vector<1x16xf32>
    %799 = vector.shape_cast %798 : vector<1x16xf32> to vector<16xf32>
    %c0_487 = arith.constant 0 : index
    %c80_488 = arith.constant 80 : index
    %800 = vector.load %arg11[%c0_487, %c80_488] : memref<1x256xf32, #tpu.memory_space<vmem>>, vector<1x16xf32>
    %801 = vector.shape_cast %800 : vector<1x16xf32> to vector<16xf32>
    %802 = vector.shape_cast %799 : vector<16xf32> to vector<1x16xf32>
    tpu.vector_store %arg11[%c0_487, %c80_488], %802 {strides = array<i32>} : memref<1x256xf32, #tpu.memory_space<vmem>>, vector<1x16xf32>,
    %c6_489 = arith.constant 6 : index
    %c0_490 = arith.constant 0 : index
    %803 = vector.load %arg10[%c6_489, %c0_490] : memref<16x16xf32, #tpu.memory_space<vmem>>, vector<1x16xf32>
    %804 = vector.shape_cast %803 : vector<1x16xf32> to vector<16xf32>
    %c0_491 = arith.constant 0 : index
    %c96_492 = arith.constant 96 : index
    %805 = vector.load %arg11[%c0_491, %c96_492] : memref<1x256xf32, #tpu.memory_space<vmem>>, vector<1x16xf32>
    %806 = vector.shape_cast %805 : vector<1x16xf32> to vector<16xf32>
    %807 = vector.shape_cast %804 : vector<16xf32> to vector<1x16xf32>
    tpu.vector_store %arg11[%c0_491, %c96_492], %807 {strides = array<i32>} : memref<1x256xf32, #tpu.memory_space<vmem>>, vector<1x16xf32>,
    %c7_493 = arith.constant 7 : index
    %c0_494 = arith.constant 0 : index
    %808 = vector.load %arg10[%c7_493, %c0_494] : memref<16x16xf32, #tpu.memory_space<vmem>>, vector<1x16xf32>
    %809 = vector.shape_cast %808 : vector<1x16xf32> to vector<16xf32>
    %c0_495 = arith.constant 0 : index
    %c112_496 = arith.constant 112 : index
    %810 = vector.load %arg11[%c0_495, %c112_496] : memref<1x256xf32, #tpu.memory_space<vmem>>, vector<1x16xf32>
    %811 = vector.shape_cast %810 : vector<1x16xf32> to vector<16xf32>
    %812 = vector.shape_cast %809 : vector<16xf32> to vector<1x16xf32>
    tpu.vector_store %arg11[%c0_495, %c112_496], %812 {strides = array<i32>} : memref<1x256xf32, #tpu.memory_space<vmem>>, vector<1x16xf32>,
    %c8_497 = arith.constant 8 : index
    %c0_498 = arith.constant 0 : index
    %813 = vector.load %arg10[%c8_497, %c0_498] : memref<16x16xf32, #tpu.memory_space<vmem>>, vector<1x16xf32>
    %814 = vector.shape_cast %813 : vector<1x16xf32> to vector<16xf32>
    %c0_499 = arith.constant 0 : index
    %c128_500 = arith.constant 128 : index
    %815 = vector.load %arg11[%c0_499, %c128_500] : memref<1x256xf32, #tpu.memory_space<vmem>>, vector<1x16xf32>
    %816 = vector.shape_cast %815 : vector<1x16xf32> to vector<16xf32>
    %817 = vector.shape_cast %814 : vector<16xf32> to vector<1x16xf32>
    tpu.vector_store %arg11[%c0_499, %c128_500], %817 {strides = array<i32>} : memref<1x256xf32, #tpu.memory_space<vmem>>, vector<1x16xf32>,
    %c9_501 = arith.constant 9 : index
    %c0_502 = arith.constant 0 : index
    %818 = vector.load %arg10[%c9_501, %c0_502] : memref<16x16xf32, #tpu.memory_space<vmem>>, vector<1x16xf32>
    %819 = vector.shape_cast %818 : vector<1x16xf32> to vector<16xf32>
    %c0_503 = arith.constant 0 : index
    %c144_504 = arith.constant 144 : index
    %820 = vector.load %arg11[%c0_503, %c144_504] : memref<1x256xf32, #tpu.memory_space<vmem>>, vector<1x16xf32>
    %821 = vector.shape_cast %820 : vector<1x16xf32> to vector<16xf32>
    %822 = vector.shape_cast %819 : vector<16xf32> to vector<1x16xf32>
    tpu.vector_store %arg11[%c0_503, %c144_504], %822 {strides = array<i32>} : memref<1x256xf32, #tpu.memory_space<vmem>>, vector<1x16xf32>,
    %c10_505 = arith.constant 10 : index
    %c0_506 = arith.constant 0 : index
    %823 = vector.load %arg10[%c10_505, %c0_506] : memref<16x16xf32, #tpu.memory_space<vmem>>, vector<1x16xf32>
    %824 = vector.shape_cast %823 : vector<1x16xf32> to vector<16xf32>
    %c0_507 = arith.constant 0 : index
    %c160_508 = arith.constant 160 : index
    %825 = vector.load %arg11[%c0_507, %c160_508] : memref<1x256xf32, #tpu.memory_space<vmem>>, vector<1x16xf32>
    %826 = vector.shape_cast %825 : vector<1x16xf32> to vector<16xf32>
    %827 = vector.shape_cast %824 : vector<16xf32> to vector<1x16xf32>
    tpu.vector_store %arg11[%c0_507, %c160_508], %827 {strides = array<i32>} : memref<1x256xf32, #tpu.memory_space<vmem>>, vector<1x16xf32>,
    %c11_509 = arith.constant 11 : index
    %c0_510 = arith.constant 0 : index
    %828 = vector.load %arg10[%c11_509, %c0_510] : memref<16x16xf32, #tpu.memory_space<vmem>>, vector<1x16xf32>
    %829 = vector.shape_cast %828 : vector<1x16xf32> to vector<16xf32>
    %c0_511 = arith.constant 0 : index
    %c176_512 = arith.constant 176 : index
    %830 = vector.load %arg11[%c0_511, %c176_512] : memref<1x256xf32, #tpu.memory_space<vmem>>, vector<1x16xf32>
    %831 = vector.shape_cast %830 : vector<1x16xf32> to vector<16xf32>
    %832 = vector.shape_cast %829 : vector<16xf32> to vector<1x16xf32>
    tpu.vector_store %arg11[%c0_511, %c176_512], %832 {strides = array<i32>} : memref<1x256xf32, #tpu.memory_space<vmem>>, vector<1x16xf32>,
    %c12_513 = arith.constant 12 : index
    %c0_514 = arith.constant 0 : index
    %833 = vector.load %arg10[%c12_513, %c0_514] : memref<16x16xf32, #tpu.memory_space<vmem>>, vector<1x16xf32>
    %834 = vector.shape_cast %833 : vector<1x16xf32> to vector<16xf32>
    %c0_515 = arith.constant 0 : index
    %c192_516 = arith.constant 192 : index
    %835 = vector.load %arg11[%c0_515, %c192_516] : memref<1x256xf32, #tpu.memory_space<vmem>>, vector<1x16xf32>
    %836 = vector.shape_cast %835 : vector<1x16xf32> to vector<16xf32>
    %837 = vector.shape_cast %834 : vector<16xf32> to vector<1x16xf32>
    tpu.vector_store %arg11[%c0_515, %c192_516], %837 {strides = array<i32>} : memref<1x256xf32, #tpu.memory_space<vmem>>, vector<1x16xf32>,
    %c13_517 = arith.constant 13 : index
    %c0_518 = arith.constant 0 : index
    %838 = vector.load %arg10[%c13_517, %c0_518] : memref<16x16xf32, #tpu.memory_space<vmem>>, vector<1x16xf32>
    %839 = vector.shape_cast %838 : vector<1x16xf32> to vector<16xf32>
    %c0_519 = arith.constant 0 : index
    %c208_520 = arith.constant 208 : index
    %840 = vector.load %arg11[%c0_519, %c208_520] : memref<1x256xf32, #tpu.memory_space<vmem>>, vector<1x16xf32>
    %841 = vector.shape_cast %840 : vector<1x16xf32> to vector<16xf32>
    %842 = vector.shape_cast %839 : vector<16xf32> to vector<1x16xf32>
    tpu.vector_store %arg11[%c0_519, %c208_520], %842 {strides = array<i32>} : memref<1x256xf32, #tpu.memory_space<vmem>>, vector<1x16xf32>,
    %c14_521 = arith.constant 14 : index
    %c0_522 = arith.constant 0 : index
    %843 = vector.load %arg10[%c14_521, %c0_522] : memref<16x16xf32, #tpu.memory_space<vmem>>, vector<1x16xf32>
    %844 = vector.shape_cast %843 : vector<1x16xf32> to vector<16xf32>
    %c0_523 = arith.constant 0 : index
    %c224_524 = arith.constant 224 : index
    %845 = vector.load %arg11[%c0_523, %c224_524] : memref<1x256xf32, #tpu.memory_space<vmem>>, vector<1x16xf32>
    %846 = vector.shape_cast %845 : vector<1x16xf32> to vector<16xf32>
    %847 = vector.shape_cast %844 : vector<16xf32> to vector<1x16xf32>
    tpu.vector_store %arg11[%c0_523, %c224_524], %847 {strides = array<i32>} : memref<1x256xf32, #tpu.memory_space<vmem>>, vector<1x16xf32>,
    %c15_525 = arith.constant 15 : index
    %c0_526 = arith.constant 0 : index
    %848 = vector.load %arg10[%c15_525, %c0_526] : memref<16x16xf32, #tpu.memory_space<vmem>>, vector<1x16xf32>
    %849 = vector.shape_cast %848 : vector<1x16xf32> to vector<16xf32>
    %c0_527 = arith.constant 0 : index
    %c240_528 = arith.constant 240 : index
    %850 = vector.load %arg11[%c0_527, %c240_528] : memref<1x256xf32, #tpu.memory_space<vmem>>, vector<1x16xf32>
    %851 = vector.shape_cast %850 : vector<1x16xf32> to vector<16xf32>
    %852 = vector.shape_cast %849 : vector<16xf32> to vector<1x16xf32>
    tpu.vector_store %arg11[%c0_527, %c240_528], %852 {strides = array<i32>} : memref<1x256xf32, #tpu.memory_space<vmem>>, vector<1x16xf32>,
    %c0_529 = arith.constant 0 : index
    %c0_530 = arith.constant 0 : index
    %853 = vector.load %arg11[%c0_529, %c0_530] : memref<1x256xf32, #tpu.memory_space<vmem>>, vector<1x256xf32>
    %854 = vector.broadcast %853 : vector<1x256xf32> to vector<16x256xf32>
    %855 = arith.mulf %854, %1 : vector<16x256xf32>
    %c0_531 = arith.constant 0 : index
    %c0_532 = arith.constant 0 : index
    %856 = vector.load %arg3[%c0_531, %c0_532] : memref<32x16xbf16, #tpu.memory_space<vmem>>, vector<32x16xbf16>
    %857 = arith.truncf %855 : vector<16x256xf32> to vector<16x256xbf16>
    %cst_533 = arith.constant dense<0.000000e+00> : vector<32x256xf32>
    %858 = tpu.matmul %856, %857, %cst_533 {dimension_numbers = #tpu.dot_dimension_numbers<[1], [0], [0], [1], [0, 0, 1, 1], [], []>} : vector<32x16xbf16>, vector<16x256xbf16>, vector<32x256xf32> -> vector<32x256xf32>
    %c0_534 = arith.constant 0 : index
    %c0_535 = arith.constant 0 : index
    %859 = vector.load %arg4[%c0_534, %c0_535] : memref<32x1xf32, #tpu.memory_space<vmem>>, vector<32x1xf32>
    %860 = vector.broadcast %859 : vector<32x1xf32> to vector<32x256xf32>
    %861 = arith.addf %858, %860 : vector<32x256xf32>
    %862 = vector.extract_strided_slice %861 {offsets = [0, 0], sizes = [8, 256], strides = [1, 1]} : vector<32x256xf32> to vector<8x256xf32>
    %863 = vector.extract_strided_slice %861 {offsets = [8, 0], sizes = [8, 256], strides = [1, 1]} : vector<32x256xf32> to vector<8x256xf32>
    %864 = vector.extract_strided_slice %861 {offsets = [16, 0], sizes = [16, 256], strides = [1, 1]} : vector<32x256xf32> to vector<16x256xf32>
    %cst_536 = arith.constant dense<0.000000e+00> : vector<256x256xf32>
    %865 = tpu.matmul %862, %863, %cst_536 {dimension_numbers = #tpu.dot_dimension_numbers<[0], [0], [1], [1], [0, 1, 1, 1], [], []>} : vector<8x256xf32>, vector<8x256xf32>, vector<256x256xf32> -> vector<256x256xf32>
    %cst_537 = arith.constant dense<0xFF800000> : vector<256xf32>
    %866 = vector.multi_reduction <maximumf>, %865, %cst_537 [1] : vector<256x256xf32> to vector<256xf32>
    %867 = vector.shape_cast %866 : vector<256xf32> to vector<256x1xf32>
    %868 = vector.broadcast %867 : vector<256x1xf32> to vector<256x256xf32>
    %869 = arith.subf %865, %868 : vector<256x256xf32>
    %870 = math.exp %869 : vector<256x256xf32>
    %cst_538 = arith.constant dense<0.000000e+00> : vector<256xf32>
    %871 = vector.multi_reduction <add>, %870, %cst_538 [1] : vector<256x256xf32> to vector<256xf32>
    %872 = vector.shape_cast %871 : vector<256xf32> to vector<256x1xf32>
    %873 = tpu.reciprocal %872 {approx = true} : vector<256x1xf32> -> vector<256x1xf32>
    %874 = vector.broadcast %873 : vector<256x1xf32> to vector<256x256xf32>
    %875 = arith.mulf %870, %874 : vector<256x256xf32>
    %876 = arith.truncf %864 : vector<16x256xf32> to vector<16x256xbf16>
    %877 = arith.truncf %875 : vector<256x256xf32> to vector<256x256xbf16>
    %cst_539 = arith.constant dense<0.000000e+00> : vector<16x256xf32>
    %878 = tpu.matmul %876, %877, %cst_539 {dimension_numbers = #tpu.dot_dimension_numbers<[1], [1], [0], [0], [0, 0, 1, 0], [], []>} : vector<16x256xbf16>, vector<256x256xbf16>, vector<16x256xf32> -> vector<16x256xf32>
    %879 = arith.mulf %878, %855 : vector<16x256xf32>
    %c0_540 = arith.constant 0 : index
    %c0_541 = arith.constant 0 : index
    %880 = vector.load %arg5[%c0_540, %c0_541] : memref<16x16xbf16, #tpu.memory_space<vmem>>, vector<16x16xbf16>
    %881 = arith.truncf %879 : vector<16x256xf32> to vector<16x256xbf16>
    %cst_542 = arith.constant dense<0.000000e+00> : vector<16x256xf32>
    %882 = tpu.matmul %880, %881, %cst_542 {dimension_numbers = #tpu.dot_dimension_numbers<[1], [0], [0], [1], [0, 0, 1, 1], [], []>} : vector<16x16xbf16>, vector<16x256xbf16>, vector<16x256xf32> -> vector<16x256xf32>
    %c0_543 = arith.constant 0 : index
    %c0_544 = arith.constant 0 : index
    %883 = vector.load %arg6[%c0_543, %c0_544] : memref<16x1xf32, #tpu.memory_space<vmem>>, vector<16x1xf32>
    %884 = vector.broadcast %883 : vector<16x1xf32> to vector<16x256xf32>
    %885 = arith.addf %882, %884 : vector<16x256xf32>
    %cst_545 = arith.constant 0.000000e+00 : f32
    %886 = vector.broadcast %cst_545 : f32 to vector<16x256xf32>
    %887 = arith.maximumf %885, %886 : vector<16x256xf32>
    %c0_546 = arith.constant 0 : index
    %c0_547 = arith.constant 0 : index
    %c0_548 = arith.constant 0 : index
    %888 = vector.load %arg7[%c0_546, %c0_547, %c0_548] : memref<1x16x256xf32, #tpu.memory_space<vmem>>, vector<1x16x256xf32>
    %889 = vector.shape_cast %888 : vector<1x16x256xf32> to vector<16x256xf32>
    %890 = vector.shape_cast %887 : vector<16x256xf32> to vector<1x16x256xf32>
    tpu.vector_store %arg7[%c0_546, %c0_547, %c0_548], %890 {strides = array<i32>} : memref<1x16x256xf32, #tpu.memory_space<vmem>>, vector<1x16x256xf32>,
    return
  }
  func.func @transform_0(%arg0: i32) -> (i32, i32, i32) {
    %c0_i32 = arith.constant 0 : i32
    %c0_i32_0 = arith.constant 0 : i32
    %c0_i32_1 = arith.constant 0 : i32
    return %arg0, %c0_i32, %c0_i32_0 : i32, i32, i32
  }
  func.func @transform_1(%arg0: i32) -> i32 {
    %c0_i32 = arith.constant 0 : i32
    %c0_i32_0 = arith.constant 0 : i32
    return %c0_i32 : i32
  }
  func.func @transform_2(%arg0: i32) -> (i32, i32) {
    %c0_i32 = arith.constant 0 : i32
    %c0_i32_0 = arith.constant 0 : i32
    %c0_i32_1 = arith.constant 0 : i32
    return %c0_i32, %c0_i32_0 : i32, i32
  }
  func.func @transform_3(%arg0: i32) -> (i32, i32) {
    %c0_i32 = arith.constant 0 : i32
    %c0_i32_0 = arith.constant 0 : i32
    %c0_i32_1 = arith.constant 0 : i32
    return %c0_i32, %c0_i32_0 : i32, i32
  }
  func.func @transform_4(%arg0: i32) -> (i32, i32) {
    %c0_i32 = arith.constant 0 : i32
    %c0_i32_0 = arith.constant 0 : i32
    %c0_i32_1 = arith.constant 0 : i32
    return %c0_i32, %c0_i32_0 : i32, i32
  }
  func.func @transform_5(%arg0: i32) -> (i32, i32) {
    %c0_i32 = arith.constant 0 : i32
    %c0_i32_0 = arith.constant 0 : i32
    %c0_i32_1 = arith.constant 0 : i32
    return %c0_i32, %c0_i32_0 : i32, i32
  }
  func.func @transform_6(%arg0: i32) -> (i32, i32, i32) {
    %c0_i32 = arith.constant 0 : i32
    %c0_i32_0 = arith.constant 0 : i32
    %c0_i32_1 = arith.constant 0 : i32
    return %arg0, %c0_i32, %c0_i32_0 : i32, i32, i32
  }
}

</mosaic_0001>

<bundles_post_ra>
// kernel: tpu_custom_call.1
= control target key start
LH: loop header
LB: loop body
LE: loop exit
PB: predicated region body
PF: predicated region fallthrough
CT: control target
= control target key end

     0   :  { %s5824_s0 = inlined_call_operand.hbm [shape: f32[2,16,256], index: 0, kind: input, shape index: {}]   ;;  %s5825_s1 = inlined_call_operand.vmem [shape: f32[98], index: 1, kind: input, shape index: {}]   ;;  %s5826_s2 = inlined_call_operand.vmem [shape: bf16[32,16], index: 2, kind: input, shape index: {}]   ;;  %s5827_s3 = inlined_call_operand.vmem [shape: f32[32,1], index: 3, kind: input, shape index: {}]   ;;  %s5828_s4 = inlined_call_operand.vmem [shape: bf16[16,16], index: 4, kind: input, shape index: {}]   ;;  %s5829_s5 = inlined_call_operand.vmem [shape: f32[16,1], index: 5, kind: input, shape index: {}]   ;;  %s5830_s6 = inlined_call_operand.hbm [shape: f32[2,16,256], index: 6, kind: output, shape index: {}]  }
   0x1   :  { %5863 = sst [smem:[#allocation45_spill]] %s5825_s1 }
   0x2   :  { %11 = vsyncpa [#allocation7], 0 }
   0x3   :  { %13 = vsyncpa [#allocation7 + $0x1], 0 }
   0x4   :  { %14 = vsyncpa [#allocation9], 0 }
   0x5   :  { %15 = vsyncpa [#allocation8], 0 }
   0x6   :  { %17 = vsyncpa [#allocation8 + $0x1], 0  ;;  %s3949_s21 = smov 0   ;;  %s3951_s22 = smov 0  }
   0x7   :  { %s3953_s23 = smov 0   ;;  %s3955_s24 = smov 0  }
   0x8 LB: > { %5864 = sst [smem:[#allocation15_spill]] %s3880_s23  ;;  %s3970_s25 = sadd.s32 4294967295, %s3884_s24   ;;  %s3884_s24 = sphi %s3955_s24, %s5960_s24   ;;  %s3880_s23 = sphi %s3953_s23, %s5957_s23   ;;  %s3876_s22 = sphi %s3951_s22, %s5959_s22   ;;  %s3872_s21 = sphi %s3949_s21, %s5958_s21  }
   0x9   : > { %s3242_s26 = sadd.s32 4294967294, %s3884_s24   ;;  %s3974_s27 = sadd.s32 1, %s3884_s24  }
   0xa   : > { %s30_s28 = sadd.s32 1, %s3880_s23  ;;  %s27_s29 = ssub.s32 %s3884_s24, %s3974_s27 }
   0xb   : > { %p37_p0 = scmp.ne.s32.totalorder %s3880_s23, %s3876_s22  ;;  %p28_p1 = scmp.eq.s32.totalorder %s27_s29, 0 }
   0xc   : > { %p38_p2 = scmp.eq.s32.totalorder %s3884_s24, 0  ;;  %p43_p3 = scmp.ne.s32.totalorder %s3876_s22, %s3872_s21 }
   0xd   : > { %p44_p4 = scmp.eq.s32.totalorder %s3970_s25, 0  ;;  %p172_p7 = scmp.eq.s32.totalorder %s3970_s25, 1 }
   0xe   : > { %s3986_s30 = scalar_select %p28_p1, %s3880_s23, %s30_s28  }
   0xf   : > { %p3988_p5 = por %p38_p2, %p37_p0  ;;  %p3994_p6 = por %p44_p4, %p43_p3 }
  0x10   : > { %5865 = sst [smem:[#allocation16_spill]] %s3986_s30  ;;  %p178_p8 = scmp.eq.s32.totalorder %s3242_s26, 1 }
  0x11   : > { %p3243_p9 = scmp.ge.s32.totalorder %s3884_s24, 1  ;;  %p185_p10 = scmp.lt.s32.totalorder %s3884_s24, 3 }
  0x12   : > { %p4001_p11 = por %p172_p7, %p37_p0  ;;  %p4005_p12 = por %p178_p8, %p43_p3 }
  0x13   : > { %p4009_p13 = pnand %p3243_p9, %p185_p10  ;;  %s5871_s1 = sld [smem:[#allocation45_spill]] }
  0x14   : > { %p3465_p2 = scmp.lt.s32.totalorder %s3884_s24, 2  ;;  %s220_s15 = sand.u32 1, %s3880_s23  }
  0x15   : > { %p3452_p1 = pneg %p4009_p13  ;;  %s3246_s17 = sshll.u32 %s220_s15, 5 }
  0x16   : > { %p4025_p3 = pnand %p3465_p2, %p3988_p5  ;;  %s3886_s18 = smov [#allocation10]  }
  0x17   : > { %p3453_p7 = pnand %p3452_p1, %p44_p4  ;;  %s3439_s19 = sshll.u32 %s3884_s24, 5 }
  0x18   : > { %s224_s20 = scalar_lea.vmem [#allocation6], %s3246_s17  ;;  %s229_s12 = scalar_lea.hbm %s5824_s0, %s3439_s19 }
  0x19   : > { %s197_s14 = sshll.u32 %s5871_s1, 4  ;;  %s232_s26 = sshll.u32 %s224_s20, 4  ;;  %s198_s14 = int_to_ptr.vmem [resolvable:$true] %s197_s14  ;;  %s233_s26 = int_to_ptr.vmem [resolvable:$true] %s232_s26 }
  0x1a   : > { %3455 = dma.vmem_to_smem (!%p3453_p7), %s198_s14, 16, %s3886_s18, [#allocation9]  }
  0x1b   : > { %s230_s13 = sshll.u32 %s229_s12, 4  ;;  %s221_s1 = scalar_lea.sflag [#allocation7], %s220_s15  ;;  %s231_s13 = int_to_ptr.hbm [resolvable:$true] %s230_s13 }
  0x1c   : > { %s3784_s7 = sshra.s32 %s231_s13, 4  ;;  %p3788_p8 = pneg %p4025_p3  ;;  %s3785_s7 = int_to_ptr.hbm [resolvable:$true] %s3784_s7 }
  0x1d   : > { %s3786_s30 = scalar_lea.hbm %s3785_s7, 32  ;;  %s3791_s17 = scalar_lea.hbm %s5824_s0, 64 }
  0x1e   : > { %p3787_p5 = scmp.ne.s32.totalorder %s3785_s7, %s3786_s30  ;;  %p3792_p1 = scmp.lt.s32.totalorder %s3785_s7, %s5824_s0 }
  0x1f   : > { %p3793_p2 = scmp.lt.s32.totalorder %s3791_s17, %s3786_s30 }
  0x20   : > { %p3789_p9 = pnand %p3788_p8, %p3787_p5 }
  0x21   : > { %p3794_p7 = por %p3793_p2, %p3792_p1 }
  0x22   : > { %p3790_p10 = pneg %p3789_p9 }
  0x24   : > { %p3795_p0 = pnand %p3794_p7, %p3790_p10 }
  0x26   : > { %3798 = shalt.err (!%p3795_p0)
}
  0x27   : > { %s3887_s15 = smov 256   ;;  %s3888_s19 = smov 16  }
  0x28   : > { %3459 = dma.hbm_to_vmem [thread:$0]  (!%p4025_p3), %s231_s13, 512, %s233_s26, %s221_s1, %s3887_s15, %s3887_s15, %s3888_s19  }
  0x29   : > { %244 = sbr.rel (%p4009_p13) target bundleno = 2416 (0x970), region = 44 }
  0x2e   : > { %s4046_s28 = sand.u32 1, %s3876_s22  }
  0x2f   : > { %s3250_s23 = sshll.u32 %s4046_s28, 5  ;;  %s247_s30 = scalar_lea.sflag [#allocation7], %s4046_s28 }
  0x30   : > { %s4052_s29 = scalar_lea.vmem [#allocation6], %s3250_s23 }
  0x31   : > { %3859 = dma.done.wait (%p3994_p6), %s247_s30, 512  }
  0x32   : > { %3861 = vsyncadd (%p3994_p6), %s247_s30, 4294966784 }
  0x33   : > { %3863 = dma.done.wait (%p44_p4), [#allocation9], 16  }
  0x34   : > { %3865 = vsyncadd (%p44_p4), [#allocation9], 4294967280 }
  0x35   : > { %261 = sfence }
  0x36   : > { %v287_v0 = vld [vmem:[%s4052_s29] sm:$0xff]  ;;  %v288_v1 = vld [vmem:[%s4052_s29 + $0x8] sm:$0xff]  ;;  %v289_v2 = vld [vmem:[%s4052_s29 + $0x10] sm:$0xff]  ;;  %v3889_v4 = vmov 16.0   ;;  %v320_v32 = vlaneseq  ;;  %vm317_vm1 = vcmask 1040384   ;;  %s3890_s1 = smov 115  }
  0x37   : > { %v290_v3 = vld [vmem:[%s4052_s29 + $0x18] sm:$0xff]  ;;  %3563 = vrcp.f32 %v3889_v4  ;;  %v325_v5 = vmax.f32 %v287_v0, %v289_v2  ;;  %v291_v6 = vadd.f32 %v289_v2, %v287_v0  ;;  %s3891_s8 = smov 3   ;;  %s3892_s11 = smov 99   ;;  %vm346_vm3 = vcmask 179200  }
  0x38   : > { %v298_v7 = vadd.f32 %v290_v3, %v288_v1  ;;  %v332_v8 = vmax.f32 %v288_v1, %v290_v3  ;;  %vm322_vm2 = vcmp.lt.s32.totalorder %v320_v32, 256  ;;  %s3893_s16 = smov 83   ;;  %s3894_s26 = smov 67   ;;  %v3898_v3 = vmov 0.0  }
  0x39   : > { %v326_v9 = vrot.slane %v325_v5, 4  ;;  %v292_v10 = vrot.slane %v291_v6, 4  ;;  %s3895_s12 = smov 51   ;;  %s3896_s13 = smov 35   ;;  %351 = vst.msk [vmem:[#allocation2 + $0x18] sm:$0xff] %vm346_vm3, %v3898_v3  ;;  %vm360_vm4 = vcmask 147480  }
  0x3a   : > { %v299_v11 = vrot.slane %v298_v7, 4  ;;  %v333_v12 = vrot.slane %v332_v8, 4  ;;  %s3897_s7 = smov 19   ;;  %347 = vst.msk [vmem:[#allocation2] sm:$0xff] %vm346_vm3, %v3898_v3  ;;  %s4109_s14 = sld [smem:[#allocation10 + $0x32]]  ;;  %vm349_vm5 = vcmask 177152  }
  0x3b   : > { %v327_v13 = vmax.f32 %v325_v5, %v326_v9  ;;  %v293_v14 = vadd.f32 %v292_v10, %v291_v6  ;;  %348 = vst.msk [vmem:[#allocation2 + $0x8] sm:$0xff] %vm346_vm3, %v3898_v3  ;;  %s3899_s18 = smov 127   ;;  %s3304_s17 = sld [smem:[#allocation10 + $0x34]]  ;;  %vm1912_vm8 = vcmask 130048   ;;  %vm1916_vm15 = vcmp.lt.s32.totalorder %v320_v32, 16 }
  0x3c   : > { %v300_v15 = vadd.f32 %v299_v11, %v298_v7  ;;  %v334_v16 = vmax.f32 %v332_v8, %v333_v12  ;;  %352 = vst.msk [vmem:[#allocation2 + $0x20] sm:$0xff] %vm346_vm3, %v3898_v3  ;;  %s3303_s20 = sld [smem:[#allocation10 + $0x33]]  ;;  %s3900_s19 = smov 125   ;;  %vm4982_vm3 = vcmp.ge.s32.totalorder %v320_v32, 32 }
  0x3d   : > { %v3564_v17 = vpop.eup %3563  ;;  %v328_v18 = vrot.slane %v327_v13, 2  ;;  %v294_v19 = vrot.slane %v293_v14, 2  ;;  %350 = vst.msk [vmem:[#allocation2 + $0x10] sm:$0x3f] %vm349_vm5, %v3898_v3  ;;  %s4140_s15 = sld [smem:[#allocation10 + $0x35]]  ;;  %s3901_s30 = smov 126  }
  0x3e   : > { %v301_v20 = vrot.slane %v300_v15, 2  ;;  %v306_v21 = vmul.f32 16.0, %v3564_v17  ;;  %v335_v22 = vrot.slane %v334_v16, 2  ;;  %vm310_vm0 = vweird.f32 %v3564_v17  ;;  %353 = vst.msk [vmem:[#allocation2 + $0x28] sm:$0x3f] %vm349_vm5, %v3898_v3 }
  0x3f   : > { %v329_v23 = vmax.f32 %v327_v13, %v328_v18  ;;  %v295_v24 = vadd.f32 %v294_v19, %v293_v14 }
  0x40   : > { %v302_v25 = vadd.f32 %v301_v20, %v300_v15  ;;  %v307_v26 = vsub.f32 1.0, %v306_v21  ;;  %v336_v27 = vmax.f32 %v334_v16, %v335_v22 }
  0x41   : > { %v330_v28 = vrot.slane %v329_v23, 1  ;;  %v296_v29 = vrot.slane %v295_v24, 1 }
  0x42   : > { %v303_v30 = vrot.slane %v302_v25, 1  ;;  %v308_v31 = vmul.f32 %v3564_v17, %v307_v26  ;;  %v337_v33 = vrot.slane %v336_v27, 1 }
  0x43   : > { %v297_v34 = vadd.f32 %v296_v29, %v295_v24  ;;  %v331_v37 = vmax.f32 %v329_v23, %v330_v28  ;;  %v1233_v24 = vstv %s4109_s14  ;;  %s3257_s14 = sld [smem:[#allocation10 + $0x5]] }
  0x44   : > { %v304_v35 = vadd.f32 %v303_v30, %v302_v25  ;;  %v309_v36 = vadd.f32 %v3564_v17, %v308_v31  ;;  %v338_v38 = vmax.f32 %v336_v27, %v337_v33 }
  0x46   : > { %v311_v39 = vsel %vm310_vm0, %v3564_v17, %v309_v36  ;;  %v341_v40 = vrot.slane %v338_v38, 7  ;;  %vm1924_vm0 = vcmp.ge.s32.totalorder %v320_v32, 16 }
  0x47   : > { %v313_v41 = vmul.f32 %v311_v39, %v304_v35  ;;  %v312_v42 = vmul.f32 %v311_v39, %v297_v34 }
  0x48   : > { %v342_v43 = vsel %vm317_vm1, %v331_v37, %v341_v40 }
  0x49   : > { %v316_v44 = vrot.slane %v313_v41, 7  ;;  %345 = vst.msk [vmem:[#allocation3 + $0x1] ss:$2 sm:$0x3] %vm322_vm2, %v342_v43 }
  0x4b   : > { %v318_v45 = vsel %vm317_vm1, %v312_v42, %v316_v44  ;;  %vm1925_vm1 = vcmp.lt.s32.totalorder %v320_v32, 32 }
  0x4c   : > { %324 = vst.msk [vmem:[#allocation3] ss:$2 sm:$0x3] %vm322_vm2, %v318_v45  ;;  %vm1926_vm2 = vmand %vm1924_vm0, %vm1925_vm1  ;;  %vm5043_vm0 = vcmp.ge.s32.totalorder %v320_v32, 96  ;;  %vm5048_vm1 = vcmp.lt.s32.totalorder %v320_v32, 112 }
  0x50   : > { %v3531_v46 = vld [vmem:[#allocation3 + $0x1] ss:$0 sm:$0xff]  ;;  %v3552_v63 = vld [vmem:[#allocation3 + $0x3] ss:$0 sm:$0xff] }
  0x51   : > { %v3532_v47 = vld [vmem:[#allocation3 + $0x1] ss:$0 sm:$0xff]  ;;  %380 = vrot.lane.b32.xlu1 %v3531_v46, %s3890_s1  ;;  %v3547_v0 = vld [vmem:[#allocation3 + $0x3] ss:$0 sm:$0xff] }
  0x52   : > { %365 = vrot.lane.b32.xlu0 %v3532_v47, %s3891_s8  ;;  %v3537_v48 = vld [vmem:[#allocation3 + $0x1] ss:$0 sm:$0xff]  ;;  %v3551_v5 = vld [vmem:[#allocation3 + $0x3] ss:$0 sm:$0xff] }
  0x53   : > { %v3533_v49 = vld [vmem:[#allocation3 + $0x1] ss:$0 sm:$0xff]  ;;  %394 = vrot.lane.b32.xlu2 %v3537_v48, %s3892_s11  ;;  %v3536_v53 = vld [vmem:[#allocation3] ss:$0 sm:$0xff]  ;;  %v3544_v61 = vld [vmem:[#allocation3 + $0x2] ss:$0 sm:$0xff] }
  0x54   : > { %v3534_v50 = vld [vmem:[#allocation3 + $0x1] ss:$0 sm:$0xff]  ;;  %v3543_v54 = vld [vmem:[#allocation3] ss:$0 sm:$0xff]  ;;  %v3548_v1 = vld [vmem:[#allocation3 + $0x2] ss:$0 sm:$0xff] }
  0x55   : > { %v3540_v51 = vld [vmem:[#allocation3 + $0x1] ss:$0 sm:$0xff]  ;;  %v3538_v55 = vld [vmem:[#allocation3] ss:$0 sm:$0xff]  ;;  %v3555_v2 = vld [vmem:[#allocation3 + $0x2] ss:$0 sm:$0xff] }
  0x56   : > { %v3535_v52 = vld [vmem:[#allocation3 + $0x1] ss:$0 sm:$0xff]  ;;  %v3539_v56 = vld [vmem:[#allocation3] ss:$0 sm:$0xff]  ;;  %v3550_v4 = vld [vmem:[#allocation3 + $0x2] ss:$0 sm:$0xff] }
  0x57   : > { %v3546_v57 = vld [vmem:[#allocation3] ss:$0 sm:$0xff]  ;;  %v3545_v62 = vld [vmem:[#allocation3 + $0x1] ss:$0 sm:$0xff]  ;;  %v3558_v6 = vld [vmem:[#allocation3 + $0x3] ss:$0 sm:$0xff] }
  0x58   : > { %v3541_v58 = vld [vmem:[#allocation3] ss:$0 sm:$0xff]  ;;  %v3553_v7 = vld [vmem:[#allocation3 + $0x3] ss:$0 sm:$0xff]  ;;  %v3554_v8 = vld [vmem:[#allocation3 + $0x2] ss:$0 sm:$0xff] }
  0x59   : > { %408 = vrot.lane.b32.xlu1 %v3533_v49, %s3893_s16  ;;  %v3542_v59 = vld [vmem:[#allocation3] ss:$0 sm:$0xff]  ;;  %v3561_v9 = vld [vmem:[#allocation3 + $0x2] ss:$0 sm:$0xff]  ;;  %v3557_v11 = vld [vmem:[#allocation3 + $0x3] ss:$0 sm:$0xff]  ;;  %v1261_v49 = vstv %s3304_s17 }
  0x5a   : > { %422 = vrot.lane.b32.xlu0 %v3534_v50, %s3894_s26  ;;  %v3549_v60 = vld [vmem:[#allocation3] ss:$0 sm:$0xff]  ;;  %v3556_v10 = vld [vmem:[#allocation3 + $0x2] ss:$0 sm:$0xff]  ;;  %v3562_v12 = vld [vmem:[#allocation3 + $0x3] ss:$0 sm:$0xff]  ;;  %v1247_v50 = vstv %s3303_s20 }
  0x5b   : > { %436 = vrot.lane.b32.xlu2 %v3540_v51, %s3895_s12  ;;  %v3559_v13 = vld [vmem:[#allocation3 + $0x3] ss:$0 sm:$0xff]  ;;  %v3560_v14 = vld [vmem:[#allocation3 + $0x2] ss:$0 sm:$0xff]  ;;  %s3258_s17 = sld [smem:[#allocation10 + $0x6]] }
  0x5c   : > { %s3256_s20 = sld [smem:[#allocation10 + $0x4]] }
  0x61   : > { %450 = vrot.lane.b32.xlu1 %v3535_v52, %s3896_s13 }
  0x62   : > { %357 = vrot.lane.b32.xlu0 %v3536_v53, %s3891_s8 }
  0x63   : > { %387 = vrot.lane.b32.xlu2 %v3543_v54, %s3892_s11 }
  0x69   : > { %373 = vrot.lane.b32.xlu1 %v3538_v55, %s3890_s1  ;;  %v1275_v55 = vstv %s4140_s15  ;;  %s4192_s15 = sld [smem:[#allocation10 + $0xf]] }
  0x6a   : > { %401 = vrot.lane.b32.xlu0 %v3539_v56, %s3893_s16 }
  0x6b   : > { %415 = vrot.lane.b32.xlu2 %v3546_v57, %s3894_s26 }
  0x71   : > { %429 = vrot.lane.b32.xlu1 %v3541_v58, %s3895_s12 }
  0x72   : > { %443 = vrot.lane.b32.xlu0 %v3542_v59, %s3896_s13 }
  0x73   : > { %457 = vrot.lane.b32.xlu2 %v3549_v60, %s3897_s7 }
  0x79   : > { %471 = vrot.lane.b32.xlu1 %v3544_v61, %s3891_s8 }
  0x7a   : > { %464 = vrot.lane.b32.xlu0 %v3545_v62, %s3897_s7 }
  0x7b   : > { %478 = vrot.lane.b32.xlu2 %v3552_v63, %s3891_s8  ;;  %s3306_s8 = sld [smem:[#allocation10 + $0x36]] }
  0x81   : > { %492 = vrot.lane.b32.xlu1 %v3547_v0, %s3890_s1  ;;  %v1289_v62 = vstv %s3306_s8  ;;  %s3309_s8 = sld [smem:[#allocation10 + $0x39]] }
  0x82   : > { %485 = vrot.lane.b32.xlu0 %v3548_v1, %s3890_s1  ;;  %s3307_s1 = sld [smem:[#allocation10 + $0x37]] }
  0x83   : > { %499 = vrot.lane.b32.xlu2 %v3555_v2, %s3892_s11 }
  0x88   : > { %v1303_v61 = vstv %s3307_s1  ;;  %s3260_s1 = sld [smem:[#allocation10 + $0x8]] }
  0x89   : > { %513 = vrot.lane.b32.xlu1 %v3550_v4, %s3893_s16 }
  0x8a   : > { %506 = vrot.lane.b32.xlu0 %v3551_v5, %s3892_s11  ;;  %s3902_s11 = smov 124  }
  0x8b   : > { %520 = vrot.lane.b32.xlu2 %v3558_v6, %s3893_s16  ;;  %s4161_s16 = sld [smem:[#allocation10 + $0x2]] }
  0x91   : > { %534 = vrot.lane.b32.xlu1 %v3553_v7, %s3894_s26  ;;  %v603_v3 = vstv %s4161_s16  ;;  %s4213_s16 = sld [smem:[#allocation10 + $0x9]] }
  0x92   : > { %527 = vrot.lane.b32.xlu0 %v3554_v8, %s3894_s26  ;;  %s3903_s26 = smov 122  }
  0x93   : > { %541 = vrot.lane.b32.xlu2 %v3561_v9, %s3895_s12 }
  0x99   : > { %555 = vrot.lane.b32.xlu1 %v3556_v10, %s3896_s13 }
  0x9a   : > { %548 = vrot.lane.b32.xlu0 %v3557_v11, %s3895_s12  ;;  %s3904_s12 = smov 123  }
  0x9b   : > { %562 = vrot.lane.b32.xlu2 %v3562_v12, %s3896_s13  ;;  %s3255_s13 = sld [smem:[#allocation10 + $0x3]] }
  0xa1   : > { %576 = vrot.lane.b32.xlu1 %v3559_v13, %s3897_s7  ;;  %v617_v8 = vstv %s3255_s13  ;;  %v645_v13 = vstv %s3257_s14  ;;  %s3316_s13 = sld [smem:[#allocation10 + $0x40]] }
  0xa2   : > { %569 = vrot.lane.b32.xlu0 %v3560_v14, %s3897_s7  ;;  %s3253_s7 = sld [smem:[#allocation10 + $0x1]] }
  0xa3   : > { %s4236_s14 = sld [smem:[#allocation10 + $0x41]] }
  0xa8   : > { %v589_v9 = vstv %s3253_s7  ;;  %s3268_s7 = sld [smem:[#allocation10 + $0x10]] }
  0xad   : > { %v395_v15 = vpop.permute.xlu2 %394 }
  0xae   : > { %397 = vst.msk [vmem:[#allocation2 + $0x1d] sm:$0x1] %vm360_vm4, %v395_v15 }
  0xb5   : > { %v437_v16 = vpop.permute.xlu2 %436 }
  0xb6   : > { %439 = vst.msk [vmem:[#allocation2 + $0x20] sm:$0x1] %vm360_vm4, %v437_v16 }
  0xbd   : > { %v388_v17 = vpop.permute.xlu2 %387 }
  0xbe   : > { %390 = vst.msk [vmem:[#allocation2 + $0x5] sm:$0x1] %vm360_vm4, %v388_v17  ;;  %v659_v17 = vstv %s3258_s17  ;;  %s3310_s17 = sld [smem:[#allocation10 + $0x3a]] }
  0xc3   : > { %v381_v18 = vpop.permute.xlu1 %380 }
  0xc4   : > { %383 = vst.msk [vmem:[#allocation2 + $0x1c] sm:$0x1] %vm360_vm4, %v381_v18  ;;  %v366_v19 = vpop.permute.xlu0 %365  ;;  %v631_v18 = vstv %s3256_s20  ;;  %s3262_s20 = sld [smem:[#allocation10 + $0xa]] }
  0xc5   : > { %369 = vst.msk [vmem:[#allocation2 + $0x1b] sm:$0x1] %vm360_vm4, %v366_v19  ;;  %v416_v20 = vpop.permute.xlu2 %415 }
  0xc6   : > { %418 = vst.msk [vmem:[#allocation2 + $0x7] sm:$0x1] %vm360_vm4, %v416_v20 }
  0xcb   : > { %v409_v21 = vpop.permute.xlu1 %408 }
  0xcc   : > { %411 = vst.msk [vmem:[#allocation2 + $0x1e] sm:$0x1] %vm360_vm4, %v409_v21  ;;  %v423_v22 = vpop.permute.xlu0 %422 }
  0xcd   : > { %425 = vst.msk [vmem:[#allocation2 + $0x1f] sm:$0x1] %vm360_vm4, %v423_v22  ;;  %v458_v23 = vpop.permute.xlu2 %457 }
  0xce   : > { %460 = vst.msk [vmem:[#allocation2 + $0xa] sm:$0x1] %vm360_vm4, %v458_v23  ;;  %v773_v23 = vstv %s4192_s15  ;;  %s4253_s15 = sld [smem:[#allocation10 + $0x3b]] }
  0xd3   : > { %v451_v25 = vpop.permute.xlu1 %450 }
  0xd4   : > { %453 = vst.msk [vmem:[#allocation2 + $0x21] sm:$0x1] %vm360_vm4, %v451_v25  ;;  %v358_v26 = vpop.permute.xlu0 %357  ;;  %v4116_v27 = vld [vmem:[#allocation2 + $0x18] sm:$0xff] }
  0xd5   : > { %361 = vst.msk [vmem:[#allocation2 + $0x3] sm:$0x1] %vm360_vm4, %v358_v26  ;;  %v1234_v28 = vmul.f32 %v1233_v24, %v4116_v27  ;;  %v479_v29 = vpop.permute.xlu2 %478  ;;  %v1276_v58 = vmul.f32 %v1275_v55, %v4116_v27  ;;  %v1262_v59 = vmul.f32 %v1261_v49, %v4116_v27  ;;  %v1248_v60 = vmul.f32 %v1247_v50, %v4116_v27 }
  0xd6   : > { %481 = vst.msk [vmem:[#allocation2 + $0x23] sm:$0x1] %vm360_vm4, %v479_v29  ;;  %v1304_v4 = vmul.f32 %v1303_v61, %v4116_v27  ;;  %v1290_v6 = vmul.f32 %v1289_v62, %v4116_v27 }
  0xd7   : > { %1238 = vrot.lane.b32.xlu1 %v1234_v28, %s3899_s18 }
  0xdb   : > { %v374_v30 = vpop.permute.xlu1 %373 }
  0xdc   : > { %376 = vst.msk [vmem:[#allocation2 + $0x4] sm:$0x1] %vm360_vm4, %v374_v30  ;;  %v402_v31 = vpop.permute.xlu0 %401 }
  0xdd   : > { %404 = vst.msk [vmem:[#allocation2 + $0x6] sm:$0x1] %vm360_vm4, %v402_v31  ;;  %v500_v33 = vpop.permute.xlu2 %499  ;;  %v681_v31 = vstv %s3260_s1  ;;  %s3269_s1 = sld [smem:[#allocation10 + $0x11]] }
  0xde   : > { %502 = vst.msk [vmem:[#allocation2 + $0xd] sm:$0x1] %vm360_vm4, %v500_v33  ;;  %v1325_v33 = vstv %s3309_s8  ;;  %s3318_s8 = sld [smem:[#allocation10 + $0x42]] }
  0xe3   : > { %v430_v34 = vpop.permute.xlu1 %429 }
  0xe4   : > { %432 = vst.msk [vmem:[#allocation2 + $0x8] sm:$0x1] %vm360_vm4, %v430_v34  ;;  %v444_v35 = vpop.permute.xlu0 %443  ;;  %v4178_v7 = vld [vmem:[#allocation2] sm:$0xff] }
  0xe5   : > { %446 = vst.msk [vmem:[#allocation2 + $0x9] sm:$0x1] %vm360_vm4, %v444_v35  ;;  %v521_v36 = vpop.permute.xlu2 %520  ;;  %v618_v10 = vmul.f32 %v617_v8, %v4178_v7  ;;  %v590_v12 = vmul.f32 %v589_v9, %v4178_v7  ;;  %v604_v15 = vmul.f32 %v603_v3, %v4178_v7  ;;  %v660_v19 = vmul.f32 %v659_v17, %v4178_v7 }
  0xe6   : > { %523 = vst.msk [vmem:[#allocation2 + $0x26] sm:$0x1] %vm360_vm4, %v521_v36  ;;  %v632_v21 = vmul.f32 %v631_v18, %v4178_v7  ;;  %v646_v25 = vmul.f32 %v645_v13, %v4178_v7 }
  0xeb   : > { %v472_v37 = vpop.permute.xlu1 %471  ;;  %v4215_v30 = vld [vmem:[#allocation2 + $0x1] sm:$0xff] }
  0xec   : > { %474 = vst.msk [vmem:[#allocation2 + $0xb] sm:$0x1] %vm360_vm4, %v472_v37  ;;  %v465_v38 = vpop.permute.xlu0 %464  ;;  %v4200_v22 = vld [vmem:[#allocation2 + $0x2] sm:$0xff]  ;;  %v682_v36 = vmul.f32 %v681_v31, %v4215_v30  ;;  %v4223_v37 = vld [vmem:[#allocation2 + $0x19] sm:$0xff] }
  0xed   : > { %467 = vst.msk [vmem:[#allocation2 + $0x22] sm:$0x1] %vm360_vm4, %v465_v38  ;;  %v542_v39 = vpop.permute.xlu2 %541  ;;  %v695_v38 = vstv %s4213_s16  ;;  %s4268_s16 = sld [smem:[#allocation10 + $0x12]] }
  0xee   : > { %544 = vst.msk [vmem:[#allocation2 + $0x10] sm:$0x1] %vm360_vm4, %v542_v39 }
  0xf3   : > { %v493_v40 = vpop.permute.xlu1 %492 }
  0xf4   : > { %495 = vst.msk [vmem:[#allocation2 + $0x24] sm:$0x1] %vm360_vm4, %v493_v40  ;;  %v486_v41 = vpop.permute.xlu0 %485  ;;  %v1326_v40 = vmul.f32 %v1325_v33, %v4223_v37 }
  0xf5   : > { %488 = vst.msk [vmem:[#allocation2 + $0xc] sm:$0x1] %vm360_vm4, %v486_v41  ;;  %v563_v42 = vpop.permute.xlu2 %562  ;;  %v696_v41 = vmul.f32 %v695_v38, %v4215_v30 }
  0xf6   : > { %565 = vst.msk [vmem:[#allocation2 + $0x29] sm:$0x1] %vm360_vm4, %v563_v42 }
  0xfb   : > { %v514_v43 = vpop.permute.xlu1 %513 }
  0xfc   : > { %516 = vst.msk [vmem:[#allocation2 + $0xe] sm:$0x1] %vm360_vm4, %v514_v43  ;;  %v507_v44 = vpop.permute.xlu0 %506 }
  0xfd   : > { %509 = vst.msk [vmem:[#allocation2 + $0x25] sm:$0x1] %vm360_vm4, %v507_v44  ;;  %v4238_v44 = vld [vmem:[#allocation2 + $0x1a] sm:$0xff] }
 0x103   : > { %v535_v45 = vpop.permute.xlu1 %534 }
 0x104   : > { %537 = vst.msk [vmem:[#allocation2 + $0x27] sm:$0x1] %vm360_vm4, %v535_v45  ;;  %v528_v46 = vpop.permute.xlu0 %527  ;;  %v1417_v45 = vstv %s3316_s13  ;;  %s3301_s13 = sld [smem:[#allocation10 + $0x31]] }
 0x105   : > { %530 = vst.msk [vmem:[#allocation2 + $0xf] sm:$0x1] %vm360_vm4, %v528_v46  ;;  %v787_v46 = vstv %s3268_s7  ;;  %s3263_s7 = sld [smem:[#allocation10 + $0xb]] }
 0x10b   : > { %v556_v47 = vpop.permute.xlu1 %555  ;;  %v4142_v48 = vld [vmem:[#allocation2 + $0x20] sm:$0xff] }
 0x10c   : > { %558 = vst.msk [vmem:[#allocation2 + $0x11] sm:$0x1] %vm360_vm4, %v556_v47  ;;  %v549_v51 = vpop.permute.xlu0 %548  ;;  %v1263_v52 = vmul.f32 %v1261_v49, %v4142_v48  ;;  %v1249_v53 = vmul.f32 %v1247_v50, %v4142_v48  ;;  %v1235_v54 = vmul.f32 %v1233_v24, %v4142_v48  ;;  %v1305_v63 = vmul.f32 %v1303_v61, %v4142_v48  ;;  %v4169_v2 = vld [vmem:[#allocation2 + $0x8] sm:$0xff] }
 0x10d   : > { %551 = vst.msk [vmem:[#allocation2 + $0x28] sm:$0x1] %vm360_vm4, %v549_v51  ;;  %v1291_v0 = vmul.f32 %v1289_v62, %v4142_v48  ;;  %v1277_v1 = vmul.f32 %v1275_v55, %v4142_v48  ;;  %v605_v5 = vmul.f32 %v603_v3, %v4169_v2  ;;  %v591_v11 = vmul.f32 %v589_v9, %v4169_v2  ;;  %v4209_v28 = vld [vmem:[#allocation2 + $0x9] sm:$0xff] }
 0x10e   : > { %1268 = vrot.lane.b32.xlu1 %v1263_v52, %s3900_s19  ;;  %1254 = vrot.lane.b32.xlu0 %v1249_v53, %s3901_s30  ;;  %v647_v14 = vmul.f32 %v645_v13, %v4169_v2  ;;  %v619_v16 = vmul.f32 %v617_v8, %v4169_v2  ;;  %v633_v20 = vmul.f32 %v631_v18, %v4169_v2  ;;  %v1431_v51 = vstv %s4236_s14  ;;  %s4278_s14 = sld [smem:[#allocation10 + $0x3c]] }
 0x10f   : > { %1240 = vrot.lane.b32.xlu2 %v1235_v54, %s3899_s18  ;;  %v774_v24 = vmul.f32 %v773_v23, %v4200_v22  ;;  %v661_v26 = vmul.f32 %v659_v17, %v4169_v2  ;;  %v683_v34 = vmul.f32 %v681_v31, %v4209_v28  ;;  %v1418_v50 = vmul.f32 %v1417_v45, %v4238_v44 }
 0x110   : > { %v788_v52 = vmul.f32 %v787_v46, %v4200_v22  ;;  %v1432_v53 = vmul.f32 %v1431_v51, %v4238_v44  ;;  %v697_v54 = vmul.f32 %v695_v38, %v4209_v28  ;;  %v1353_v62 = vstv %s4253_s15  ;;  %s3319_s15 = sld [smem:[#allocation10 + $0x43]] }
 0x113   : > { %v577_v56 = vpop.permute.xlu1 %576  ;;  %v4226_v39 = vld [vmem:[#allocation2 + $0xa] sm:$0xff] }
 0x114   : > { %579 = vst.msk [vmem:[#allocation2 + $0x2a] sm:$0x1] %vm360_vm4, %v577_v56  ;;  %v570_v57 = vpop.permute.xlu0 %569  ;;  %v4211_v29 = vld [vmem:[#allocation2 + $0x21] sm:$0xff]  ;;  %v775_v42 = vmul.f32 %v773_v23, %v4226_v39  ;;  %v789_v49 = vmul.f32 %v787_v46, %v4226_v39  ;;  %v1339_v56 = vstv %s3310_s17  ;;  %s4289_s17 = sld [smem:[#allocation10 + $0xc]] }
 0x115   : > { %572 = vst.msk [vmem:[#allocation2 + $0x12] sm:$0x1] %vm360_vm4, %v570_v57  ;;  %v1327_v35 = vmul.f32 %v1325_v33, %v4211_v29  ;;  %v4234_v43 = vld [vmem:[#allocation2 + $0x22] sm:$0xff]  ;;  %v709_v57 = vstv %s3262_s20  ;;  %s4291_s20 = sld [smem:[#allocation10 + $0x3f]]  ;;  %vm1934_vm4 = vcmp.lt.s32.totalorder %v320_v32, 48 }
 0x116   : > { %1280 = vrot.lane.b32.xlu1 %v1276_v58, %s3902_s11  ;;  %1266 = vrot.lane.b32.xlu0 %v1262_v59, %s3900_s19  ;;  %v1419_v47 = vmul.f32 %v1417_v45, %v4234_v43  ;;  %v1341_v58 = vmul.f32 %v1339_v56, %v4211_v29  ;;  %v711_v59 = vmul.f32 %v709_v57, %v4209_v28  ;;  %vm1935_vm5 = vmand %vm4982_vm3, %vm1934_vm4  ;;  %vm1979_vm3 = vcmp.lt.s32.totalorder %v320_v32, 128 }
 0x117   : > { %1252 = vrot.lane.b32.xlu2 %v1248_v60, %s3901_s30  ;;  %v1340_v60 = vmul.f32 %v1339_v56, %v4223_v37  ;;  %vm1971_vm4 = vmand %vm5043_vm0, %vm5048_vm1 }
 0x11e   : > { %1310 = vrot.lane.b32.xlu1 %v1305_v63, %s3903_s26  ;;  %1296 = vrot.lane.b32.xlu0 %v1291_v0, %s3904_s12  ;;  %v710_v63 = vmul.f32 %v709_v57, %v4215_v30  ;;  %v1354_v0 = vmul.f32 %v1353_v62, %v4223_v37 }
 0x11f   : > { %1282 = vrot.lane.b32.xlu2 %v1277_v1, %s3902_s11  ;;  %v1433_v1 = vmul.f32 %v1431_v51, %v4234_v43 }
 0x126   : > { %1308 = vrot.lane.b32.xlu0 %v1304_v4, %s3903_s26  ;;  %610 = vrot.lane.b32.xlu1 %v605_v5, %s3901_s30  ;;  %v801_v5 = vstv %s3269_s1  ;;  %s4304_s1 = sld [smem:[#allocation10 + $0x13]] }
 0x127   : > { %1294 = vrot.lane.b32.xlu2 %v1290_v6, %s3904_s12  ;;  %v1445_v6 = vstv %s3318_s8  ;;  %v803_v8 = vmul.f32 %v801_v5, %v4226_v39  ;;  %s4317_s8 = sld [smem:[#allocation10 + $0x44]] }
 0x128   : > { %v1447_v9 = vmul.f32 %v1445_v6, %v4234_v43  ;;  %v1446_v17 = vmul.f32 %v1445_v6, %v4238_v44 }
 0x12e   : > { %622 = vrot.lane.b32.xlu1 %v618_v10, %s3900_s19  ;;  %596 = vrot.lane.b32.xlu0 %v591_v11, %s3899_s18  ;;  %v802_v10 = vmul.f32 %v801_v5, %v4200_v22 }
 0x12f   : > { %594 = vrot.lane.b32.xlu2 %v590_v12, %s3899_s18 }
 0x136   : > { %652 = vrot.lane.b32.xlu1 %v647_v14, %s3904_s12  ;;  %608 = vrot.lane.b32.xlu0 %v604_v15, %s3901_s30  ;;  %v815_v14 = vstv %s4268_s16  ;;  %v1227_v15 = vstv %s3301_s13  ;;  %s580_s16 = sld [smem:[#allocation10]] }
 0x137   : > { %624 = vrot.lane.b32.xlu2 %v619_v16, %s3900_s19  ;;  %v1229_v16 = vmul.f32 %v1227_v15, %v4142_v48  ;;  %v816_v18 = vmul.f32 %v815_v14, %v4200_v22  ;;  %v1228_v48 = vmul.f32 %v1227_v15, %v4116_v27  ;;  %v817_v56 = vmul.f32 %v815_v14, %v4226_v39  ;;  %s3313_s13 = sld [smem:[#allocation10 + $0x3d]] }
 0x13e   : > { %664 = vrot.lane.b32.xlu1 %v660_v19, %s3903_s26  ;;  %638 = vrot.lane.b32.xlu0 %v633_v20, %s3902_s11  ;;  %v1355_v20 = vmul.f32 %v1353_v62, %v4211_v29 }
 0x13f   : > { %636 = vrot.lane.b32.xlu2 %v632_v21, %s3902_s11 }
 0x146   : > { %778 = vrot.lane.b32.xlu1 %v774_v24, %s3899_s18  ;;  %650 = vrot.lane.b32.xlu0 %v646_v25, %s3904_s12 }
 0x147   : > { %666 = vrot.lane.b32.xlu2 %v661_v26, %s3903_s26  ;;  %v723_v26 = vstv %s3263_s7  ;;  %s4330_s7 = sld [smem:[#allocation10 + $0xd]] }
 0x149   : > { %v1239_v3 = vpop.permute.xlu1 %1238 }
 0x14a   : > { %v1244_v31 = vadd.f32 %v1239_v3, %v1228_v48 }
 0x14e   : > { %688 = vrot.lane.b32.xlu0 %v683_v34, %s3899_s18  ;;  %1332 = vrot.lane.b32.xlu1 %v1327_v35, %s3899_s18  ;;  %v1367_v34 = vstv %s4278_s14  ;;  %v725_v35 = vmul.f32 %v723_v26, %v4209_v28  ;;  %s4341_s14 = sld [smem:[#allocation10 + $0x3e]] }
 0x14f   : > { %686 = vrot.lane.b32.xlu2 %v682_v36, %s3899_s18  ;;  %v1369_v36 = vmul.f32 %v1367_v34, %v4211_v29 }
 0x156   : > { %1330 = vrot.lane.b32.xlu0 %v1326_v40, %s3899_s18  ;;  %700 = vrot.lane.b32.xlu1 %v696_v41, %s3901_s30  ;;  %v724_v40 = vmul.f32 %v723_v26, %v4215_v30 }
 0x157   : > { %780 = vrot.lane.b32.xlu2 %v775_v42, %s3899_s18 }
 0x15e   : > { %1424 = vrot.lane.b32.xlu0 %v1419_v47, %s3899_s18  ;;  %794 = vrot.lane.b32.xlu1 %v789_v49, %s3901_s30  ;;  %v737_v49 = vstv %s4289_s17  ;;  %s4347_s17 = sld [smem:[#allocation10 + $0xe]] }
 0x15f   : > { %1422 = vrot.lane.b32.xlu2 %v1418_v50, %s3899_s18  ;;  %v1411_v50 = vstv %s4291_s20  ;;  %s3272_s20 = sld [smem:[#allocation10 + $0x14]] }
 0x166   : > { %792 = vrot.lane.b32.xlu0 %v788_v52, %s3901_s30  ;;  %1436 = vrot.lane.b32.xlu1 %v1432_v53, %s3901_s30  ;;  %v1413_v53 = vmul.f32 %v1411_v50, %v4234_v43 }
 0x167   : > { %702 = vrot.lane.b32.xlu2 %v697_v54, %s3901_s30  ;;  %v1368_v54 = vmul.f32 %v1367_v34, %v4223_v37 }
 0x169   : > { %v1241_v55 = vpop.permute.xlu2 %1240 }
 0x16a   : > { %v1245_v19 = vadd.f32 %v1241_v55, %v1229_v16  ;;  %v738_v55 = vmul.f32 %v737_v49, %v4215_v30  ;;  %v739_v16 = vmul.f32 %v737_v49, %v4209_v28 }
 0x16e   : > { %1346 = vrot.lane.b32.xlu0 %v1341_v58, %s3901_s30  ;;  %716 = vrot.lane.b32.xlu1 %v711_v59, %s3900_s19 }
 0x16f   : > { %1344 = vrot.lane.b32.xlu2 %v1340_v60, %s3901_s30 }
 0x171   : > { %v1253_v61 = vpop.permute.xlu2 %1252 }
 0x172   : > { %v1258_v38 = vadd.f32 %v1253_v61, %v1244_v31 }
 0x176   : > { %714 = vrot.lane.b32.xlu0 %v710_v63, %s3900_s19  ;;  %1358 = vrot.lane.b32.xlu1 %v1354_v0, %s3900_s19  ;;  %v1412_v63 = vmul.f32 %v1411_v50, %v4238_v44  ;;  %v1459_v0 = vstv %s3319_s15  ;;  %s4358_s15 = sld [smem:[#allocation10 + $0x45]] }
 0x177   : > { %1438 = vrot.lane.b32.xlu2 %v1433_v1, %s3901_s30  ;;  %v829_v1 = vstv %s4304_s1  ;;  %v1460_v6 = vmul.f32 %v1459_v0, %v4238_v44  ;;  %s4373_s1 = sld [smem:[#allocation10 + $0x1d]] }
 0x178   : > { %v831_v5 = vmul.f32 %v829_v1, %v4226_v39 }
 0x179   : > { %v1283_v4 = vpop.permute.xlu2 %1282 }
 0x17e   : > { %808 = vrot.lane.b32.xlu0 %v803_v8, %s3900_s19  ;;  %1452 = vrot.lane.b32.xlu1 %v1447_v9, %s3900_s19 }
 0x17f   : > { %806 = vrot.lane.b32.xlu2 %v802_v10, %s3900_s19 }
 0x180   : > { %v1269_v11 = vpop.permute.xlu1 %1268  ;;  %v1255_v12 = vpop.permute.xlu0 %1254 }
 0x181   : > { %v1295_v13 = vpop.permute.xlu2 %1294  ;;  %v1259_v21 = vadd.f32 %v1255_v12, %v1245_v19  ;;  %v583_v12 = vstv %s580_s16  ;;  %s4392_s16 = sld [smem:[#allocation10 + $0x47]] }
 0x182   : > { %v585_v15 = vmul.f32 %v583_v12, %v4169_v2  ;;  %v751_v2 = vstv %s4330_s7  ;;  %s4419_s7 = sld [smem:[#allocation10 + $0x7]] }
 0x183   : > { %v1273_v33 = vadd.f32 %v1269_v11, %v1259_v21  ;;  %v1473_v11 = vstv %s4317_s8  ;;  %v1381_v21 = vstv %s3313_s13  ;;  %v753_v26 = vmul.f32 %v751_v2, %v4209_v28  ;;  %s3274_s8 = sld [smem:[#allocation10 + $0x16]] }
 0x184   : > { %v1474_v14 = vmul.f32 %v1473_v11, %v4238_v44  ;;  %v1383_v48 = vmul.f32 %v1381_v21, %v4211_v29  ;;  %s4408_s13 = sld [smem:[#allocation10 + $0x17]] }
 0x185   : > { %v1287_v41 = vadd.f32 %v1283_v4, %v1273_v33  ;;  %v1461_v4 = vmul.f32 %v1459_v0, %v4234_v43  ;;  %v1382_v33 = vmul.f32 %v1381_v21, %v4223_v37 }
 0x186   : > { %1450 = vrot.lane.b32.xlu0 %v1446_v17, %s3900_s19  ;;  %820 = vrot.lane.b32.xlu1 %v816_v18, %s3902_s11 }
 0x187   : > { %1360 = vrot.lane.b32.xlu2 %v1355_v20, %s3900_s19 }
 0x188   : > { %v1281_v23 = vpop.permute.xlu1 %1280  ;;  %v1267_v24 = vpop.permute.xlu0 %1266 }
 0x189   : > { %v4287_v25 = vpop.permute.xlu2 %594  ;;  %v1272_v27 = vadd.f32 %v1267_v24, %v1258_v38 }
 0x18b   : > { %v1286_v51 = vadd.f32 %v1281_v23, %v1272_v27  ;;  %v584_v23 = vmul.f32 %v583_v12, %v4178_v7  ;;  %v1395_v27 = vstv %s4341_s14  ;;  %s3330_s14 = sld [smem:[#allocation10 + $0x4e]] }
 0x18d   : > { %v1300_v58 = vadd.f32 %v1295_v13, %v1286_v51  ;;  %v830_v13 = vmul.f32 %v829_v1, %v4200_v22  ;;  %v600_v31 = vadd.f32 %v4287_v25, %v584_v23 }
 0x18e   : > { %730 = vrot.lane.b32.xlu0 %v725_v35, %s3902_s11  ;;  %1374 = vrot.lane.b32.xlu1 %v1369_v36, %s3902_s11 }
 0x18f   : > { %728 = vrot.lane.b32.xlu2 %v724_v40, %s3902_s11 }
 0x190   : > { %v1311_v42 = vpop.permute.xlu1 %1310  ;;  %v1297_v45 = vpop.permute.xlu0 %1296 }
 0x191   : > { %v4300_v46 = vpop.permute.xlu2 %624  ;;  %v1301_v47 = vadd.f32 %v1297_v45, %v1287_v41  ;;  %v1396_v45 = vmul.f32 %v1395_v27, %v4223_v37 }
 0x193   : > { %v1315_v52 = vadd.f32 %v1311_v42, %v1301_v47  ;;  %v752_v42 = vmul.f32 %v751_v2, %v4215_v30  ;;  %v767_v47 = vstv %s4347_s17  ;;  %v879_v2 = vstv %s4408_s13  ;;  %s4432_s17 = sld [smem:[#allocation10 + $0x1e]] }
 0x194   : > { %v769_v50 = vmul.f32 %v767_v47, %v4226_v39  ;;  %s3283_s13 = sld [smem:[#allocation10 + $0x1f]] }
 0x195   : > { %v4310_v57 = vadd.f32 %v1413_v53, %v1315_v52 }
 0x196   : > { %1372 = vrot.lane.b32.xlu0 %v1368_v54, %s3902_s11  ;;  %742 = vrot.lane.b32.xlu1 %v738_v55, %s3904_s12 }
 0x197   : > { %822 = vrot.lane.b32.xlu2 %v817_v56, %s3902_s11 }
 0x198   : > { %v611_v59 = vpop.permute.xlu1 %610  ;;  %v1309_v60 = vpop.permute.xlu0 %1308 }
 0x199   : > { %v4315_v61 = vpop.permute.xlu2 %636  ;;  %v1314_v62 = vadd.f32 %v1309_v60, %v1300_v58  ;;  %v843_v58 = vstv %s3272_s20  ;;  %v1487_v60 = vstv %s4358_s15  ;;  %s4434_s20 = sld [smem:[#allocation10 + $0x38]] }
 0x19a   : > { %v1489_v0 = vmul.f32 %v1487_v60, %v4234_v43  ;;  %s4453_s15 = sld [smem:[#allocation10 + $0x4f]] }
 0x19b   : > { %v4321_v3 = vadd.f32 %v1412_v63, %v1314_v62  ;;  %v768_v62 = vmul.f32 %v767_v47, %v4200_v22  ;;  %v845_v63 = vmul.f32 %v843_v58, %v4226_v39  ;;  %v957_v39 = vstv %s4373_s1  ;;  %s3324_s1 = sld [smem:[#allocation10 + $0x48]] }
 0x19c   : > { %v1601_v47 = vstv %s3330_s14  ;;  %s4523_s14 = sld [smem:[#allocation10 + $0x20]] }
 0x19e   : > { %1466 = vrot.lane.b32.xlu0 %v1461_v4, %s3902_s11  ;;  %836 = vrot.lane.b32.xlu1 %v831_v5, %s3904_s12 }
 0x19f   : > { %1464 = vrot.lane.b32.xlu2 %v1460_v6, %s3902_s11 }
 0x1a0   : > { %v623_v8 = vpop.permute.xlu1 %622  ;;  %v597_v9 = vpop.permute.xlu0 %596 }
 0x1a1   : > { %v667_v10 = vpop.permute.xlu2 %666  ;;  %v601_v17 = vadd.f32 %v597_v9, %v585_v15  ;;  %v1397_v9 = vmul.f32 %v1395_v27, %v4211_v29  ;;  %v865_v15 = vstv %s3274_s8  ;;  %s4477_s8 = sld [smem:[#allocation10 + $0x18]] }
 0x1a3   : > { %v615_v24 = vadd.f32 %v611_v59, %v601_v17 }
 0x1a5   : > { %v629_v7 = vadd.f32 %v4300_v46, %v615_v24  ;;  %v1475_v46 = vmul.f32 %v1473_v11, %v4234_v43 }
 0x1a6   : > { %834 = vrot.lane.b32.xlu0 %v830_v13, %s3904_s12  ;;  %1478 = vrot.lane.b32.xlu1 %v1474_v14, %s3904_s12  ;;  %v4404_v13 = vld [vmem:[#allocation2 + $0x23] sm:$0xff]  ;;  %v4406_v14 = vld [vmem:[#allocation2 + $0xb] sm:$0xff] }
 0x1a7   : > { %744 = vrot.lane.b32.xlu2 %v739_v16, %s3904_s12  ;;  %v1509_v16 = vstv %s4392_s16  ;;  %s4490_s16 = sld [smem:[#allocation10 + $0x49]] }
 0x1a8   : > { %v653_v18 = vpop.permute.xlu1 %652  ;;  %v609_v19 = vpop.permute.xlu0 %608  ;;  %v1511_v17 = vmul.f32 %v1509_v16, %v4404_v13 }
 0x1a9   : > { %v4339_v20 = vpop.permute.xlu2 %686  ;;  %v614_v34 = vadd.f32 %v609_v19, %v600_v31 }
 0x1ab   : > { %v628_v25 = vadd.f32 %v623_v8, %v614_v34  ;;  %v4389_v8 = vld [vmem:[#allocation2 + $0x4] sm:$0xff] }
 0x1ac   : > { %v958_v43 = vmul.f32 %v957_v39, %v4389_v8 }
 0x1ad   : > { %v642_v51 = vadd.f32 %v4315_v61, %v628_v25  ;;  %v844_v61 = vmul.f32 %v843_v58, %v4200_v22  ;;  %v1488_v22 = vmul.f32 %v1487_v60, %v4238_v44  ;;  %v4410_v44 = vld [vmem:[#allocation2 + $0x3] sm:$0xff] }
 0x1ae   : > { %1388 = vrot.lane.b32.xlu0 %v1383_v48, %s3904_s12  ;;  %758 = vrot.lane.b32.xlu1 %v753_v26, %s3903_s26  ;;  %v866_v19 = vmul.f32 %v865_v15, %v4410_v44  ;;  %v4428_v48 = vld [vmem:[#allocation2 + $0x1b] sm:$0xff]  ;;  %v4430_v26 = vld [vmem:[#allocation2 + $0xc] sm:$0xff]  ;;  %v880_v31 = vmul.f32 %v879_v2, %v4410_v44 }
 0x1af   : > { %1386 = vrot.lane.b32.xlu2 %v1382_v33, %s3904_s12  ;;  %v1510_v33 = vmul.f32 %v1509_v16, %v4428_v48  ;;  %v959_v34 = vmul.f32 %v957_v39, %v4430_v26  ;;  %v881_v39 = vmul.f32 %v879_v2, %v4406_v14 }
 0x1b0   : > { %v665_v35 = vpop.permute.xlu1 %664  ;;  %v639_v36 = vpop.permute.xlu0 %638 }
 0x1b1   : > { %v4355_v38 = vpop.permute.xlu2 %780  ;;  %v643_v40 = vadd.f32 %v639_v36, %v629_v7 }
 0x1b3   : > { %v657_v41 = vadd.f32 %v653_v18, %v643_v40  ;;  %v867_v18 = vmul.f32 %v865_v15, %v4406_v14 }
 0x1b5   : > { %v671_v49 = vadd.f32 %v667_v10, %v657_v41 }
 0x1b6   : > { %756 = vrot.lane.b32.xlu0 %v752_v42, %s3903_s26  ;;  %1400 = vrot.lane.b32.xlu1 %v1396_v45, %s3903_s26  ;;  %v4451_v42 = vld [vmem:[#allocation2 + $0x24] sm:$0xff]  ;;  %v4455_v45 = vld [vmem:[#allocation2 + $0x1c] sm:$0xff] }
 0x1b7   : > { %1480 = vrot.lane.b32.xlu2 %v1475_v46, %s3904_s12  ;;  %v4369_v52 = vadd.f32 %v769_v50, %v671_v49  ;;  %v971_v49 = vstv %s4432_s17  ;;  %v1319_v46 = vstv %s4434_s20  ;;  %s3277_s17 = sld [smem:[#allocation10 + $0x19]] }
 0x1b8   : > { %v4371_v53 = vpop.permute.xlu1 %778  ;;  %v651_v54 = vpop.permute.xlu0 %650  ;;  %v973_v50 = vmul.f32 %v971_v49, %v4430_v26  ;;  %v1320_v60 = vmul.f32 %v1319_v46, %v4223_v37  ;;  %s4540_s20 = sld [smem:[#allocation10 + $0x4a]] }
 0x1b9   : > { %v1423_v55 = vpop.permute.xlu2 %1422  ;;  %v656_v56 = vadd.f32 %v651_v54, %v642_v51  ;;  %v1603_v51 = vmul.f32 %v1601_v47, %v4451_v42  ;;  %v1602_v54 = vmul.f32 %v1601_v47, %v4455_v45 }
 0x1ba   : > { %v1428_v7 = vadd.f32 %v1423_v55, %v4321_v3 }
 0x1bb   : > { %v670_v59 = vadd.f32 %v665_v35, %v656_v56  ;;  %v675_v35 = vstv %s4419_s7  ;;  %s4511_s7 = sld [smem:[#allocation10 + $0x50]] }
 0x1bc   : > { %v677_v27 = vmul.f32 %v675_v35, %v4209_v28  ;;  %v1321_v28 = vmul.f32 %v1319_v46, %v4211_v29  ;;  %v985_v46 = vstv %s3283_s13  ;;  %s4582_s13 = sld [smem:[#allocation10 + $0x15]] }
 0x1bd   : > { %v4380_v1 = vadd.f32 %v768_v62, %v670_v59 }
 0x1be   : > { %850 = vrot.lane.b32.xlu0 %v845_v63, %s3903_s26  ;;  %1494 = vrot.lane.b32.xlu1 %v1489_v0, %s3903_s26  ;;  %v1615_v0 = vstv %s4453_s15  ;;  %s4555_s15 = sld [smem:[#allocation10 + $0x1a]] }
 0x1bf   : > { %848 = vrot.lane.b32.xlu2 %v844_v61, %s3903_s26  ;;  %v676_v61 = vmul.f32 %v675_v35, %v4215_v30 }
 0x1c0   : > { %v4385_v4 = vpop.permute.xlu1 %1332  ;;  %v689_v5 = vpop.permute.xlu0 %688 }
 0x1c1   : > { %v4387_v6 = vpop.permute.xlu2 %702  ;;  %v693_v3 = vadd.f32 %v689_v5, %v677_v27  ;;  %v1337_v55 = vadd.f32 %v4385_v4, %v1321_v28  ;;  %v1616_v4 = vmul.f32 %v1615_v0, %v4455_v45  ;;  %v692_v37 = vadd.f32 %v4339_v20, %v676_v61 }
 0x1c2   : > { %v1523_v20 = vstv %s3324_s1  ;;  %v1617_v27 = vmul.f32 %v1615_v0, %v4451_v42  ;;  %v987_v28 = vmul.f32 %v985_v46, %v4430_v26  ;;  %s4564_s1 = sld [smem:[#allocation10 + $0x1c]] }
 0x1c3   : > { %v707_v56 = vadd.f32 %v4387_v6, %v693_v3  ;;  %v972_v6 = vmul.f32 %v971_v49, %v4389_v8  ;;  %v1524_v2 = vmul.f32 %v1523_v20, %v4428_v48 }
 0x1c6   : > { %1492 = vrot.lane.b32.xlu0 %v1488_v22, %s3903_s26  ;;  %962 = vrot.lane.b32.xlu1 %v958_v43, %s3899_s18 }
 0x1c7   : > { %1402 = vrot.lane.b32.xlu2 %v1397_v9, %s3903_s26 }
 0x1c8   : > { %v4400_v10 = vpop.permute.xlu1 %700  ;;  %v1331_v11 = vpop.permute.xlu0 %1330 }
 0x1c9   : > { %v4402_v12 = vpop.permute.xlu2 %1344  ;;  %v1336_v5 = vadd.f32 %v1331_v11, %v1320_v60  ;;  %v706_v22 = vadd.f32 %v4400_v10, %v692_v37  ;;  %v999_v60 = vstv %s4523_s14  ;;  %s4590_s14 = sld [smem:[#allocation10 + $0x46]] }
 0x1ca   : > { %v1000_v0 = vmul.f32 %v999_v60, %v4389_v8 }
 0x1cb   : > { %v1350_v30 = vadd.f32 %v4402_v12, %v1336_v5  ;;  %v785_v12 = vadd.f32 %v4355_v38, %v4369_v52  ;;  %v1537_v52 = vstv %s4490_s16  ;;  %s4574_s16 = sld [smem:[#allocation10 + $0x21]] }
 0x1cc   : > { %v1539_v5 = vmul.f32 %v1537_v52, %v4404_v13 }
 0x1ce   : > { %1516 = vrot.lane.b32.xlu1 %v1511_v17, %s3899_s18  ;;  %872 = vrot.lane.b32.xlu0 %v867_v18, %s3899_s18  ;;  %v893_v18 = vstv %s4477_s8  ;;  %s3333_s8 = sld [smem:[#allocation10 + $0x51]] }
 0x1cf   : > { %870 = vrot.lane.b32.xlu2 %v866_v19, %s3899_s18  ;;  %v895_v10 = vmul.f32 %v893_v18, %v4406_v14  ;;  %v1525_v19 = vmul.f32 %v1523_v20, %v4404_v13 }
 0x1d0   : > { %v4421_v21 = vpop.permute.xlu1 %794  ;;  %v4423_v23 = vpop.permute.xlu0 %1424 }
 0x1d1   : > { %v4425_v24 = vpop.permute.xlu2 %1438  ;;  %v1429_v17 = vadd.f32 %v4423_v23, %v4310_v57 }
 0x1d3   : > { %v1443_v57 = vadd.f32 %v4425_v24, %v1429_v17  ;;  %v894_v24 = vmul.f32 %v893_v18, %v4410_v44 }
 0x1d6   : > { %884 = vrot.lane.b32.xlu1 %v880_v31, %s3901_s30  ;;  %1514 = vrot.lane.b32.xlu0 %v1510_v33, %s3899_s18  ;;  %v799_v31 = vadd.f32 %v4421_v21, %v785_v12  ;;  %v1538_v21 = vmul.f32 %v1537_v52, %v4428_v48 }
 0x1d7   : > { %964 = vrot.lane.b32.xlu2 %v959_v34, %s3899_s18  ;;  %v784_v34 = vadd.f32 %v4371_v53, %v4380_v1 }
 0x1d8   : > { %v1437_v36 = vpop.permute.xlu1 %1436  ;;  %v4444_v40 = vpop.permute.xlu0 %792 }
 0x1d9   : > { %v4447_v25 = vpop.permute.xlu2 %806  ;;  %v4449_v41 = vadd.f32 %v1437_v36, %v1428_v7  ;;  %v798_v36 = vadd.f32 %v4444_v40, %v784_v34 }
 0x1db   : > { %v812_v53 = vadd.f32 %v4447_v25, %v798_v36  ;;  %v1013_v36 = vstv %s4574_s16  ;;  %s3286_s16 = sld [smem:[#allocation10 + $0x22]] }
 0x1de   : > { %978 = vrot.lane.b32.xlu1 %v973_v50, %s3901_s30  ;;  %1608 = vrot.lane.b32.xlu0 %v1603_v51, %s3899_s18  ;;  %v1629_v50 = vstv %s4511_s7  ;;  %s4588_s7 = sld [smem:[#allocation10 + $0x52]] }
 0x1df   : > { %1606 = vrot.lane.b32.xlu2 %v1602_v54, %s3899_s18  ;;  %v1631_v51 = vmul.f32 %v1629_v50, %v4451_v42  ;;  %v986_v54 = vmul.f32 %v985_v46, %v4389_v8  ;;  %v1630_v61 = vmul.f32 %v1629_v50, %v4455_v45 }
 0x1e0   : > { %v717_v58 = vpop.permute.xlu1 %716  ;;  %v1347_v59 = vpop.permute.xlu0 %1346 }
 0x1e1   : > { %v4469_v62 = vpop.permute.xlu2 %1360  ;;  %v4471_v63 = vadd.f32 %v717_v58, %v707_v56  ;;  %v4473_v29 = vadd.f32 %v1347_v59, %v1337_v55 }
 0x1e3   : > { %v1365_v25 = vadd.f32 %v4469_v62, %v4473_v29 }
 0x1e6   : > { %1620 = vrot.lane.b32.xlu1 %v1616_v4, %s3901_s30  ;;  %976 = vrot.lane.b32.xlu0 %v972_v6, %s3901_s30 }
 0x1e7   : > { %886 = vrot.lane.b32.xlu2 %v881_v39, %s3901_s30  ;;  %v907_v39 = vstv %s3277_s17  ;;  %s3327_s17 = sld [smem:[#allocation10 + $0x4b]] }
 0x1e8   : > { %v1359_v43 = vpop.permute.xlu1 %1358  ;;  %v715_v9 = vpop.permute.xlu0 %714 }
 0x1e9   : > { %v729_v11 = vpop.permute.xlu2 %728  ;;  %v4488_v15 = vadd.f32 %v1359_v43, %v1350_v30  ;;  %v720_v16 = vadd.f32 %v715_v9, %v706_v22  ;;  %v1551_v22 = vstv %s4540_s20  ;;  %v909_v43 = vmul.f32 %v907_v39, %v4406_v14  ;;  %s4610_s20 = sld [smem:[#allocation10 + $0x1b]] }
 0x1ea   : > { %v1553_v30 = vmul.f32 %v1551_v22, %v4404_v13  ;;  %v908_v9 = vmul.f32 %v907_v39, %v4410_v44  ;;  %v1552_v12 = vmul.f32 %v1551_v22, %v4428_v48 }
 0x1eb   : > { %v734_v62 = vadd.f32 %v729_v11, %v720_v16 }
 0x1ee   : > { %900 = vrot.lane.b32.xlu1 %v895_v10, %s3900_s19  ;;  %1530 = vrot.lane.b32.xlu0 %v1525_v19, %s3901_s30  ;;  %v921_v10 = vstv %s4555_s15  ;;  %s4623_s15 = sld [smem:[#allocation10 + $0x4c]] }
 0x1ef   : > { %1528 = vrot.lane.b32.xlu2 %v1524_v2, %s3901_s30  ;;  %v922_v19 = vmul.f32 %v921_v10, %v4410_v44  ;;  %v1001_v2 = vmul.f32 %v999_v60, %v4430_v26 }
 0x1f0   : > { %v1453_v23 = vpop.permute.xlu1 %1452  ;;  %v809_v33 = vpop.permute.xlu0 %808 }
 0x1f1   : > { %v823_v7 = vpop.permute.xlu2 %822  ;;  %v4507_v35 = vadd.f32 %v1453_v23, %v1443_v57  ;;  %v813_v38 = vadd.f32 %v809_v33, %v799_v31  ;;  %v951_v33 = vstv %s4564_s1  ;;  %s4669_s1 = sld [smem:[#allocation10 + $0x2b]] }
 0x1f3   : > { %v827_v11 = vadd.f32 %v823_v7, %v813_v38  ;;  %v1643_v38 = vstv %s3333_s8  ;;  %s4625_s8 = sld [smem:[#allocation10 + $0x4d]] }
 0x1f6   : > { %1542 = vrot.lane.b32.xlu1 %v1538_v21, %s3900_s19  ;;  %898 = vrot.lane.b32.xlu0 %v894_v24, %s3900_s19  ;;  %v952_v21 = vmul.f32 %v951_v33, %v4389_v8  ;;  %v1015_v24 = vmul.f32 %v1013_v36, %v4430_v26 }
 0x1f7   : > { %1622 = vrot.lane.b32.xlu2 %v1617_v27, %s3901_s30  ;;  %v1645_v27 = vmul.f32 %v1643_v38, %v4451_v42 }
 0x1f8   : > { %v821_v1 = vpop.permute.xlu1 %820  ;;  %v1451_v47 = vpop.permute.xlu0 %1450 }
 0x1f9   : > { %v1465_v40 = vpop.permute.xlu2 %1464  ;;  %v4520_v3 = vadd.f32 %v821_v1, %v812_v53  ;;  %v1456_v49 = vadd.f32 %v1451_v47, %v4449_v41  ;;  %v1644_v53 = vmul.f32 %v1643_v38, %v4455_v45 }
 0x1fb   : > { %v1470_v31 = vadd.f32 %v1465_v40, %v1456_v49  ;;  %v859_v49 = vstv %s4582_s13  ;;  %s4654_s13 = sld [smem:[#allocation10 + $0x53]] }
 0x1fc   : > { %v860_v39 = vmul.f32 %v859_v49, %v4410_v44 }
 0x1fe   : > { %1636 = vrot.lane.b32.xlu1 %v1631_v51, %s3900_s19  ;;  %992 = vrot.lane.b32.xlu0 %v987_v28, %s3900_s19  ;;  %v1657_v28 = vstv %s4588_s7  ;;  %s3288_s7 = sld [smem:[#allocation10 + $0x24]] }
 0x1ff   : > { %990 = vrot.lane.b32.xlu2 %v986_v54, %s3900_s19  ;;  %v861_v54 = vmul.f32 %v859_v49, %v4406_v14 }
 0x200   : > { %v1375_v41 = vpop.permute.xlu1 %1374  ;;  %v731_v55 = vpop.permute.xlu0 %730 }
 0x201   : > { %v4534_v56 = vpop.permute.xlu2 %744  ;;  %v4536_v58 = vadd.f32 %v1375_v41, %v1365_v25  ;;  %v735_v59 = vadd.f32 %v731_v55, %v4471_v63  ;;  %v1503_v25 = vstv %s4590_s14  ;;  %s4690_s14 = sld [smem:[#allocation10 + $0x55]] }
 0x202   : > { %v1505_v55 = vmul.f32 %v1503_v25, %v4404_v13 }
 0x203   : > { %v749_v47 = vadd.f32 %v4534_v56, %v735_v59  ;;  %v1658_v56 = vmul.f32 %v1657_v28, %v4455_v45  ;;  %v1014_v59 = vmul.f32 %v1013_v36, %v4389_v8 }
 0x206   : > { %1004 = vrot.lane.b32.xlu1 %v1000_v0, %s3902_s11  ;;  %1634 = vrot.lane.b32.xlu0 %v1630_v61, %s3900_s19  ;;  %v923_v0 = vmul.f32 %v921_v10, %v4406_v14 }
 0x207   : > { %1544 = vrot.lane.b32.xlu2 %v1539_v5, %s3900_s19 }
 0x208   : > { %v743_v29 = vpop.permute.xlu1 %742  ;;  %v1373_v63 = vpop.permute.xlu0 %1372 }
 0x209   : > { %v4548_v4 = vpop.permute.xlu2 %1386  ;;  %v4550_v6 = vadd.f32 %v743_v29, %v734_v62  ;;  %v4553_v37 = vadd.f32 %v1373_v63, %v4488_v15 }
 0x20e   : > { %1558 = vrot.lane.b32.xlu1 %v1553_v30, %s3902_s11  ;;  %914 = vrot.lane.b32.xlu0 %v909_v43, %s3902_s11  ;;  %v1504_v30 = vmul.f32 %v1503_v25, %v4428_v48  ;;  %v1565_v43 = vstv %s3327_s17  ;;  %s4710_s17 = sld [smem:[#allocation10 + $0x25]] }
 0x20f   : > { %912 = vrot.lane.b32.xlu2 %v908_v9, %s3902_s11 }
 0x210   : > { %v837_v15 = vpop.permute.xlu1 %836  ;;  %v1467_v16 = vpop.permute.xlu0 %1466 }
 0x211   : > { %v4566_v20 = vpop.permute.xlu2 %1480  ;;  %v4568_v17 = vadd.f32 %v837_v15, %v827_v11  ;;  %v4571_v18 = vadd.f32 %v1467_v16, %v4507_v35  ;;  %v1567_v15 = vmul.f32 %v1565_v43, %v4404_v13  ;;  %v1566_v16 = vmul.f32 %v1565_v43, %v4428_v48  ;;  %v4728_v43 = vld [vmem:[#allocation2 + $0x1d] sm:$0xff] }
 0x216   : > { %926 = vrot.lane.b32.xlu1 %v922_v19, %s3904_s12  ;;  %1556 = vrot.lane.b32.xlu0 %v1552_v12, %s3902_s11  ;;  %v1579_v12 = vstv %s4623_s15  ;;  %s3296_s15 = sld [smem:[#allocation10 + $0x2c]] }
 0x217   : > { %1006 = vrot.lane.b32.xlu2 %v1001_v2, %s3902_s11  ;;  %v1595_v2 = vstv %s4625_s8  ;;  %s4746_s8 = sld [smem:[#allocation10 + $0x5d]] }
 0x218   : > { %v1479_v57 = vpop.permute.xlu1 %1478  ;;  %v835_v23 = vpop.permute.xlu0 %834 }
 0x219   : > { %v849_v34 = vpop.permute.xlu2 %848  ;;  %v4585_v7 = vadd.f32 %v1479_v57, %v1470_v31  ;;  %v840_v35 = vadd.f32 %v835_v23, %v4520_v3 }
 0x21b   : > { %v854_v52 = vadd.f32 %v849_v34, %v840_v35  ;;  %v1597_v34 = vmul.f32 %v1595_v2, %v4451_v42 }
 0x21d   : > { %v4599_v1 = vadd.f32 %v952_v21, %v854_v52  ;;  %v1659_v52 = vmul.f32 %v1657_v28, %v4451_v42  ;;  %v1581_v28 = vmul.f32 %v1579_v12, %v4404_v13  ;;  %v4708_v13 = vld [vmem:[#allocation2 + $0xd] sm:$0xff] }
 0x21e   : > { %1020 = vrot.lane.b32.xlu1 %v1015_v24, %s3904_s12  ;;  %1650 = vrot.lane.b32.xlu0 %v1645_v27, %s3902_s11  ;;  %v1596_v24 = vmul.f32 %v1595_v2, %v4455_v45  ;;  %v1155_v2 = vstv %s3296_s15  ;;  %s3347_s15 = sld [smem:[#allocation10 + $0x5f]] }
 0x21f   : > { %1648 = vrot.lane.b32.xlu2 %v1644_v53, %s3902_s11  ;;  %v1671_v53 = vstv %s4654_s13  ;;  %s3290_s13 = sld [smem:[#allocation10 + $0x26]] }
 0x220   : > { %v759_v40 = vpop.permute.xlu1 %758  ;;  %v1389_v3 = vpop.permute.xlu0 %1388 }
 0x221   : > { %v1403_v46 = vpop.permute.xlu2 %1402  ;;  %v763_v50 = vadd.f32 %v759_v40, %v749_v47  ;;  %v1393_v51 = vadd.f32 %v1389_v3, %v4536_v58  ;;  %v1392_v58 = vadd.f32 %v4548_v4, %v4553_v37  ;;  %v935_v4 = vstv %s4610_s20  ;;  %s3344_s20 = sld [smem:[#allocation10 + $0x5c]] }
 0x222   : > { %v937_v11 = vmul.f32 %v935_v4, %v4406_v14  ;;  %v953_v14 = vmul.f32 %v951_v33, %v4430_v26  ;;  %v936_v38 = vmul.f32 %v935_v4, %v4410_v44  ;;  %v1027_v44 = vstv %s3286_s16  ;;  %s3338_s16 = sld [smem:[#allocation10 + $0x56]] }
 0x223   : > { %v1407_v41 = vadd.f32 %v1403_v46, %v1393_v51  ;;  %v4613_v60 = vadd.f32 %v861_v54, %v763_v50  ;;  %v1673_v47 = vmul.f32 %v1671_v53, %v4451_v42  ;;  %v1029_v40 = vmul.f32 %v1027_v44, %v4430_v26  ;;  %v4687_v42 = vld [vmem:[#allocation2 + $0x6] sm:$0xff] }
 0x224   : > { %v1141_v26 = vstv %s4669_s1  ;;  %v1672_v51 = vmul.f32 %v1671_v53, %v4455_v45  ;;  %v4706_v45 = vld [vmem:[#allocation2 + $0x25] sm:$0xff]  ;;  %s3297_s1 = sld [smem:[#allocation10 + $0x2d]] }
 0x225   : > { %v1507_v61 = vadd.f32 %v1505_v55, %v1407_v41 }
 0x226   : > { %1662 = vrot.lane.b32.xlu1 %v1658_v56, %s3904_s12  ;;  %1018 = vrot.lane.b32.xlu0 %v1014_v59, %s3904_s12  ;;  %v4712_v59 = vld [vmem:[#allocation2 + $0x5] sm:$0xff] }
 0x227   : > { %928 = vrot.lane.b32.xlu2 %v923_v0, %s3904_s12  ;;  %v1049_v0 = vstv %s3288_s7  ;;  %s3346_s7 = sld [smem:[#allocation10 + $0x5e]] }
 0x228   : > { %v1401_v5 = vpop.permute.xlu1 %1400  ;;  %v757_v62 = vpop.permute.xlu0 %756  ;;  %v1707_v53 = vstv %s3338_s16  ;;  %s4855_s16 = sld [smem:[#allocation10 + $0x23]] }
 0x229   : > { %v4627_v29 = vpop.permute.xlu2 %870  ;;  %v1406_v63 = vadd.f32 %v1401_v5, %v1392_v58  ;;  %v762_v22 = vadd.f32 %v757_v62, %v4550_v6  ;;  %v1485_v6 = vadd.f32 %v4566_v20, %v4571_v18  ;;  %v1580_v18 = vmul.f32 %v1579_v12, %v4428_v48 }
 0x22a   : > { %v1051_v5 = vmul.f32 %v1049_v0, %v4708_v13  ;;  %v1050_v62 = vmul.f32 %v1049_v0, %v4712_v59  ;;  %v1785_v12 = vstv %s3344_s20  ;;  %s4825_s20 = sld [smem:[#allocation10 + $0x28]] }
 0x22b   : > { %v862_v9 = vadd.f32 %v860_v39, %v762_v22  ;;  %v4633_v37 = vadd.f32 %v1504_v30, %v1406_v63  ;;  %v1063_v30 = vstv %s4710_s17  ;;  %s3340_s17 = sld [smem:[#allocation10 + $0x58]] }
 0x22c   : > { %v1064_v4 = vmul.f32 %v1063_v30, %v4712_v59 }
 0x22d   : > { %v876_v54 = vadd.f32 %v4627_v29, %v862_v9  ;;  %v4730_v9 = vld [vmem:[#allocation2 + $0xe] sm:$0xff] }
 0x22e   : > { %942 = vrot.lane.b32.xlu1 %v937_v11, %s3903_s26  ;;  %1572 = vrot.lane.b32.xlu0 %v1567_v15, %s3904_s12  ;;  %v1143_v11 = vmul.f32 %v1141_v26, %v4730_v9 }
 0x22f   : > { %1570 = vrot.lane.b32.xlu2 %v1566_v16, %s3904_s12 }
 0x230   : > { %v1495_v10 = vpop.permute.xlu1 %1494  ;;  %v851_v19 = vpop.permute.xlu0 %850 }
 0x231   : > { %v1499_v31 = vadd.f32 %v1495_v10, %v1485_v6  ;;  %v4645_v57 = vpop.permute.xlu2 %964  ;;  %v855_v23 = vadd.f32 %v851_v19, %v4568_v17  ;;  %v4744_v10 = vld [vmem:[#allocation2 + $0x26] sm:$0xff]  ;;  %v4748_v19 = vld [vmem:[#allocation2 + $0x1e] sm:$0xff] }
 0x233   : > { %v4652_v35 = vadd.f32 %v953_v14, %v855_v23  ;;  %v1599_v20 = vadd.f32 %v1597_v34, %v1499_v31  ;;  %v1157_v31 = vmul.f32 %v1155_v2, %v4730_v9  ;;  %v1787_v14 = vmul.f32 %v1785_v12, %v4744_v10 }
 0x234   : > { %v1786_v23 = vmul.f32 %v1785_v12, %v4748_v19 }
 0x236   : > { %1584 = vrot.lane.b32.xlu1 %v1580_v18, %s3903_s26  ;;  %940 = vrot.lane.b32.xlu0 %v936_v38, %s3903_s26  ;;  %v1799_v38 = vstv %s4746_s8  ;;  %s4844_s8 = sld [smem:[#allocation10 + $0x2f]] }
 0x237   : > { %1664 = vrot.lane.b32.xlu2 %v1659_v52, %s3904_s12  ;;  %v1800_v52 = vmul.f32 %v1799_v38, %v4748_v19 }
 0x238   : > { %v963_v17 = vpop.permute.xlu1 %962  ;;  %v1493_v33 = vpop.permute.xlu0 %1492 }
 0x239   : > { %v4663_v36 = vadd.f32 %v963_v17, %v4599_v1  ;;  %v4665_v21 = vpop.permute.xlu2 %1606  ;;  %v1498_v48 = vadd.f32 %v1493_v33, %v4585_v7  ;;  %v1028_v1 = vmul.f32 %v1027_v44, %v4389_v8  ;;  %v1142_v8 = vmul.f32 %v1141_v26, %v4687_v42 }
 0x23a   : > { %v1156_v17 = vmul.f32 %v1155_v2, %v4687_v42  ;;  %v1065_v33 = vmul.f32 %v1063_v30, %v4708_v13 }
 0x23b   : > { %v4671_v27 = vadd.f32 %v1596_v24, %v1498_v48 }
 0x23e   : > { %1678 = vrot.lane.b32.xlu1 %v1673_v47, %s3903_s26  ;;  %1034 = vrot.lane.b32.xlu0 %v1029_v40, %s3903_s26  ;;  %v1077_v47 = vstv %s3290_s13  ;;  %s4859_s13 = sld [smem:[#allocation10 + $0x60]] }
 0x23f   : > { %1032 = vrot.lane.b32.xlu2 %v1028_v1, %s3903_s26  ;;  %v1079_v40 = vmul.f32 %v1077_v47, %v4708_v13  ;;  %v1709_v1 = vmul.f32 %v1707_v53, %v4706_v45 }
 0x240   : > { %v1517_v7 = vpop.permute.xlu1 %1516  ;;  %v873_v3 = vpop.permute.xlu0 %872 }
 0x241   : > { %v4680_v49 = vadd.f32 %v1517_v7, %v1507_v61  ;;  %v4682_v46 = vpop.permute.xlu2 %886  ;;  %v4685_v50 = vadd.f32 %v873_v3, %v4613_v60  ;;  %v1693_v61 = vstv %s4690_s14  ;;  %v1708_v7 = vmul.f32 %v1707_v53, %v4728_v43  ;;  %s4800_s14 = sld [smem:[#allocation10 + $0x2e]] }
 0x242   : > { %v1695_v58 = vmul.f32 %v1693_v61, %v4706_v45 }
 0x246   : > { %1146 = vrot.lane.b32.xlu1 %v1142_v8, %s3899_s18  ;;  %1676 = vrot.lane.b32.xlu0 %v1672_v51, %s3903_s26 }
 0x247   : > { %1586 = vrot.lane.b32.xlu2 %v1581_v28, %s3903_s26  ;;  %v1183_v12 = vstv %s4800_s14  ;;  %s4920_s14 = sld [smem:[#allocation10 + $0x5b]] }
 0x248   : > { %v885_v25 = vpop.permute.xlu1 %884  ;;  %v1515_v41 = vpop.permute.xlu0 %1514  ;;  %v1184_v2 = vmul.f32 %v1183_v12, %v4687_v42 }
 0x249   : > { %v4699_v55 = vadd.f32 %v885_v25, %v876_v54  ;;  %v4701_v60 = vpop.permute.xlu2 %1528  ;;  %v4704_v56 = vadd.f32 %v1515_v41, %v4633_v37  ;;  %v1694_v37 = vmul.f32 %v1693_v61, %v4728_v43  ;;  %v1078_v54 = vmul.f32 %v1077_v47, %v4712_v59 }
 0x24a   : > { %v1801_v25 = vmul.f32 %v1799_v38, %v4744_v10 }
 0x24e   : > { %1700 = vrot.lane.b32.xlu1 %v1695_v58, %s3899_s18  ;;  %1056 = vrot.lane.b32.xlu0 %v1051_v5, %s3899_s18  ;;  %v1169_v58 = vstv %s3297_s1  ;;  %v1813_v5 = vstv %s3346_s7  ;;  %s4890_s1 = sld [smem:[#allocation10 + $0x59]] }
 0x24f   : > { %1054 = vrot.lane.b32.xlu2 %v1050_v62, %s3899_s18  ;;  %v1815_v62 = vmul.f32 %v1813_v5, %v4744_v10  ;;  %v1170_v30 = vmul.f32 %v1169_v58, %v4687_v42  ;;  %s4917_s7 = sld [smem:[#allocation10 + $0x5a]] }
 0x250   : > { %v4721_v29 = vpop.permute.xlu1 %978  ;;  %v1609_v63 = vpop.permute.xlu0 %1608 }
 0x251   : > { %v4723_v39 = vpop.permute.xlu2 %1622  ;;  %v4725_v22 = vadd.f32 %v1609_v63, %v1599_v20  ;;  %v1171_v63 = vmul.f32 %v1169_v58, %v4730_v9 }
 0x256   : > { %1068 = vrot.lane.b32.xlu1 %v1064_v4, %s3901_s30  ;;  %1698 = vrot.lane.b32.xlu0 %v1694_v37, %s3899_s18 }
 0x257   : > { %1148 = vrot.lane.b32.xlu2 %v1143_v11, %s3899_s18 }
 0x258   : > { %v4738_v15 = vpop.permute.xlu1 %1620  ;;  %v4740_v16 = vpop.permute.xlu0 %976 }
 0x259   : > { %v4742_v6 = vpop.permute.xlu2 %990 }
 0x25e   : > { %1162 = vrot.lane.b32.xlu1 %v1157_v31, %s3901_s30  ;;  %1792 = vrot.lane.b32.xlu0 %v1787_v14, %s3899_s18  ;;  %v1814_v31 = vmul.f32 %v1813_v5, %v4748_v19 }
 0x25f   : > { %1790 = vrot.lane.b32.xlu2 %v1786_v23, %s3899_s18  ;;  %s4775_s18 = sld [smem:[#allocation10 + $0x57]] }
 0x260   : > { %v4756_v34 = vpop.permute.xlu1 %900  ;;  %v4758_v20 = vpop.permute.xlu0 %1530 }
 0x261   : > { %v4760_v18 = vpop.permute.xlu2 %1544 }
 0x265   : > { %v1721_v51 = vstv %s4775_s18  ;;  %s4865_s18 = sld [smem:[#allocation10 + $0x54]] }
 0x266   : > { %1804 = vrot.lane.b32.xlu1 %v1800_v52, %s3901_s30  ;;  %1160 = vrot.lane.b32.xlu0 %v1156_v17, %s3901_s30  ;;  %v1722_v28 = vmul.f32 %v1721_v51, %v4728_v43  ;;  %v1723_v14 = vmul.f32 %v1721_v51, %v4706_v45  ;;  %v982_v51 = vadd.f32 %v4740_v16, %v4663_v36 }
 0x267   : > { %1070 = vrot.lane.b32.xlu2 %v1065_v33, %s3901_s30  ;;  %v1735_v33 = vstv %s3340_s17  ;;  %v891_v36 = vadd.f32 %v4682_v46, %v4685_v50  ;;  %v1827_v50 = vstv %s3347_s15  ;;  %s3349_s17 = sld [smem:[#allocation10 + $0x61]]  ;;  %s3909_s15 = smov 96  }
 0x268   : > { %v4769_v24 = vpop.permute.xlu1 %1542  ;;  %v4771_v48 = vpop.permute.xlu0 %898  ;;  %v1737_v53 = vmul.f32 %v1735_v33, %v4706_v45  ;;  %v1736_v58 = vmul.f32 %v1735_v33, %v4728_v43  ;;  %v996_v5 = vadd.f32 %v4742_v6, %v982_v51 }
 0x269   : > { %v4773_v44 = vpop.permute.xlu2 %912 }
 0x26e   : > { %1084 = vrot.lane.b32.xlu1 %v1079_v40, %s3900_s19  ;;  %1714 = vrot.lane.b32.xlu0 %v1709_v1, %s3901_s30 }
 0x26f   : > { %1712 = vrot.lane.b32.xlu2 %v1708_v7, %s3901_s30 }
 0x270   : > { %v4783_v3 = vpop.permute.xlu1 %1636  ;;  %v4785_v26 = vpop.permute.xlu0 %992 }
 0x271   : > { %v4787_v8 = vpop.permute.xlu2 %1006 }
 0x276   : > { %1726 = vrot.lane.b32.xlu1 %v1722_v28, %s3900_s19  ;;  %1082 = vrot.lane.b32.xlu0 %v1078_v54, %s3900_s19  ;;  %v1105_v54 = vstv %s4825_s20  ;;  %s3907_s20 = smov 32  }
 0x277   : > { %1806 = vrot.lane.b32.xlu2 %v1801_v25, %s3901_s30  ;;  %s3291_s30 = sld [smem:[#allocation10 + $0x27]]  ;;  %v1106_v25 = vmul.f32 %v1105_v54, %v4712_v59 }
 0x278   : > { %v1005_v41 = vpop.permute.xlu1 %1004  ;;  %v4796_v0 = vpop.permute.xlu0 %1634 }
 0x279   : > { %v4798_v61 = vpop.permute.xlu2 %1648  ;;  %v1010_v16 = vadd.f32 %v1005_v41, %v996_v5  ;;  %v1841_v5 = vstv %s4859_s13 }
 0x27d   : > { %v1091_v17 = vstv %s3291_s30  ;;  %s3300_s30 = sld [smem:[#allocation10 + $0x30]] }
 0x27e   : > { %1820 = vrot.lane.b32.xlu1 %v1815_v62, %s3900_s19  ;;  %1176 = vrot.lane.b32.xlu0 %v1171_v63, %s3900_s19  ;;  %v1093_v47 = vmul.f32 %v1091_v17, %v4708_v13  ;;  %v1092_v40 = vmul.f32 %v1091_v17, %v4712_v59  ;;  %v1185_v62 = vmul.f32 %v1183_v12, %v4730_v9  ;;  %v1197_v17 = vstv %s4844_s8  ;;  %s3910_s8 = smov 80  }
 0x27f   : > { %1174 = vrot.lane.b32.xlu2 %v1170_v30, %s3900_s19  ;;  %v905_v12 = vadd.f32 %v4756_v34, %v891_v36  ;;  %v1829_v34 = vmul.f32 %v1827_v50, %v4744_v10 }
 0x280   : > { %v4808_v4 = vpop.permute.xlu1 %1558  ;;  %v915_v37 = vpop.permute.xlu0 %914 }
 0x281   : > { %v4810_v11 = vpop.permute.xlu2 %928  ;;  %v919_v41 = vadd.f32 %v915_v37, %v905_v12  ;;  %v1534_v37 = vadd.f32 %v4701_v60, %v4704_v56 }
 0x283   : > { %v933_v51 = vadd.f32 %v4810_v11, %v919_v41  ;;  %v1548_v36 = vadd.f32 %v4769_v24, %v1534_v37  ;;  %v1842_v24 = vmul.f32 %v1841_v5, %v4748_v19 }
 0x286   : > { %1188 = vrot.lane.b32.xlu1 %v1184_v2, %s3902_s11  ;;  %1818 = vrot.lane.b32.xlu0 %v1814_v31, %s3900_s19  ;;  %v1535_v2 = vadd.f32 %v4758_v20, %v4680_v49  ;;  %v1828_v49 = vmul.f32 %v1827_v50, %v4748_v19  ;;  %v1107_v50 = vmul.f32 %v1105_v54, %v4708_v13 }
 0x287   : > { %1728 = vrot.lane.b32.xlu2 %v1723_v14, %s3900_s19  ;;  %s4837_s19 = sld [smem:[#allocation10 + $0x2a]] }
 0x288   : > { %v4819_v23 = vpop.permute.xlu1 %926  ;;  %v4821_v38 = vpop.permute.xlu0 %1556 }
 0x289   : > { %v4823_v52 = vpop.permute.xlu2 %1570  ;;  %v1562_v11 = vadd.f32 %v4821_v38, %v1548_v36 }
 0x28d   : > { %v1135_v6 = vstv %s4837_s19  ;;  %s3908_s19 = smov 64  }
 0x28e   : > { %1742 = vrot.lane.b32.xlu1 %v1737_v53, %s3902_s11  ;;  %1098 = vrot.lane.b32.xlu0 %v1093_v47, %s3902_s11  ;;  %v1136_v33 = vmul.f32 %v1135_v6, %v4687_v42  ;;  %v1199_v53 = vmul.f32 %v1197_v17, %v4730_v9  ;;  %v1549_v47 = vadd.f32 %v4760_v18, %v1535_v2 }
 0x28f   : > { %1096 = vrot.lane.b32.xlu2 %v1092_v40, %s3902_s11 }
 0x290   : > { %v4833_v1 = vpop.permute.xlu1 %1020  ;;  %v4835_v7 = vpop.permute.xlu0 %1650  ;;  %v1563_v40 = vadd.f32 %v4808_v4, %v1549_v47  ;;  %v1687_v4 = vstv %s4865_s18 }
 0x291   : > { %v4841_v28 = vpop.permute.xlu2 %1664  ;;  %v1689_v2 = vmul.f32 %v1687_v4, %v4706_v45 }
 0x296   : > { %1110 = vrot.lane.b32.xlu1 %v1106_v25, %s3904_s12  ;;  %1740 = vrot.lane.b32.xlu0 %v1736_v58, %s3902_s11  ;;  %v1043_v25 = vstv %s4855_s16  ;;  %s3911_s16 = smov 112  }
 0x297   : > { %1190 = vrot.lane.b32.xlu2 %v1185_v62, %s3902_s11  ;;  %v1045_v62 = vmul.f32 %v1043_v25, %v4708_v13 }
 0x298   : > { %v4857_v63 = vpop.permute.xlu1 %1662  ;;  %v1019_v30 = vpop.permute.xlu0 %1018 }
 0x299   : > { %v1033_v31 = vpop.permute.xlu2 %1032  ;;  %v1024_v46 = vadd.f32 %v1019_v30, %v1010_v16  ;;  %v904_v16 = vadd.f32 %v4771_v48, %v4699_v55  ;;  %v1198_v55 = vmul.f32 %v1197_v17, %v4687_v42  ;;  %v969_v48 = vadd.f32 %v4645_v57, %v4652_v35 }
 0x29a   : > { %v1576_v57 = vadd.f32 %v4823_v52, %v1562_v11  ;;  %v1843_v11 = vmul.f32 %v1841_v5, %v4744_v10 }
 0x29b   : > { %v1038_v14 = vadd.f32 %v1033_v31, %v1024_v46  ;;  %v918_v46 = vadd.f32 %v4773_v44, %v904_v16  ;;  %v983_v41 = vadd.f32 %v4721_v29, %v969_v48  ;;  %v1044_v44 = vmul.f32 %v1043_v25, %v4712_v59 }
 0x29c   : > { %v1688_v29 = vmul.f32 %v1687_v4, %v4728_v43 }
 0x29d   : > { %v4875_v20 = vadd.f32 %v1136_v33, %v1038_v14  ;;  %v1627_v14 = vadd.f32 %v4723_v39, %v4725_v22  ;;  %v932_v17 = vadd.f32 %v4819_v23, %v918_v46  ;;  %v997_v39 = vadd.f32 %v4785_v26, %v983_v41 }
 0x29e   : > { %1204 = vrot.lane.b32.xlu1 %v1199_v53, %s3904_s12  ;;  %1834 = vrot.lane.b32.xlu0 %v1829_v34, %s3902_s11  ;;  %v1749_v34 = vstv %s4890_s1 }
 0x29f   : > { %1832 = vrot.lane.b32.xlu2 %v1828_v49, %s3902_s11  ;;  %s4894_s11 = sld [smem:[#allocation10 + $0x29]]  ;;  %v1641_v33 = vadd.f32 %v4783_v3, %v1627_v14  ;;  %v1612_v3 = vadd.f32 %v4665_v21, %v4671_v27  ;;  %v1011_v26 = vadd.f32 %v4787_v8, %v997_v39  ;;  %v1750_v25 = vmul.f32 %v1749_v34, %v4728_v43 }
 0x2a0   : > { %v943_v18 = vpop.permute.xlu1 %942  ;;  %v1573_v58 = vpop.permute.xlu0 %1572  ;;  %v1137_v21 = vmul.f32 %v1135_v6, %v4730_v9  ;;  %v1763_v8 = vstv %s4917_s7  ;;  %s3443_s7 = sshll.u32 %s3970_s25, 5 }
 0x2a1   : > { %v947_v30 = vadd.f32 %v943_v18, %v933_v51  ;;  %v1587_v60 = vpop.permute.xlu2 %1586  ;;  %v1577_v56 = vadd.f32 %v1573_v58, %v1563_v40  ;;  %v1655_v52 = vadd.f32 %v4835_v7, %v1641_v33  ;;  %v1751_v51 = vmul.f32 %v1749_v34, %v4706_v45 }
 0x2a2   : > { %v1626_v7 = vadd.f32 %v4738_v15, %v1612_v3  ;;  %v1025_v18 = vadd.f32 %v4833_v1, %v1011_v26 }
 0x2a3   : > { %v1591_v12 = vadd.f32 %v1587_v60, %v1577_v56  ;;  %v4897_v31 = vadd.f32 %v1045_v62, %v947_v30  ;;  %v1779_v62 = vstv %s4920_s14 }
 0x2a4   : > { %v1640_v36 = vadd.f32 %v4796_v0, %v1626_v7  ;;  %v1781_v15 = vmul.f32 %v1779_v62, %v4744_v10 }
 0x2a5   : > { %v4907_v38 = vadd.f32 %v1689_v2, %v1591_v12  ;;  %v1119_v49 = vstv %s4894_s11  ;;  %s285_s11 = scalar_lea.vmem [#allocation11], %s3250_s23 }
 0x2a6   : > { %1846 = vrot.lane.b32.xlu1 %v1842_v24, %s3904_s12  ;;  %1202 = vrot.lane.b32.xlu0 %v1198_v55, %s3904_s12  ;;  %v1121_v40 = vmul.f32 %v1119_v49, %v4708_v13  ;;  %v1669_v13 = vadd.f32 %v4841_v28, %v1655_v52  ;;  %v1764_v28 = vmul.f32 %v1763_v8, %v4728_v43 }
 0x2a7   : > { %1112 = vrot.lane.b32.xlu2 %v1107_v50, %s3904_s12  ;;  %v1120_v4 = vmul.f32 %v1119_v49, %v4712_v59  ;;  %v1654_v6 = vadd.f32 %v4798_v61, %v1640_v36  ;;  %v1780_v43 = vmul.f32 %v1779_v62, %v4748_v19  ;;  %v1211_v59 = vstv %s3300_s30  ;;  %s3153_s30 = scalar_lea.hbm %s5830_s6, %s3443_s7 }
 0x2a8   : > { %v1585_v35 = vpop.permute.xlu1 %1584  ;;  %v941_v54 = vpop.permute.xlu0 %940  ;;  %v1855_v61 = vstv %s3349_s17  ;;  %v1213_v5 = vmul.f32 %v1211_v59, %v4730_v9  ;;  %v1212_v50 = vmul.f32 %v1211_v59, %v4687_v42  ;;  %s3154_s17 = sshll.u32 %s285_s11, 4  ;;  %s3156_s23 = sshll.u32 %s3153_s30, 4  ;;  %s3155_s17 = int_to_ptr.vmem [resolvable:$true] %s3154_s17  ;;  %s3157_s23 = int_to_ptr.hbm [resolvable:$true] %s3156_s23 }
 0x2a9   : > { %v1590_v22 = vadd.f32 %v1585_v35, %v1576_v57  ;;  %v4925_v23 = vpop.permute.xlu2 %1054  ;;  %v946_v53 = vadd.f32 %v941_v54, %v932_v17  ;;  %v1668_v0 = vadd.f32 %v4857_v63, %v1654_v6  ;;  %v1857_v46 = vmul.f32 %v1855_v61, %v4744_v10 }
 0x2aa   : > { %v1856_v35 = vmul.f32 %v1855_v61, %v4748_v19  ;;  %v1765_v10 = vmul.f32 %v1763_v8, %v4706_v45 }
 0x2ab   : > { %v1046_v47 = vadd.f32 %v1044_v44, %v946_v53  ;;  %v1690_v37 = vadd.f32 %v1688_v29, %v1590_v22 }
 0x2ad   : > { %v1060_v42 = vadd.f32 %v4925_v23, %v1046_v47 }
 0x2ae   : > { %1126 = vrot.lane.b32.xlu1 %v1121_v40, %s3903_s26  ;;  %1756 = vrot.lane.b32.xlu0 %v1751_v51, %s3904_s12 }
 0x2af   : > { %1754 = vrot.lane.b32.xlu2 %v1750_v25, %s3904_s12 }
 0x2b0   : > { %v1679_v58 = vpop.permute.xlu1 %1678  ;;  %v1035_v27 = vpop.permute.xlu0 %1034 }
 0x2b1   : > { %v1683_v16 = vadd.f32 %v1679_v58, %v1669_v13  ;;  %v1149_v30 = vpop.permute.xlu2 %1148  ;;  %v1039_v60 = vadd.f32 %v1035_v27, %v1025_v18 }
 0x2b3   : > { %v1139_v1 = vadd.f32 %v1137_v21, %v1039_v60  ;;  %v1783_v56 = vadd.f32 %v1781_v15, %v1683_v16 }
 0x2b5   : > { %v1153_v39 = vadd.f32 %v1149_v30, %v1139_v1 }
 0x2b6   : > { %1768 = vrot.lane.b32.xlu1 %v1764_v28, %s3903_s26  ;;  %1124 = vrot.lane.b32.xlu0 %v1120_v4, %s3903_s26 }
 0x2b7   : > { %1848 = vrot.lane.b32.xlu2 %v1843_v11, %s3904_s12  ;;  %s3906_s12 = smov 48  }
 0x2b8   : > { %v1147_v12 = vpop.permute.xlu1 %1146  ;;  %v1677_v2 = vpop.permute.xlu0 %1676 }
 0x2b9   : > { %v1791_v24 = vpop.permute.xlu2 %1790  ;;  %v1682_v55 = vadd.f32 %v1677_v2, %v1668_v0  ;;  %v1152_v19 = vadd.f32 %v1147_v12, %v4875_v20 }
 0x2bb   : > { %v1782_v48 = vadd.f32 %v1780_v43, %v1682_v55 }
 0x2bd   : > { %v1796_v45 = vadd.f32 %v1791_v24, %v1782_v48 }
 0x2be   : > { %1862 = vrot.lane.b32.xlu1 %v1857_v46, %s3903_s26  ;;  %1218 = vrot.lane.b32.xlu0 %v1213_v5, %s3903_s26 }
 0x2bf   : > { %1216 = vrot.lane.b32.xlu2 %v1212_v50, %s3903_s26 }
 0x2c0   : > { %v1701_v63 = vpop.permute.xlu1 %1700  ;;  %v1057_v41 = vpop.permute.xlu0 %1056 }
 0x2c1   : > { %v1705_v14 = vadd.f32 %v1701_v63, %v4907_v38  ;;  %v1071_v17 = vpop.permute.xlu2 %1070  ;;  %v1061_v57 = vadd.f32 %v1057_v41, %v4897_v31 }
 0x2c3   : > { %v1075_v23 = vadd.f32 %v1071_v17, %v1061_v57 }
 0x2c6   : > { %1860 = vrot.lane.b32.xlu0 %v1856_v35, %s3903_s26 }
 0x2c7   : > { %1770 = vrot.lane.b32.xlu2 %v1765_v10, %s3903_s26  ;;  %s3905_s26 = smov 16  }
 0x2c8   : > { %v1069_v9 = vpop.permute.xlu1 %1068  ;;  %v1699_v44 = vpop.permute.xlu0 %1698 }
 0x2c9   : > { %v1074_v54 = vadd.f32 %v1069_v9, %v1060_v42  ;;  %v1713_v29 = vpop.permute.xlu2 %1712  ;;  %v1704_v33 = vadd.f32 %v1699_v44, %v1690_v37 }
 0x2cb   : > { %v1718_v18 = vadd.f32 %v1713_v29, %v1704_v33 }
 0x2d0   : > { %v1163_v38 = vpop.permute.xlu1 %1162  ;;  %v1793_v22 = vpop.permute.xlu0 %1792 }
 0x2d1   : > { %v1167_v53 = vadd.f32 %v1163_v38, %v1153_v39  ;;  %v1807_v31 = vpop.permute.xlu2 %1806  ;;  %v1797_v34 = vadd.f32 %v1793_v22, %v1783_v56 }
 0x2d3   : > { %v1811_v50 = vadd.f32 %v1807_v31, %v1797_v34 }
 0x2d8   : > { %v1805_v52 = vpop.permute.xlu1 %1804  ;;  %v1161_v49 = vpop.permute.xlu0 %1160 }
 0x2d9   : > { %v1810_v40 = vadd.f32 %v1805_v52, %v1796_v45  ;;  %v1175_v51 = vpop.permute.xlu2 %1174  ;;  %v1166_v3 = vadd.f32 %v1161_v49, %v1152_v19 }
 0x2db   : > { %v1180_v59 = vadd.f32 %v1175_v51, %v1166_v3 }
 0x2e0   : > { %v1085_v47 = vpop.permute.xlu1 %1084  ;;  %v1715_v26 = vpop.permute.xlu0 %1714 }
 0x2e1   : > { %v1089_v25 = vadd.f32 %v1085_v47, %v1075_v23  ;;  %v1729_v7 = vpop.permute.xlu2 %1728  ;;  %v1719_v37 = vadd.f32 %v1715_v26, %v1705_v14 }
 0x2e3   : > { %v1733_v41 = vadd.f32 %v1729_v7, %v1719_v37 }
 0x2e8   : > { %v1727_v13 = vpop.permute.xlu1 %1726  ;;  %v1083_v58 = vpop.permute.xlu0 %1082 }
 0x2e9   : > { %v1732_v21 = vadd.f32 %v1727_v13, %v1718_v18  ;;  %v1097_v27 = vpop.permute.xlu2 %1096  ;;  %v1088_v8 = vadd.f32 %v1083_v58, %v1074_v54 }
 0x2eb   : > { %v1102_v61 = vadd.f32 %v1097_v27, %v1088_v8 }
 0x2f0   : > { %v1821_v62 = vpop.permute.xlu1 %1820  ;;  %v1177_v20 = vpop.permute.xlu0 %1176 }
 0x2f1   : > { %v1191_v36 = vpop.permute.xlu2 %1190  ;;  %v1825_v57 = vadd.f32 %v1821_v62, %v1811_v50  ;;  %v1181_v35 = vadd.f32 %v1177_v20, %v1167_v53 }
 0x2f3   : > { %v1195_v33 = vadd.f32 %v1191_v36, %v1181_v35 }
 0x2f8   : > { %v1189_v16 = vpop.permute.xlu1 %1188  ;;  %v1819_v30 = vpop.permute.xlu0 %1818 }
 0x2f9   : > { %v1833_v60 = vpop.permute.xlu2 %1832  ;;  %v1194_v48 = vadd.f32 %v1189_v16, %v1180_v59  ;;  %v1824_v52 = vadd.f32 %v1819_v30, %v1810_v40 }
 0x2fb   : > { %v1838_v7 = vadd.f32 %v1833_v60, %v1824_v52 }
 0x300   : > { %v1743_v15 = vpop.permute.xlu1 %1742  ;;  %v1099_v1 = vpop.permute.xlu0 %1098 }
 0x301   : > { %v1113_v56 = vpop.permute.xlu2 %1112  ;;  %v1747_v9 = vadd.f32 %v1743_v15, %v1733_v41  ;;  %v1103_v44 = vadd.f32 %v1099_v1, %v1089_v25 }
 0x303   : > { %v1117_v22 = vadd.f32 %v1113_v56, %v1103_v44 }
 0x308   : > { %v1111_v28 = vpop.permute.xlu1 %1110  ;;  %v1741_v4 = vpop.permute.xlu0 %1740 }
 0x309   : > { %v1755_v0 = vpop.permute.xlu2 %1754  ;;  %v1116_v63 = vadd.f32 %v1111_v28, %v1102_v61  ;;  %v1746_v53 = vadd.f32 %v1741_v4, %v1732_v21 }
 0x30b   : > { %v1760_v18 = vadd.f32 %v1755_v0, %v1746_v53 }
 0x310   : > { %v1205_v6 = vpop.permute.xlu1 %1204  ;;  %v1835_v11 = vpop.permute.xlu0 %1834 }
 0x311   : > { %v1849_v24 = vpop.permute.xlu2 %1848  ;;  %v1839_v54 = vadd.f32 %v1835_v11, %v1825_v57  ;;  %v1209_v38 = vadd.f32 %v1205_v6, %v1195_v33 }
 0x313   : > { %v1853_v45 = vadd.f32 %v1849_v24, %v1839_v54 }
 0x318   : > { %v1847_v12 = vpop.permute.xlu1 %1846  ;;  %v1203_v2 = vpop.permute.xlu0 %1202 }
 0x319   : > { %v1217_v46 = vpop.permute.xlu2 %1216  ;;  %v1208_v5 = vadd.f32 %v1203_v2, %v1194_v48  ;;  %v1852_v37 = vadd.f32 %v1847_v12, %v1838_v7 }
 0x31b   : > { %v1222_v10 = vadd.f32 %v1217_v46, %v1208_v5 }
 0x320   : > { %v1127_v43 = vpop.permute.xlu1 %1126  ;;  %v1757_v55 = vpop.permute.xlu0 %1756 }
 0x321   : > { %v1761_v39 = vadd.f32 %v1757_v55, %v1747_v9  ;;  %v1771_v19 = vpop.permute.xlu2 %1770  ;;  %v1131_v49 = vadd.f32 %v1127_v43, %v1117_v22 }
 0x323   : > { %v1775_v51 = vadd.f32 %v1771_v19, %v1761_v39 }
 0x328   : > { %v1769_v14 = vpop.permute.xlu1 %1768  ;;  %v1125_v17 = vpop.permute.xlu0 %1124 }
 0x329   : > { %v1130_v42 = vadd.f32 %v1125_v17, %v1116_v63  ;;  %v1774_v27 = vadd.f32 %v1769_v14, %v1760_v18 }
 0x32b   : > { %v1868_v29 = vadd.f32 %v1222_v10, %v1130_v42 }
 0x330   : > { %v1863_v31 = vpop.permute.xlu1 %1862  ;;  %v1219_v34 = vpop.permute.xlu0 %1218 }
 0x331   : > { %v1867_v3 = vadd.f32 %v1863_v31, %v1853_v45  ;;  %v1223_v23 = vadd.f32 %v1219_v34, %v1209_v38 }
 0x333   : > { %v1871_v47 = vadd.f32 %v1867_v3, %v1775_v51  ;;  %v1869_v26 = vadd.f32 %v1223_v23, %v1131_v49 }
 0x335   : > { %v1873_v25 = vadd.f32 %v1871_v47, %v1869_v26 }
 0x337   : > { %v3351_v13 = vmul.f32 -1.442695, %v1873_v25 }
 0x338   : > { %v1861_v58 = vpop.permute.xlu0 %1860 }
 0x339   : > { %3565 = vpow2.f32 %v3351_v13  ;;  %v1866_v8 = vadd.f32 %v1861_v58, %v1852_v37  ;;  %v2042_v13 = vld [vmem:[%s5827_s3] sm:$0xff]  ;;  %v2043_v58 = vld [vmem:[%s5827_s3 + $0x8] sm:$0xff] }
 0x33b   : > { %v1870_v62 = vadd.f32 %v1866_v8, %v1774_v27 }
 0x33d   : > { %v1872_v40 = vadd.f32 %v1870_v62, %v1868_v29  ;;  %v3912_v62 = vmov 0  }
 0x33e   : > { %3528 = vset.pattern.permute.xlu1 %v3912_v62  ;;  %3529 = vset.pattern.permute.xlu2 %v3912_v62 }
 0x33f   : > { %v3566_v20 = vpop.eup %3565  ;;  %v3350_v36 = vmul.f32 -1.442695, %v1872_v40 }
 0x340   : > { %v1881_v16 = vadd.f32 1.0, %v3566_v20 }
 0x341   : > { %3567 = vpow2.f32 %v3350_v36 }
 0x342   : > { %3569 = vrcp.f32 %v1881_v16  ;;  %v1908_v56 = vand.u32 2147483648, %v1881_v16  ;;  %v1906_v4 = vand.u32 2147483647, %v1881_v16  ;;  %vm1902_vm7 = vweird.f32 %v1881_v16 }
 0x344   : > { %v1909_v0 = vor.u32 1.1754944e-38, %v1908_v56  ;;  %vm1907_vm10 = vcmp.eq.f32.partialorder %v1906_v4, 8.507059e+37 }
 0x347   : > { %v3568_v30 = vpop.eup %3567 }
 0x348   : > { %v3570_v21 = vpop.eup %3569  ;;  %v1880_v15 = vadd.f32 1.0, %v3568_v30 }
 0x349   : > { %v1898_v1 = vmul.f32 %v3570_v21, %v1881_v16  ;;  %vm1903_vm6 = vweird.f32 %v3570_v21 }
 0x34a   : > { %3571 = vrcp.f32 %v1880_v15  ;;  %vm1904_vm9 = vmor %vm1902_vm7, %vm1903_vm6  ;;  %v1893_v55 = vand.u32 2147483648, %v1880_v15  ;;  %v1891_v48 = vand.u32 2147483647, %v1880_v15  ;;  %vm1887_vm12 = vweird.f32 %v1880_v15 }
 0x34b   : > { %v1899_v60 = vsub.f32 1.0, %v1898_v1  ;;  %vm4990_vm6 = vcmp.ge.s32.totalorder %v320_v32, 48  ;;  %vm4995_vm7 = vcmp.lt.s32.totalorder %v320_v32, 64 }
 0x34c   : > { %v1894_v46 = vor.u32 1.1754944e-38, %v1893_v55  ;;  %vm1892_vm14 = vcmp.eq.f32.partialorder %v1891_v48, 8.507059e+37 }
 0x34d   : > { %v1900_v28 = vmul.f32 %v3570_v21, %v1899_v60  ;;  %v3765_v60 = vld [vmem:[%s4052_s29] sm:$0xff] }
 0x34f   : > { %v1901_v6 = vadd.f32 %v3570_v21, %v1900_v28  ;;  %v3766_v28 = vld [vmem:[%s4052_s29 + $0x10] sm:$0xff] }
 0x350   : > { %v3572_v11 = vpop.eup %3571 }
 0x351   : > { %v1905_v12 = vsel %vm1904_vm9, %v3570_v21, %v1901_v6  ;;  %v1883_v2 = vmul.f32 %v3572_v11, %v1880_v15  ;;  %vm1888_vm11 = vweird.f32 %v3572_v11  ;;  %vm5000_vm9 = vcmp.ge.s32.totalorder %v320_v32, 64  ;;  %v3767_v6 = vld [vmem:[%s4052_s29 + $0x8] sm:$0xff] }
 0x352   : > { %v1910_v24 = vsel %vm1907_vm10, %v1909_v0, %v1905_v12  ;;  %vm1889_vm13 = vmor %vm1887_vm12, %vm1888_vm11  ;;  %vm5005_vm10 = vcmp.lt.s32.totalorder %v320_v32, 80  ;;  %v3768_v0 = vld [vmem:[%s4052_s29 + $0x18] sm:$0xff] }
 0x353   : > { %1914 = vst.msk [vmem:[#allocation4 + $0x8] sm:$0xff] %vm1912_vm8, %v1910_v24  ;;  %v1884_v43 = vsub.f32 1.0, %v1883_v2  ;;  %vm1944_vm11 = vmand %vm4990_vm6, %vm4995_vm7  ;;  %vm2184_vm6 = vcmask 64512  }
 0x354   : > { %vm1953_vm12 = vmand %vm5000_vm9, %vm5005_vm10 }
 0x355   : > { %v1885_v59 = vmul.f32 %v3572_v11, %v1884_v43  ;;  %v3440_v43 = vld [vmem:[%s5826_s2] sm:$0xff] }
 0x357   : > { %v1886_v61 = vadd.f32 %v3572_v11, %v1885_v59 }
 0x359   : > { %v1890_v5 = vsel %vm1889_vm13, %v3572_v11, %v1886_v61  ;;  %vm5018_vm13 = vcmp.ge.s32.totalorder %v320_v32, 80 }
 0x35a   : > { %v1895_v50 = vsel %vm1892_vm14, %v1894_v46, %v1890_v5  ;;  %v1984_v63 = vld [vmem:[#allocation4 + $0x9] sm:$0x1]  ;;  %v1982_v41 = vld [vmem:[#allocation4 + $0x8] sm:$0x1]  ;;  %v2002_v10 = vld [vmem:[#allocation4 + $0xc] sm:$0x1] }
 0x35b   : > { %1913 = vst.msk [vmem:[#allocation4] sm:$0xff] %vm1912_vm8, %v1895_v50  ;;  %1986 = vrot.lane.b32.xlu0 %v1984_v63, %s3905_s26  ;;  %v1996_v42 = vld [vmem:[#allocation4 + $0xb] sm:$0x1]  ;;  %v1990_v9 = vld [vmem:[#allocation4 + $0xa] sm:$0x1]  ;;  %vm5023_vm14 = vcmp.lt.s32.totalorder %v320_v32, 96 }
 0x35c   : > { %1983 = vst.msk [vmem:[#allocation5 + $0x1] sm:$0x1] %vm1916_vm15, %v1982_v41  ;;  %v2020_v33 = vld [vmem:[#allocation4 + $0xf] sm:$0x1]  ;;  %v2014_v39 = vld [vmem:[#allocation4 + $0xe] sm:$0x1] }
 0x35d   : > { %v2008_v38 = vld [vmem:[#allocation4 + $0xd] sm:$0x1] }
 0x362   : > { %v1937_v14 = vld [vmem:[#allocation4 + $0x3] sm:$0x1]  ;;  %v1928_v17 = vld [vmem:[#allocation4 + $0x2] sm:$0x1]  ;;  %v1919_v57 = vld [vmem:[#allocation4 + $0x1] sm:$0x1] }
 0x363   : > { %1939 = vrot.lane.b32.xlu0 %v1937_v14, %s3906_s12  ;;  %1930 = vrot.lane.b32.xlu1 %v1928_v17, %s3907_s20  ;;  %v1915_v35 = vld [vmem:[#allocation4] sm:$0x1]  ;;  %v1964_v44 = vld [vmem:[#allocation4 + $0x6] sm:$0x1]  ;;  %v1955_v54 = vld [vmem:[#allocation4 + $0x5] sm:$0x1] }
 0x364   : > { %1921 = vrot.lane.b32.xlu2 %v1919_v57, %s3905_s26  ;;  %1918 = vst.msk [vmem:[#allocation5] sm:$0x1] %vm1916_vm15, %v1915_v35  ;;  %v1946_v29 = vld [vmem:[#allocation4 + $0x4] sm:$0x1]  ;;  %v1973_v22 = vld [vmem:[#allocation4 + $0x7] sm:$0x1]  ;;  %vm1962_vm15 = vmand %vm5018_vm13, %vm5023_vm14 }
 0x36b   : > { %2004 = vrot.lane.b32.xlu0 %v2002_v10, %s3908_s19  ;;  %1998 = vrot.lane.b32.xlu1 %v1996_v42, %s3906_s12  ;;  %s3142_s12 = scalar_lea.sflag [#allocation8], %s4046_s28 }
 0x36c   : > { %1992 = vrot.lane.b32.xlu2 %v1990_v9, %s3907_s20  ;;  %s3828_s20 = sshra.s32 %s3157_s23, 4  ;;  %s3829_s20 = int_to_ptr.hbm [resolvable:$true] %s3828_s20 }
 0x36d   : > { %p3835_p0 = scmp.lt.s32.totalorder %s3829_s20, %s5830_s6 }
 0x373   : > { %1966 = vrot.lane.b32.xlu0 %v1964_v44, %s3909_s15  ;;  %1957 = vrot.lane.b32.xlu1 %v1955_v54, %s3910_s8 }
 0x374   : > { %1948 = vrot.lane.b32.xlu2 %v1946_v29, %s3908_s19  ;;  %s3830_s19 = scalar_lea.hbm %s3829_s20, 32 }
 0x375   : > { %p3831_p4 = scmp.ne.s32.totalorder %s3829_s20, %s3830_s19 }
 0x377   : > { %p3832_p6 = pnand %p3831_p4, %p4001_p11 }
 0x379   : > { %p3833_p13 = pneg %p3832_p6 }
 0x37b   : > { %2022 = vrot.lane.b32.xlu0 %v2020_v33, %s3911_s16  ;;  %2016 = vrot.lane.b32.xlu1 %v2014_v39, %s3909_s15 }
 0x37c   : > { %2010 = vrot.lane.b32.xlu2 %v2008_v38, %s3910_s8  ;;  %s3834_s8 = scalar_lea.hbm %s5830_s6, 64 }
 0x37d   : > { %p3836_p3 = scmp.lt.s32.totalorder %s3834_s8, %s3830_s19 }
 0x37f   : > { %p3837_p5 = por %p3836_p3, %p3835_p0 }
 0x381   : > { %p3838_p8 = pnand %p3837_p5, %p3833_p13 }
 0x383   : > { %2048 = vperm.xlu1 %3528, %v2042_v13  }
 0x384   : > { %1975 = vrot.lane.b32.xlu2 %v1973_v22, %s3911_s16 }
 0x38c   : > { %2053 = vperm.xlu2 %3529, %v2043_v58  }
 0x3be   : > { %v1922_v19 = vpop.permute.xlu2 %1921 }
 0x3bf   : > { %1927 = vst.msk [vmem:[#allocation5] sm:$0x1] %vm1926_vm2, %v1922_v19 }
 0x3c6   : > { %v1993_v45 = vpop.permute.xlu2 %1992 }
 0x3cd   : > { %v1987_v31 = vpop.permute.xlu0 %1986 }
 0x3ce   : > { %1989 = vst.msk [vmem:[#allocation5 + $0x1] sm:$0x1] %vm1926_vm2, %v1987_v31  ;;  %v1949_v51 = vpop.permute.xlu2 %1948  ;;  %vm5053_vm2 = vcmp.ge.s32.totalorder %v320_v32, 112 }
 0x3cf   : > { %1995 = vst.msk [vmem:[#allocation5 + $0x1] sm:$0x1] %vm1935_vm5, %v1993_v45 }
 0x3d5   : > { %v1931_v53 = vpop.permute.xlu1 %1930  ;;  %v1940_v47 = vpop.permute.xlu0 %1939 }
 0x3d6   : > { %1936 = vst.msk [vmem:[#allocation5] sm:$0x1] %vm1935_vm5, %v1931_v53  ;;  %v2011_v25 = vpop.permute.xlu2 %2010  ;;  %vm1980_vm5 = vmand %vm5053_vm2, %vm1979_vm3 }
 0x3d7   : > { %1945 = vst.msk [vmem:[#allocation5] sm:$0x1] %vm1944_vm11, %v1940_v47 }
 0x3d8   : > { %1954 = vst.msk [vmem:[#allocation5] sm:$0x1] %vm1953_vm12, %v1949_v51 }
 0x3dd   : > { %v1999_v37 = vpop.permute.xlu1 %1998  ;;  %v2005_v18 = vpop.permute.xlu0 %2004 }
 0x3de   : > { %2001 = vst.msk [vmem:[#allocation5 + $0x1] sm:$0x1] %vm1944_vm11, %v1999_v37  ;;  %v1976_v32 = vpop.permute.xlu2 %1975 }
 0x3df   : > { %2007 = vst.msk [vmem:[#allocation5 + $0x1] sm:$0x1] %vm1953_vm12, %v2005_v18 }
 0x3e0   : > { %2013 = vst.msk [vmem:[#allocation5 + $0x1] sm:$0x1] %vm1962_vm15, %v2011_v25 }
 0x3e5   : > { %v1958_v20 = vpop.permute.xlu1 %1957  ;;  %v1967_v36 = vpop.permute.xlu0 %1966 }
 0x3e6   : > { %1963 = vst.msk [vmem:[#allocation5] sm:$0x1] %vm1962_vm15, %v1958_v20  ;;  %v2054_v5 = vpop.permute.xlu2 %2053 }
 0x3e7   : > { %1972 = vst.msk [vmem:[#allocation5] sm:$0x1] %vm1971_vm4, %v1967_v36 }
 0x3e8   : > { %1981 = vst.msk [vmem:[#allocation5] sm:$0x1] %vm1980_vm5, %v1976_v32 }
 0x3ed   : > { %v2017_v16 = vpop.permute.xlu1 %2016  ;;  %v2023_v30 = vpop.permute.xlu0 %2022 }
 0x3ee   : > { %2019 = vst.msk [vmem:[#allocation5 + $0x1] sm:$0x1] %vm1971_vm4, %v2017_v16 }
 0x3ef   : > { %2025 = vst.msk [vmem:[#allocation5 + $0x1] sm:$0x1] %vm1980_vm5, %v2023_v30 }
 0x3f5   : > { %v2049_v55 = vpop.permute.xlu1 %2048 }
 0x3f6   : > { %v2026_v21 = vld [vmem:[#allocation5] sm:$0x3] }
 0x3f7   : > { %v2028_v15 = vperm.slane %v2026_v21, 0  ;;  %v2029_v1 = vperm.slane %v2026_v21, 1 }
 0x3f9   : > { %v5070_v56 = vmul.f32 %v3765_v60, %v2028_v15  ;;  %v5073_v4 = vmul.f32 %v3766_v28, %v2028_v15  ;;  %v5076_v11 = vmul.f32 %v3767_v6, %v2029_v1  ;;  %v5079_v12 = vmul.f32 %v3768_v0, %v2029_v1 }
 0x3fb   : > { %5893 = vst [vmem:[#allocation17_spill] sm:$0xff] %v5070_v56  ;;  %v2040_v2 = vpack.c.bf16 %v5073_v4, %v5070_v56  ;;  %v2041_v24 = vpack.c.bf16 %v5079_v12, %v5076_v11 }
 0x3fc   : > { %5894 = vst [vmem:[#allocation18_spill] sm:$0xff] %v5073_v4 }
 0x3fd   : > { %5895 = vst [vmem:[#allocation19_spill] sm:$0xff] %v5076_v11  ;;  %2089 = vmatpush.bf16.msra.mxu0 %v2040_v2  ;;  %2108 = vmatpush.bf16.msra.mxu1 %v2041_v24 }
 0x3fe   : > { %5896 = vst [vmem:[#allocation20_spill] sm:$0xff] %v5079_v12 }
 0x400   : > { %3360 = vmatmul.msk.bf16.vlgmr.msra.gmra.mxu0 %vm1912_vm8, %v3440_v43  ;;  %3362 = vmatmul.msk.bf16.vlgmr.msra.gmra.mxu1 %vm1912_vm8, %v3440_v43 }
 0x47d   : > { %v2091_v59 = vpop.f32.mrf.mxu0  ;;  %v2110_v48 = vpop.f32.mrf.mxu1 }
 0x47e   : > { %v2092_v61 = vadd.f32 %v2091_v59, %v2049_v55  ;;  %v2111_v46 = vadd.f32 %v2110_v48, %v2049_v55 }
 0x480   : > { %2152 = vxpose.xlu1.b32.start.end [1/1] (short) %v2111_v46, 128  ;;  %2120 = vxpose.xlu0.b32.start.end [1/1] (short) %v2092_v61, 128 }
 0x485   : > { %v2093_v50 = vpop.f32.mrf.mxu0  ;;  %v2112_v63 = vpop.f32.mrf.mxu1 }
 0x486   : > { %v2094_v41 = vadd.f32 %v2093_v50, %v2054_v5  ;;  %v2113_v14 = vadd.f32 %v2112_v63, %v2054_v5 }
 0x488   : > { %2296 = vmatpush.msra.mxu2 %v2094_v41  ;;  %2409 = vmatpush.msra.mxu3 %v2113_v14 }
 0x4e7   : > { %3530 = vset.pattern.permute.xlu0 %v3912_v62 }
 0x524   : > { %v2136_v17 = vpop.trf.xlu0  ;;  %v2168_v52 = vpop.trf.xlu1 }
 0x525   : > { %3364 = vmatmul.msk.f32.vlgmr.msra.gmra.mxu2 %vm2184_vm6, %v2136_v17  ;;  %3396 = vmatmul.msk.f32.vlgmr.msra.gmra.mxu3 %vm2184_vm6, %v2136_v17 }
 0x52c   : > { %v2137_v57 = vpop.trf.xlu0  ;;  %v2169_v34 = vpop.trf.xlu1 }
 0x52d   : > { %3365 = vmatmul.msk.f32.gmra.mxu2 %vm2184_vm6, %v2137_v57  ;;  %3397 = vmatmul.msk.f32.gmra.mxu3 %vm2184_vm6, %v2137_v57 }
 0x534   : > { %v2138_v35 = vpop.trf.xlu0  ;;  %v2170_v3 = vpop.trf.xlu1 }
 0x535   : > { %3366 = vmatmul.msk.f32.gmra.mxu2 %vm2184_vm6, %v2138_v35  ;;  %3398 = vmatmul.msk.f32.gmra.mxu3 %vm2184_vm6, %v2138_v35 }
 0x53c   : > { %v2139_v10 = vpop.trf.xlu0  ;;  %v2171_v7 = vpop.trf.xlu1 }
 0x53d   : > { %3367 = vmatmul.msk.f32.gmra.mxu2 %vm2184_vm6, %v2139_v10  ;;  %3399 = vmatmul.msk.f32.gmra.mxu3 %vm2184_vm6, %v2139_v10 }
 0x544   : > { %v2140_v42 = vpop.trf.xlu0  ;;  %v2172_v36 = vpop.trf.xlu1 }
 0x545   : > { %3368 = vmatmul.msk.f32.gmra.mxu2 %vm2184_vm6, %v2140_v42  ;;  %3400 = vmatmul.msk.f32.gmra.mxu3 %vm2184_vm6, %v2140_v42 }
 0x54c   : > { %v2141_v9 = vpop.trf.xlu0  ;;  %v2173_v30 = vpop.trf.xlu1 }
 0x54d   : > { %3369 = vmatmul.msk.f32.gmra.mxu2 %vm2184_vm6, %v2141_v9  ;;  %3401 = vmatmul.msk.f32.gmra.mxu3 %vm2184_vm6, %v2141_v9 }
 0x554   : > { %v2142_v44 = vpop.trf.xlu0  ;;  %v2174_v1 = vpop.trf.xlu1 }
 0x555   : > { %3370 = vmatmul.msk.f32.gmra.mxu2 %vm2184_vm6, %v2142_v44  ;;  %3402 = vmatmul.msk.f32.gmra.mxu3 %vm2184_vm6, %v2142_v44 }
 0x55c   : > { %v2143_v54 = vpop.trf.xlu0  ;;  %v2175_v0 = vpop.trf.xlu1 }
 0x55d   : > { %3371 = vmatmul.msk.f32.gmra.mxu2 %vm2184_vm6, %v2143_v54  ;;  %3403 = vmatmul.msk.f32.gmra.mxu3 %vm2184_vm6, %v2143_v54 }
 0x564   : > { %v2144_v29 = vpop.trf.xlu0  ;;  %v2176_v43 = vpop.trf.xlu1 }
 0x565   : > { %3372 = vmatmul.msk.f32.gmra.mxu2 %vm2184_vm6, %v2144_v29  ;;  %3404 = vmatmul.msk.f32.gmra.mxu3 %vm2184_vm6, %v2144_v29 }
 0x56c   : > { %v2145_v33 = vpop.trf.xlu0  ;;  %v2177_v48 = vpop.trf.xlu1 }
 0x56d   : > { %3373 = vmatmul.msk.f32.gmra.mxu2 %vm2184_vm6, %v2145_v33  ;;  %3405 = vmatmul.msk.f32.gmra.mxu3 %vm2184_vm6, %v2145_v33 }
 0x574   : > { %v2146_v39 = vpop.trf.xlu0  ;;  %v2178_v5 = vpop.trf.xlu1 }
 0x575   : > { %3374 = vmatmul.msk.f32.gmra.mxu2 %vm2184_vm6, %v2146_v39  ;;  %3406 = vmatmul.msk.f32.gmra.mxu3 %vm2184_vm6, %v2146_v39 }
 0x57c   : > { %v2147_v38 = vpop.trf.xlu0  ;;  %v2179_v14 = vpop.trf.xlu1 }
 0x57d   : > { %3375 = vmatmul.msk.f32.gmra.mxu2 %vm2184_vm6, %v2147_v38  ;;  %3407 = vmatmul.msk.f32.gmra.mxu3 %vm2184_vm6, %v2147_v38 }
 0x584   : > { %v2148_v22 = vpop.trf.xlu0  ;;  %v2180_v42 = vpop.trf.xlu1 }
 0x585   : > { %3376 = vmatmul.msk.f32.gmra.mxu2 %vm2184_vm6, %v2148_v22  ;;  %3408 = vmatmul.msk.f32.gmra.mxu3 %vm2184_vm6, %v2148_v22 }
 0x58c   : > { %v2149_v19 = vpop.trf.xlu0  ;;  %v2181_v38 = vpop.trf.xlu1 }
 0x58d   : > { %3377 = vmatmul.msk.f32.gmra.mxu2 %vm2184_vm6, %v2149_v19  ;;  %3409 = vmatmul.msk.f32.gmra.mxu3 %vm2184_vm6, %v2149_v19 }
 0x594   : > { %v2150_v45 = vpop.trf.xlu0 }
 0x595   : > { %3378 = vmatmul.msk.f32.gmra.mxu2 %vm2184_vm6, %v2150_v45  ;;  %3410 = vmatmul.msk.f32.gmra.mxu3 %vm2184_vm6, %v2150_v45 }
 0x59c   : > { %v2151_v31 = vpop.trf.xlu0 }
 0x59d   : > { %3379 = vmatmul.msk.f32.gmra.mxu2 %vm2184_vm6, %v2151_v31  ;;  %3411 = vmatmul.msk.f32.gmra.mxu3 %vm2184_vm6, %v2151_v31  ;;  %v2182_v31 = vpop.trf.xlu1 }
 0x5a5   : > { %3380 = vmatmul.msk.f32.gmra.mxu2 %vm2184_vm6, %v2168_v52  ;;  %3412 = vmatmul.msk.f32.gmra.mxu3 %vm2184_vm6, %v2168_v52 }
 0x5a8   : > { %v5124_v49 = vpop.f32.mrf.mxu2  ;;  %v5126_v51 = vpop.f32.mrf.mxu3 }
 0x5ad   : > { %3381 = vmatmul.msk.f32.gmra.mxu2 %vm2184_vm6, %v2169_v34  ;;  %3413 = vmatmul.msk.f32.gmra.mxu3 %vm2184_vm6, %v2169_v34 }
 0x5b0   : > { %v5130_v23 = vpop.f32.mrf.mxu2  ;;  %v5132_v53 = vpop.f32.mrf.mxu3 }
 0x5b5   : > { %3382 = vmatmul.msk.f32.gmra.mxu2 %vm2184_vm6, %v2170_v3  ;;  %3414 = vmatmul.msk.f32.gmra.mxu3 %vm2184_vm6, %v2170_v3 }
 0x5b8   : > { %v5136_v47 = vpop.f32.mrf.mxu2  ;;  %v5138_v26 = vpop.f32.mrf.mxu3 }
 0x5bd   : > { %3383 = vmatmul.msk.f32.gmra.mxu2 %vm2184_vm6, %v2171_v7  ;;  %3415 = vmatmul.msk.f32.gmra.mxu3 %vm2184_vm6, %v2171_v7 }
 0x5c0   : > { %v5142_v25 = vpop.f32.mrf.mxu2  ;;  %v5144_v37 = vpop.f32.mrf.mxu3 }
 0x5c5   : > { %3384 = vmatmul.msk.f32.gmra.mxu2 %vm2184_vm6, %v2172_v36  ;;  %3416 = vmatmul.msk.f32.gmra.mxu3 %vm2184_vm6, %v2172_v36 }
 0x5c8   : > { %v5146_v18 = vpop.f32.mrf.mxu2  ;;  %v5148_v13 = vpop.f32.mrf.mxu3 }
 0x5cd   : > { %3385 = vmatmul.msk.f32.gmra.mxu2 %vm2184_vm6, %v2173_v30  ;;  %3417 = vmatmul.msk.f32.gmra.mxu3 %vm2184_vm6, %v2173_v30  ;;  %v2183_v30 = vpop.trf.xlu1 }
 0x5d0   : > { %v5150_v58 = vpop.f32.mrf.mxu2  ;;  %v5152_v27 = vpop.f32.mrf.mxu3 }
 0x5d5   : > { %3386 = vmatmul.msk.f32.gmra.mxu2 %vm2184_vm6, %v2174_v1  ;;  %3418 = vmatmul.msk.f32.gmra.mxu3 %vm2184_vm6, %v2174_v1 }
 0x5d8   : > { %v5154_v8 = vpop.f32.mrf.mxu2  ;;  %v5156_v62 = vpop.f32.mrf.mxu3 }
 0x5dd   : > { %3387 = vmatmul.msk.f32.gmra.mxu2 %vm2184_vm6, %v2175_v0  ;;  %3419 = vmatmul.msk.f32.gmra.mxu3 %vm2184_vm6, %v2175_v0 }
 0x5e0   : > { %v5158_v40 = vpop.f32.mrf.mxu2  ;;  %v5160_v20 = vpop.f32.mrf.mxu3 }
 0x5e1   : > { %v2528_v0 = vmax.f32 %v5158_v40, %v5160_v20 }
 0x5e5   : > { %3388 = vmatmul.msk.f32.gmra.mxu2 %vm2184_vm6, %v2176_v43  ;;  %3420 = vmatmul.msk.f32.gmra.mxu3 %vm2184_vm6, %v2176_v43  ;;  %v2519_v43 = vmax.f32 %v5146_v18, %v5148_v13 }
 0x5e8   : > { %v5164_v32 = vpop.f32.mrf.mxu2  ;;  %v5166_v16 = vpop.f32.mrf.mxu3 }
 0x5e9   : > { %v2531_v45 = vmax.f32 %v5164_v32, %v5166_v16 }
 0x5ed   : > { %3389 = vmatmul.msk.f32.gmra.mxu2 %vm2184_vm6, %v2177_v48  ;;  %3421 = vmatmul.msk.f32.gmra.mxu3 %vm2184_vm6, %v2177_v48  ;;  %v2522_v48 = vmax.f32 %v5150_v58, %v5152_v27 }
 0x5f0   : > { %v5170_v21 = vpop.f32.mrf.mxu2  ;;  %v5172_v15 = vpop.f32.mrf.mxu3 }
 0x5f1   : > { %v2534_v7 = vmax.f32 %v5170_v21, %v5172_v15 }
 0x5f5   : > { %3390 = vmatmul.msk.f32.gmra.mxu2 %vm2184_vm6, %v2178_v5  ;;  %3422 = vmatmul.msk.f32.gmra.mxu3 %vm2184_vm6, %v2178_v5  ;;  %v2513_v5 = vmax.f32 %v5136_v47, %v5138_v26 }
 0x5f8   : > { %v5176_v60 = vpop.f32.mrf.mxu2  ;;  %v5178_v28 = vpop.f32.mrf.mxu3 }
 0x5f9   : > { %v2537_v6 = vmax.f32 %v5176_v60, %v5178_v28 }
 0x5fb   : > { %2538 = vmax.xlane.f32.xlu1 %v2537_v6  ;;  %v2525_v6 = vmax.f32 %v5154_v8, %v5156_v62 }
 0x5fd   : > { %3391 = vmatmul.msk.f32.gmra.mxu2 %vm2184_vm6, %v2179_v14  ;;  %3423 = vmatmul.msk.f32.gmra.mxu3 %vm2184_vm6, %v2179_v14 }
 0x600   : > { %v5184_v2 = vpop.f32.mrf.mxu2  ;;  %v5186_v24 = vpop.f32.mrf.mxu3 }
 0x601   : > { %v2540_v39 = vmax.f32 %v5184_v2, %v5186_v24 }
 0x605   : > { %3392 = vmatmul.msk.f32.gmra.mxu2 %vm2184_vm6, %v2180_v42  ;;  %3424 = vmatmul.msk.f32.gmra.mxu3 %vm2184_vm6, %v2180_v42 }
 0x608   : > { %v5190_v55 = vpop.f32.mrf.mxu2  ;;  %v5192_v59 = vpop.f32.mrf.mxu3 }
 0x609   : > { %v2543_v35 = vmax.f32 %v5190_v55, %v5192_v59 }
 0x60d   : > { %3393 = vmatmul.msk.f32.gmra.mxu2 %vm2184_vm6, %v2181_v38  ;;  %3425 = vmatmul.msk.f32.gmra.mxu3 %vm2184_vm6, %v2181_v38 }
 0x610   : > { %v5196_v61 = vpop.f32.mrf.mxu2  ;;  %v5198_v46 = vpop.f32.mrf.mxu3 }
 0x611   : > { %v2546_v54 = vmax.f32 %v5196_v61, %v5198_v46 }
 0x615   : > { %3394 = vmatmul.msk.f32.gmra.mxu2 %vm2184_vm6, %v2182_v31  ;;  %3426 = vmatmul.msk.f32.gmra.mxu3 %vm2184_vm6, %v2182_v31 }
 0x618   : > { %v5202_v50 = vpop.f32.mrf.mxu2  ;;  %v5204_v63 = vpop.f32.mrf.mxu3 }
 0x619   : > { %v2549_v41 = vmax.f32 %v5202_v50, %v5204_v63 }
 0x61b   : > { %2550 = vmax.xlane.f32.xlu2 %v2549_v41  ;;  %v2516_v41 = vmax.f32 %v5142_v25, %v5144_v37 }
 0x61d   : > { %3395 = vmatmul.msk.f32.gmra.mxu2 %vm2184_vm6, %v2183_v30  ;;  %3427 = vmatmul.msk.f32.gmra.mxu3 %vm2184_vm6, %v2183_v30 }
 0x620   : > { %v5210_v17 = vpop.f32.mrf.mxu2  ;;  %v5212_v57 = vpop.f32.mrf.mxu3 }
 0x621   : > { %v2552_v10 = vmax.f32 %v5210_v17, %v5212_v57 }
 0x623   : > { %2544 = vmax.xlane.f32.xlu2 %v2543_v35  ;;  %2553 = vmax.xlane.f32.xlu0 %v2552_v10  ;;  %v2507_v10 = vmax.f32 %v5124_v49, %v5126_v51 }
 0x628   : > { %v5220_v9 = vpop.f32.mrf.mxu2  ;;  %v5222_v44 = vpop.f32.mrf.mxu3 }
 0x629   : > { %5897 = vst [vmem:[#allocation21_spill] sm:$0xff] %v5220_v9 }
 0x62a   : > { %5898 = vst [vmem:[#allocation22_spill] sm:$0xff] %v5222_v44 }
 0x62b   : > { %2547 = vmax.xlane.f32.xlu2 %v2546_v54 }
 0x630   : > { %v5226_v29 = vpop.f32.mrf.mxu2  ;;  %v5228_v33 = vpop.f32.mrf.mxu3 }
 0x631   : > { %5899 = vst [vmem:[#allocation23_spill] sm:$0xff] %v5226_v29  ;;  %v2558_v1 = vmax.f32 %v5226_v29, %v5228_v33 }
 0x632   : > { %5900 = vst [vmem:[#allocation24_spill] sm:$0xff] %v5228_v33 }
 0x633   : > { %2541 = vmax.xlane.f32.xlu2 %v2540_v39  ;;  %v2510_v39 = vmax.f32 %v5130_v23, %v5132_v53 }
 0x638   : > { %v5234_v22 = vpop.f32.mrf.mxu2  ;;  %v5236_v19 = vpop.f32.mrf.mxu3 }
 0x639   : > { %v2561_v52 = vmax.f32 %v5234_v22, %v5236_v19 }
 0x63b   : > { %2532 = vmax.xlane.f32.xlu2 %v2531_v45  ;;  %2562 = vmax.xlane.f32.xlu0 %v2561_v52 }
 0x640   : > { %v5244_v34 = vpop.f32.mrf.mxu2  ;;  %v5246_v3 = vpop.f32.mrf.mxu3 }
 0x641   : > { %5901 = vst [vmem:[#allocation25_spill] sm:$0xff] %v5244_v34  ;;  %v2564_v36 = vmax.f32 %v5244_v34, %v5246_v3 }
 0x642   : > { %5902 = vst [vmem:[#allocation26_spill] sm:$0xff] %v5246_v3 }
 0x643   : > { %2535 = vmax.xlane.f32.xlu2 %v2534_v7  ;;  %2565 = vmax.xlane.f32.xlu1 %v2564_v36 }
 0x648   : > { %v5268_v14 = vpop.f32.mrf.mxu2  ;;  %v5270_v35 = vpop.f32.mrf.mxu3 }
 0x649   : > { %v2567_v38 = vmax.f32 %v5268_v14, %v5270_v35 }
 0x64b   : > { %2526 = vmax.xlane.f32.xlu2 %v2525_v6  ;;  %2559 = vmax.xlane.f32.xlu1 %v2558_v1 }
 0x650   : > { %v5274_v42 = vpop.f32.mrf.mxu2  ;;  %v5276_v54 = vpop.f32.mrf.mxu3 }
 0x651   : > { %v2570_v7 = vmax.f32 %v5274_v42, %v5276_v54 }
 0x653   : > { %2529 = vmax.xlane.f32.xlu2 %v2528_v0 }
 0x658   : > { %v5282_v45 = vpop.f32.mrf.mxu2  ;;  %v5284_v52 = vpop.f32.mrf.mxu3 }
 0x659   : > { %v2573_v6 = vmax.f32 %v5282_v45, %v5284_v52 }
 0x65b   : > { %2520 = vmax.xlane.f32.xlu2 %v2519_v43 }
 0x660   : > { %v5290_v36 = vpop.f32.mrf.mxu2  ;;  %v5292_v30 = vpop.f32.mrf.mxu3 }
 0x663   : > { %2523 = vmax.xlane.f32.xlu2 %v2522_v48 }
 0x668   : > { %v5296_v0 = vpop.f32.mrf.mxu2  ;;  %v5298_v43 = vpop.f32.mrf.mxu3 }
 0x66b   : > { %2514 = vmax.xlane.f32.xlu2 %v2513_v5  ;;  %v2576_v5 = vmax.f32 %v5290_v36, %v5292_v30 }
 0x673   : > { %2517 = vmax.xlane.f32.xlu2 %v2516_v41  ;;  %v5304_v41 = vpop.f32.mrf.mxu2 }
 0x67b   : > { %2508 = vmax.xlane.f32.xlu2 %v2507_v10  ;;  %v5316_v56 = vpop.f32.mrf.mxu2 }
 0x683   : > { %2511 = vmax.xlane.f32.xlu2 %v2510_v39  ;;  %v5306_v39 = vpop.f32.mrf.mxu3  ;;  %v5330_v3 = vpop.f32.mrf.mxu2 }
 0x68b   : > { %2568 = vmax.xlane.f32.xlu2 %v2567_v38  ;;  %v5318_v33 = vpop.f32.mrf.mxu3 }
 0x68e   : > { %v5286_v31 = vpop.xlane.xlu2 %2550 }
 0x693   : > { %2571 = vmax.xlane.f32.xlu2 %v2570_v7  ;;  %v5332_v34 = vpop.f32.mrf.mxu3 }
 0x696   : > { %v2545_v1 = vpop.xlane.xlu2 %2544 }
 0x69b   : > { %2574 = vmax.xlane.f32.xlu2 %v2573_v6  ;;  %v2579_v6 = vmax.f32 %v5296_v0, %v5298_v43 }
 0x69e   : > { %v5300_v48 = vpop.xlane.xlu2 %2547 }
 0x6a3   : > { %2577 = vmax.xlane.f32.xlu2 %v2576_v5  ;;  %v2582_v5 = vmax.f32 %v5304_v41, %v5306_v39 }
 0x6a6   : > { %v2542_v10 = vpop.xlane.xlu2 %2541 }
 0x6a7   : > { %v2625_v38 = vsub.f32 %v5184_v2, %v2542_v10  ;;  %v2626_v7 = vsub.f32 %v5186_v24, %v2542_v10 }
 0x6a9   : > { %v2711_v12 = vmul.f32 1.442695, %v2625_v38  ;;  %v2713_v11 = vmul.f32 1.442695, %v2626_v7  ;;  %v2585_v7 = vmax.f32 %v5316_v56, %v5318_v33 }
 0x6ab   : > { %3573 = vpow2.f32 %v2711_v12  ;;  %2580 = vmax.xlane.f32.xlu2 %v2579_v6 }
 0x6ac   : > { %3575 = vpow2.f32 %v2713_v11 }
 0x6ae   : > { %v5312_v4 = vpop.xlane.xlu2 %2532 }
 0x6b1   : > { %v5320_v2 = vpop.eup %3573 }
 0x6b2   : > { %5903 = vst [vmem:[#allocation27_spill] sm:$0xff] %v5320_v2  ;;  %v5322_v24 = vpop.eup %3575 }
 0x6b3   : > { %5904 = vst [vmem:[#allocation28_spill] sm:$0xff] %v5322_v24  ;;  %2583 = vmax.xlane.f32.xlu2 %v2582_v5  ;;  %v2828_v10 = vadd.f32 %v5322_v24, %v5320_v2  ;;  %v2555_v5 = vmax.f32 %v5220_v9, %v5222_v44 }
 0x6b5   : > { %2829 = vadd.xlane.f32.xlu0 %v2828_v10 }
 0x6b6   : > { %v2536_v12 = vpop.xlane.xlu2 %2535 }
 0x6b7   : > { %v2621_v11 = vsub.f32 %v5170_v21, %v2536_v12  ;;  %v2622_v38 = vsub.f32 %v5172_v15, %v2536_v12  ;;  %v2627_v21 = vsub.f32 %v5190_v55, %v2545_v1 }
 0x6b9   : > { %v2703_v6 = vmul.f32 1.442695, %v2621_v11  ;;  %v2705_v29 = vmul.f32 1.442695, %v2622_v38  ;;  %v2588_v11 = vmax.f32 %v5330_v3, %v5332_v34  ;;  %v2628_v38 = vsub.f32 %v5192_v59, %v2545_v1 }
 0x6bb   : > { %3577 = vpow2.f32 %v2703_v6  ;;  %2586 = vmax.xlane.f32.xlu2 %v2585_v7  ;;  %v5350_v7 = vpop.f32.mrf.mxu3 }
 0x6bc   : > { %3579 = vpow2.f32 %v2705_v29  ;;  %v2715_v29 = vmul.f32 1.442695, %v2627_v21 }
 0x6bd   : > { %2556 = vmax.xlane.f32.xlu0 %v2555_v5 }
 0x6be   : > { %v2527_v10 = vpop.xlane.xlu2 %2526 }
 0x6bf   : > { %v2615_v15 = vsub.f32 %v5154_v8, %v2527_v10  ;;  %v2616_v12 = vsub.f32 %v5156_v62, %v2527_v10  ;;  %v2717_v8 = vmul.f32 1.442695, %v2628_v38  ;;  %v5348_v62 = vpop.f32.mrf.mxu2 }
 0x6c1   : > { %v5342_v24 = vpop.eup %3577  ;;  %v2691_v2 = vmul.f32 1.442695, %v2615_v15  ;;  %v2693_v44 = vmul.f32 1.442695, %v2616_v12 }
 0x6c2   : > { %5905 = vst [vmem:[#allocation29_spill] sm:$0xff] %v5342_v24  ;;  %v5344_v6 = vpop.eup %3579 }
 0x6c3   : > { %5906 = vst [vmem:[#allocation30_spill] sm:$0xff] %v5344_v6  ;;  %3581 = vpow2.f32 %v2691_v2  ;;  %2589 = vmax.xlane.f32.xlu2 %v2588_v11  ;;  %v2822_v55 = vadd.f32 %v5344_v6, %v5342_v24  ;;  %v2591_v2 = vmax.f32 %v5348_v62, %v5350_v7 }
 0x6c4   : > { %3583 = vpow2.f32 %v2693_v44 }
 0x6c5   : > { %2823 = vadd.xlane.f32.xlu0 %v2822_v55  ;;  %3585 = vpow2.f32 %v2715_v29 }
 0x6c6   : > { %v2530_v59 = vpop.xlane.xlu2 %2529  ;;  %3587 = vpow2.f32 %v2717_v8 }
 0x6c7   : > { %v2617_v1 = vsub.f32 %v5158_v40, %v2530_v59  ;;  %v2618_v5 = vsub.f32 %v5160_v20, %v2530_v59 }
 0x6c9   : > { %v5356_v10 = vpop.eup %3581  ;;  %v2695_v21 = vmul.f32 1.442695, %v2617_v1  ;;  %v2697_v15 = vmul.f32 1.442695, %v2618_v5 }
 0x6ca   : > { %5907 = vst [vmem:[#allocation31_spill] sm:$0xff] %v5356_v10  ;;  %v5358_v44 = vpop.eup %3583 }
 0x6cb   : > { %5908 = vst [vmem:[#allocation32_spill] sm:$0xff] %v5358_v44  ;;  %3589 = vpow2.f32 %v2695_v21  ;;  %2592 = vmax.xlane.f32.xlu2 %v2591_v2  ;;  %v2813_v12 = vadd.f32 %v5358_v44, %v5356_v10  ;;  %v5362_v11 = vpop.eup %3585  ;;  %v5374_v2 = vpop.f32.mrf.mxu2 }
 0x6cc   : > { %3591 = vpow2.f32 %v2697_v15  ;;  %5909 = vst [vmem:[#allocation33_spill] sm:$0xff] %v5362_v11  ;;  %v5364_v40 = vpop.eup %3587  ;;  %v5376_v21 = vpop.f32.mrf.mxu3  ;;  %v2631_v15 = vsub.f32 %v5202_v50, %v5286_v31 }
 0x6cd   : > { %2814 = vadd.xlane.f32.xlu0 %v2813_v12  ;;  %5910 = vst [vmem:[#allocation34_spill] sm:$0xff] %v5364_v40  ;;  %v2831_v1 = vadd.f32 %v5364_v40, %v5362_v11  ;;  %v2594_v12 = vmax.f32 %v5374_v2, %v5376_v21 }
 0x6ce   : > { %v2521_v20 = vpop.xlane.xlu2 %2520 }
 0x6cf   : > { %v2611_v38 = vsub.f32 %v5146_v18, %v2521_v20  ;;  %v2612_v29 = vsub.f32 %v5148_v13, %v2521_v20  ;;  %v2632_v20 = vsub.f32 %v5204_v63, %v5286_v31 }
 0x6d1   : > { %v5368_v55 = vpop.eup %3589  ;;  %v2683_v8 = vmul.f32 1.442695, %v2611_v38  ;;  %v2685_v59 = vmul.f32 1.442695, %v2612_v29 }
 0x6d2   : > { %5911 = vst [vmem:[#allocation35_spill] sm:$0xff] %v5368_v55  ;;  %v5372_v5 = vpop.eup %3591 }
 0x6d3   : > { %5912 = vst [vmem:[#allocation36_spill] sm:$0xff] %v5372_v5  ;;  %3593 = vpow2.f32 %v2683_v8  ;;  %2832 = vadd.xlane.f32.xlu2 %v2831_v1  ;;  %v2816_v18 = vadd.f32 %v5372_v5, %v5368_v55  ;;  %v2723_v8 = vmul.f32 1.442695, %v2631_v15  ;;  %v2725_v1 = vmul.f32 1.442695, %v2632_v20 }
 0x6d4   : > { %3595 = vpow2.f32 %v2685_v59  ;;  %v5396_v44 = vpop.f32.mrf.mxu3  ;;  %v2629_v20 = vsub.f32 %v5196_v61, %v5300_v48 }
 0x6d5   : > { %2817 = vadd.xlane.f32.xlu1 %v2816_v18  ;;  %v5394_v18 = vpop.f32.mrf.mxu2  ;;  %3597 = vpow2.f32 %v2723_v8 }
 0x6d6   : > { %v5380_v13 = vpop.xlane.xlu2 %2523  ;;  %v2597_v63 = vmax.f32 %v5394_v18, %v5396_v44  ;;  %3599 = vpow2.f32 %v2725_v1 }
 0x6d9   : > { %v5388_v38 = vpop.eup %3593 }
 0x6da   : > { %5913 = vst [vmem:[#allocation37_spill] sm:$0xff] %v5388_v38  ;;  %v5390_v29 = vpop.eup %3595 }
 0x6db   : > { %5914 = vst [vmem:[#allocation38_spill] sm:$0xff] %v5390_v29  ;;  %2595 = vmax.xlane.f32.xlu2 %v2594_v12  ;;  %v2807_v59 = vadd.f32 %v5390_v29, %v5388_v38  ;;  %v5402_v31 = vpop.eup %3597  ;;  %v2539_v29 = vpop.xlane.xlu1 %2538  ;;  %v2719_v38 = vmul.f32 1.442695, %v2629_v20 }
 0x6dc   : > { %v5404_v15 = vpop.eup %3599  ;;  %v5416_v10 = vpop.f32.mrf.mxu3  ;;  %v2623_v55 = vsub.f32 %v5176_v60, %v2539_v29  ;;  %v2619_v60 = vsub.f32 %v5164_v32, %v5312_v4 }
 0x6dd   : > { %2808 = vadd.xlane.f32.xlu1 %v2807_v59  ;;  %v2630_v59 = vsub.f32 %v5198_v46, %v5300_v48  ;;  %v2837_v8 = vadd.f32 %v5404_v15, %v5402_v31  ;;  %3601 = vpow2.f32 %v2719_v38  ;;  %v2624_v46 = vsub.f32 %v5178_v28, %v2539_v29  ;;  %v2554_v29 = vpop.xlane.xlu0 %2553 }
 0x6de   : > { %v5398_v50 = vpop.xlane.xlu2 %2514  ;;  %v2707_v48 = vmul.f32 1.442695, %v2623_v55  ;;  %v2620_v38 = vsub.f32 %v5166_v16, %v5312_v4  ;;  %v2699_v55 = vmul.f32 1.442695, %v2619_v60  ;;  %v2634_v32 = vsub.f32 %v5212_v57, %v2554_v29 }
 0x6df   : > { %v2721_v1 = vmul.f32 1.442695, %v2630_v59  ;;  %v2709_v20 = vmul.f32 1.442695, %v2624_v46 }
 0x6e1   : > { %3603 = vpow2.f32 %v2721_v1  ;;  %v2701_v1 = vmul.f32 1.442695, %v2620_v38 }
 0x6e2   : > { %3605 = vpow2.f32 %v2707_v48  ;;  %v2633_v48 = vsub.f32 %v5210_v17, %v2554_v29 }
 0x6e3   : > { %2598 = vmax.xlane.f32.xlu2 %v2597_v63  ;;  %v5414_v63 = vpop.f32.mrf.mxu2  ;;  %3607 = vpow2.f32 %v2709_v20  ;;  %v2729_v20 = vmul.f32 1.442695, %v2634_v32 }
 0x6e4   : > { %v2600_v61 = vmax.f32 %v5414_v63, %v5416_v10  ;;  %3609 = vpow2.f32 %v2699_v55  ;;  %v2727_v16 = vmul.f32 1.442695, %v2633_v48 }
 0x6e5   : > { %3611 = vpow2.f32 %v2701_v1 }
 0x6e6   : > { %v5406_v12 = vpop.xlane.xlu2 %2517  ;;  %3613 = vpow2.f32 %v2727_v16 }
 0x6e7   : > { %3615 = vpow2.f32 %v2729_v20 }
 0x6eb   : > { %2838 = vadd.xlane.f32.xlu2 %v2837_v8  ;;  %v5424_v8 = vpop.eup %3601 }
 0x6ec   : > { %5915 = vst [vmem:[#allocation39_spill] sm:$0xff] %v5424_v8  ;;  %v5426_v59 = vpop.eup %3603 }
 0x6ed   : > { %5916 = vst [vmem:[#allocation40_spill] sm:$0xff] %v5426_v59  ;;  %v2834_v28 = vadd.f32 %v5426_v59, %v5424_v8 }
 0x6ee   : > { %v5418_v5 = vpop.xlane.xlu2 %2508 }
 0x6f3   : > { %2601 = vmax.xlane.f32.xlu2 %v2600_v61  ;;  %v5436_v61 = vpop.eup %3605 }
 0x6f4   : > { %5917 = vst [vmem:[#allocation41_spill] sm:$0xff] %v5436_v61  ;;  %v5438_v46 = vpop.eup %3607 }
 0x6f5   : > { %5918 = vst [vmem:[#allocation42_spill] sm:$0xff] %v5438_v46  ;;  %v2825_v4 = vadd.f32 %v5438_v46, %v5436_v61  ;;  %v5446_v60 = vpop.eup %3609 }
 0x6f6   : > { %v5428_v6 = vpop.xlane.xlu2 %2511  ;;  %5919 = vst [vmem:[#allocation43_spill] sm:$0xff] %v5446_v60  ;;  %v5448_v38 = vpop.eup %3611 }
 0x6f7   : > { %5920 = vst [vmem:[#allocation44_spill] sm:$0xff] %v5448_v38  ;;  %v2819_v17 = vadd.f32 %v5448_v38, %v5446_v60  ;;  %v5454_v57 = vpop.eup %3613 }
 0x6f8   : > { %v5456_v55 = vpop.eup %3615 }
 0x6f9   : > { %v2840_v1 = vadd.f32 %v5456_v55, %v5454_v57 }
 0x6fb   : > { %2835 = vadd.xlane.f32.xlu2 %v2834_v28 }
 0x6fe   : > { %v5440_v24 = vpop.xlane.xlu2 %2568 }
 0x703   : > { %2826 = vadd.xlane.f32.xlu2 %v2825_v4 }
 0x706   : > { %v5450_v28 = vpop.xlane.xlu2 %2571 }
 0x70b   : > { %2820 = vadd.xlane.f32.xlu2 %v2819_v17 }
 0x70e   : > { %v5458_v29 = vpop.xlane.xlu2 %2574 }
 0x713   : > { %2841 = vadd.xlane.f32.xlu2 %v2840_v1 }
 0x716   : > { %v5462_v48 = vpop.xlane.xlu2 %2577 }
 0x71e   : > { %v2581_v32 = vpop.xlane.xlu2 %2580 }
 0x71f   : > { %v2651_v11 = vsub.f32 %v5296_v0, %v2581_v32 }
 0x726   : > { %v5464_v4 = vpop.xlane.xlu2 %2583 }
 0x72e   : > { %v2587_v16 = vpop.xlane.xlu2 %2586 }
 0x72f   : > { %v2655_v20 = vsub.f32 %v5316_v56, %v2587_v16  ;;  %v2656_v17 = vsub.f32 %v5318_v33, %v2587_v16  ;;  %v2652_v56 = vsub.f32 %v5298_v43, %v2581_v32 }
 0x731   : > { %v2771_v38 = vmul.f32 1.442695, %v2655_v20  ;;  %v2773_v60 = vmul.f32 1.442695, %v2656_v17  ;;  %v2604_v17 = vsub.f32 %v5126_v51, %v5418_v5  ;;  %v2645_v51 = vsub.f32 %v5274_v42, %v5450_v28 }
 0x733   : > { %3617 = vpow2.f32 %v2771_v38 }
 0x734   : > { %3619 = vpow2.f32 %v2773_v60  ;;  %v2763_v60 = vmul.f32 1.442695, %v2651_v11  ;;  %v2610_v11 = vsub.f32 %v5144_v37, %v5406_v12  ;;  %v2603_v37 = vsub.f32 %v5124_v49, %v5418_v5 }
 0x736   : > { %v2590_v46 = vpop.xlane.xlu2 %2589 }
 0x737   : > { %v2657_v61 = vsub.f32 %v5330_v3, %v2590_v46  ;;  %v2658_v40 = vsub.f32 %v5332_v34, %v2590_v46  ;;  %v2765_v3 = vmul.f32 1.442695, %v2652_v56 }
 0x739   : > { %v5470_v1 = vpop.eup %3617  ;;  %v2775_v59 = vmul.f32 1.442695, %v2657_v61  ;;  %v2777_v8 = vmul.f32 1.442695, %v2658_v40  ;;  %v2609_v40 = vsub.f32 %v5142_v25, %v5406_v12 }
 0x73a   : > { %v5473_v9 = vpop.eup %3619 }
 0x73b   : > { %3621 = vpow2.f32 %v2775_v59  ;;  %v2873_v33 = vadd.f32 %v5473_v9, %v5470_v1 }
 0x73c   : > { %3623 = vpow2.f32 %v2777_v8  ;;  %v2681_v8 = vmul.f32 1.442695, %v2610_v11 }
 0x73d   : > { %2874 = vadd.xlane.f32.xlu2 %v2873_v33  ;;  %3625 = vpow2.f32 %v2763_v60  ;;  %v2667_v60 = vmul.f32 1.442695, %v2603_v37 }
 0x73e   : > { %v2593_v38 = vpop.xlane.xlu2 %2592  ;;  %3627 = vpow2.f32 %v2765_v3  ;;  %v2669_v3 = vmul.f32 1.442695, %v2604_v17 }
 0x73f   : > { %v2659_v34 = vsub.f32 %v5348_v62, %v2593_v38  ;;  %v2660_v46 = vsub.f32 %v5350_v7, %v2593_v38  ;;  %v2679_v7 = vmul.f32 1.442695, %v2609_v40 }
 0x741   : > { %v5480_v0 = vpop.eup %3621  ;;  %v2779_v43 = vmul.f32 1.442695, %v2659_v34  ;;  %v2781_v59 = vmul.f32 1.442695, %v2660_v46 }
 0x742   : > { %v5484_v61 = vpop.eup %3623 }
 0x743   : > { %3629 = vpow2.f32 %v2779_v43  ;;  %v2876_v62 = vadd.f32 %v5484_v61, %v5480_v0  ;;  %v5492_v25 = vpop.eup %3625 }
 0x744   : > { %3631 = vpow2.f32 %v2781_v59  ;;  %v5494_v16 = vpop.eup %3627  ;;  %v2646_v59 = vsub.f32 %v5276_v54, %v5450_v28  ;;  %v2653_v54 = vsub.f32 %v5304_v41, %v5464_v4 }
 0x745   : > { %2877 = vadd.xlane.f32.xlu0 %v2876_v62  ;;  %3633 = vpow2.f32 %v2679_v7  ;;  %v2867_v56 = vadd.f32 %v5494_v16, %v5492_v25 }
 0x746   : > { %v5490_v32 = vpop.xlane.xlu2 %2832  ;;  %3635 = vpow2.f32 %v2681_v8 }
 0x747   : > { %3637 = vpow2.f32 %v2667_v60  ;;  %v2654_v60 = vsub.f32 %v5306_v39, %v5464_v4  ;;  %v2647_v39 = vsub.f32 %v5282_v45, %v5458_v29  ;;  %v2613_v45 = vsub.f32 %v5150_v58, %v5380_v13 }
 0x748   : > { %3639 = vpow2.f32 %v2669_v3  ;;  %v2767_v3 = vmul.f32 1.442695, %v2653_v54  ;;  %v2614_v54 = vsub.f32 %v5152_v27, %v5380_v13  ;;  %v2606_v58 = vsub.f32 %v5132_v53, %v5428_v6  ;;  %v2563_v27 = vpop.xlane.xlu0 %2562 }
 0x749   : > { %v5496_v20 = vpop.eup %3629  ;;  %v2769_v41 = vmul.f32 1.442695, %v2654_v60 }
 0x74a   : > { %v5500_v12 = vpop.eup %3631  ;;  %v2689_v13 = vmul.f32 1.442695, %v2614_v54  ;;  %v2650_v54 = vsub.f32 %v5292_v30, %v5462_v48 }
 0x74b   : > { %v2879_v33 = vadd.f32 %v5500_v12, %v5496_v20  ;;  %v5508_v34 = vpop.eup %3633 }
 0x74c   : > { %v5512_v40 = vpop.eup %3635 }
 0x74d   : > { %2868 = vadd.xlane.f32.xlu0 %v2867_v56  ;;  %2880 = vadd.xlane.f32.xlu1 %v2879_v33  ;;  %v2804_v11 = vadd.f32 %v5512_v40, %v5508_v34  ;;  %v5520_v7 = vpop.eup %3637 }
 0x74e   : > { %v2596_v38 = vpop.xlane.xlu2 %2595  ;;  %v5524_v37 = vpop.eup %3639 }
 0x74f   : > { %v2661_v49 = vsub.f32 %v5374_v2, %v2596_v38  ;;  %v2662_v46 = vsub.f32 %v5376_v21, %v2596_v38  ;;  %v2751_v2 = vmul.f32 1.442695, %v2645_v51  ;;  %v2753_v21 = vmul.f32 1.442695, %v2646_v59 }
 0x751   : > { %v2783_v5 = vmul.f32 1.442695, %v2661_v49  ;;  %v2785_v43 = vmul.f32 1.442695, %v2662_v46 }
 0x753   : > { %3641 = vpow2.f32 %v2783_v5  ;;  %v2648_v5 = vsub.f32 %v5284_v52, %v5458_v29  ;;  %v3441_v29 = vld [vmem:[%s5826_s2 + $0x8] sm:$0xff] }
 0x754   : > { %3643 = vpow2.f32 %v2785_v43  ;;  %3361 = vmatmul.msk.bf16.gmra.mxu0 %vm1912_vm8, %v3441_v29  ;;  %3363 = vmatmul.msk.bf16.gmra.mxu1 %vm1912_vm8, %v3441_v29  ;;  %v2649_v29 = vsub.f32 %v5290_v36, %v5462_v48 }
 0x755   : > { %2805 = vadd.xlane.f32.xlu0 %v2804_v11  ;;  %3645 = vpow2.f32 %v2751_v2  ;;  %v2755_v11 = vmul.f32 1.442695, %v2647_v39  ;;  %v2757_v2 = vmul.f32 1.442695, %v2648_v5  ;;  %v2607_v5 = vsub.f32 %v5136_v47, %v5398_v50 }
 0x756   : > { %v2599_v62 = vpop.xlane.xlu2 %2598  ;;  %3647 = vpow2.f32 %v2753_v21 }
 0x757   : > { %v2663_v8 = vsub.f32 %v5394_v18, %v2599_v62  ;;  %v2664_v42 = vsub.f32 %v5396_v44, %v2599_v62  ;;  %v2795_v44 = vadd.f32 %v5524_v37, %v5520_v7 }
 0x759   : > { %v5526_v17 = vpop.eup %3641  ;;  %v2787_v28 = vmul.f32 1.442695, %v2663_v8  ;;  %v2789_v56 = vmul.f32 1.442695, %v2664_v42 }
 0x75a   : > { %v5530_v33 = vpop.eup %3643 }
 0x75b   : > { %3649 = vpow2.f32 %v2787_v28  ;;  %v2882_v18 = vadd.f32 %v5530_v33, %v5526_v17  ;;  %v5540_v49 = vpop.eup %3645  ;;  %v2605_v28 = vsub.f32 %v5130_v23, %v5428_v6  ;;  %v2640_v6 = vsub.f32 %v5236_v19, %v2563_v27 }
 0x75c   : > { %3651 = vpow2.f32 %v2789_v56  ;;  %v5542_v46 = vpop.eup %3647 }
 0x75d   : > { %2796 = vadd.xlane.f32.xlu0 %v2795_v44  ;;  %2883 = vadd.xlane.f32.xlu2 %v2882_v18  ;;  %3653 = vpow2.f32 %v2767_v3  ;;  %v2858_v43 = vadd.f32 %v5542_v46, %v5540_v49  ;;  %v2671_v23 = vmul.f32 1.442695, %v2605_v28  ;;  %v2673_v44 = vmul.f32 1.442695, %v2606_v58 }
 0x75e   : > { %v5538_v38 = vpop.xlane.xlu2 %2838  ;;  %3655 = vpow2.f32 %v2769_v41  ;;  %v2639_v41 = vsub.f32 %v5234_v22, %v2563_v27  ;;  %v2759_v58 = vmul.f32 1.442695, %v2649_v29 }
 0x75f   : > { %3657 = vpow2.f32 %v2755_v11 }
 0x760   : > { %3659 = vpow2.f32 %v2757_v2  ;;  %v2739_v11 = vmul.f32 1.442695, %v2639_v41  ;;  %v2741_v2 = vmul.f32 1.442695, %v2640_v6  ;;  %v2830_v6 = vpop.xlane.xlu0 %2829 }
 0x761   : > { %v5544_v51 = vpop.eup %3649 }
 0x762   : > { %v5548_v4 = vpop.eup %3651 }
 0x763   : > { %v2885_v59 = vadd.f32 %v5548_v4, %v5544_v51  ;;  %v5556_v62 = vpop.eup %3653 }
 0x764   : > { %v5565_v42 = vpop.eup %3655 }
 0x765   : > { %2859 = vadd.xlane.f32.xlu0 %v2858_v43  ;;  %2886 = vadd.xlane.f32.xlu1 %v2885_v59  ;;  %v5579_v3 = vpop.eup %3657  ;;  %v2608_v59 = vsub.f32 %v5138_v26, %v5398_v50 }
 0x766   : > { %v2602_v21 = vpop.xlane.xlu2 %2601  ;;  %v5582_v53 = vpop.eup %3659 }
 0x767   : > { %v2665_v8 = vsub.f32 %v5414_v63, %v2602_v21  ;;  %v2666_v52 = vsub.f32 %v5416_v10, %v2602_v21  ;;  %v2687_v10 = vmul.f32 1.442695, %v2613_v45  ;;  %v2870_v63 = vadd.f32 %v5565_v42, %v5556_v62 }
 0x768   : > { %v2861_v22 = vadd.f32 %v5582_v53, %v5579_v3  ;;  %v2675_v45 = vmul.f32 1.442695, %v2607_v5 }
 0x769   : > { %v2791_v56 = vmul.f32 1.442695, %v2665_v8  ;;  %v2793_v60 = vmul.f32 1.442695, %v2666_v52  ;;  %v2677_v8 = vmul.f32 1.442695, %v2608_v59  ;;  %v2566_v59 = vpop.xlane.xlu1 %2565 }
 0x76b   : > { %3661 = vpow2.f32 %v2791_v56 }
 0x76c   : > { %3663 = vpow2.f32 %v2793_v60 }
 0x76d   : > { %2871 = vadd.xlane.f32.xlu1 %v2870_v63  ;;  %3665 = vpow2.f32 %v2687_v10  ;;  %v2044_v10 = vld [vmem:[%s5827_s3 + $0x10] sm:$0xff]  ;;  %v2761_v63 = vmul.f32 1.442695, %v2650_v54 }
 0x76e   : > { %v5577_v18 = vpop.xlane.xlu2 %2835  ;;  %3667 = vpow2.f32 %v2689_v13  ;;  %v2643_v13 = vsub.f32 %v5268_v14, %v5440_v24 }
 0x76f   : > { %3669 = vpow2.f32 %v2671_v23  ;;  %v2644_v23 = vsub.f32 %v5270_v35, %v5440_v24  ;;  %v5921_v24 = vld [vmem:[#allocation25_spill] sm:$0xff] }
 0x770   : > { %3671 = vpow2.f32 %v2673_v44  ;;  %v2747_v5 = vmul.f32 1.442695, %v2643_v13 }
 0x771   : > { %v5585_v39 = vpop.eup %3661  ;;  %3673 = vpow2.f32 %v2739_v11  ;;  %v2749_v11 = vmul.f32 1.442695, %v2644_v23 }
 0x772   : > { %v5589_v43 = vpop.eup %3663  ;;  %3675 = vpow2.f32 %v2741_v2  ;;  %v5922_v2 = vld [vmem:[#allocation26_spill] sm:$0xff] }
 0x773   : > { %v2888_v19 = vadd.f32 %v5589_v43, %v5585_v39  ;;  %v5597_v21 = vpop.eup %3665  ;;  %3677 = vpow2.f32 %v2675_v45  ;;  %v2642_v45 = vsub.f32 %v5922_v2, %v2566_v59 }
 0x774   : > { %v5599_v47 = vpop.eup %3667  ;;  %3679 = vpow2.f32 %v2677_v8 }
 0x775   : > { %2862 = vadd.xlane.f32.xlu1 %v2861_v22  ;;  %2889 = vadd.xlane.f32.xlu2 %v2888_v19  ;;  %v5603_v26 = vpop.eup %3669  ;;  %v2810_v56 = vadd.f32 %v5599_v47, %v5597_v21  ;;  %3681 = vpow2.f32 %v2759_v58  ;;  %v2641_v19 = vsub.f32 %v5921_v24, %v2566_v59  ;;  %v5923_v59 = vld [vmem:[#allocation21_spill] sm:$0xff]  ;;  %v5926_v24 = vld [vmem:[#allocation40_spill] sm:$0xff] }
 0x776   : > { %v5601_v52 = vpop.xlane.xlu2 %2826  ;;  %v5605_v50 = vpop.eup %3671  ;;  %3683 = vpow2.f32 %v2761_v63 }
 0x777   : > { %v2798_v28 = vadd.f32 %v5605_v50, %v5603_v26  ;;  %v5615_v60 = vpop.eup %3673  ;;  %3685 = vrcp.f32 %v5538_v38  ;;  %v2743_v54 = vmul.f32 1.442695, %v2641_v19 }
 0x778   : > { %v5620_v36 = vpop.eup %3675 }
 0x779   : > { %2058 = vperm.xlu0 %3530, %v2044_v10   ;;  %v5624_v30 = vpop.eup %3677  ;;  %v2849_v44 = vadd.f32 %v5620_v36, %v5615_v60 }
 0x77a   : > { %v5626_v48 = vpop.eup %3679 }
 0x77b   : > { %v2801_v41 = vadd.f32 %v5626_v48, %v5624_v30  ;;  %v5637_v22 = vpop.eup %3681 }
 0x77c   : > { %v5639_v35 = vpop.eup %3683 }
 0x77d   : > { %2799 = vadd.xlane.f32.xlu1 %v2798_v28  ;;  %2811 = vadd.xlane.f32.xlu2 %v2810_v56  ;;  %v3686_v8 = vpop.eup %3685  ;;  %v2864_v38 = vadd.f32 %v5639_v35, %v5637_v22  ;;  %v2745_v28 = vmul.f32 1.442695, %v2642_v45  ;;  %v2557_v56 = vpop.xlane.xlu0 %2556 }
 0x77e   : > { %v5622_v27 = vpop.xlane.xlu2 %2820  ;;  %v2951_v58 = vmul.f32 %v3686_v8, %v5402_v31  ;;  %v2952_v63 = vmul.f32 %v3686_v8, %v5404_v15  ;;  %v2560_v45 = vpop.xlane.xlu1 %2559 }
 0x785   : > { %2850 = vadd.xlane.f32.xlu1 %v2849_v44  ;;  %2802 = vadd.xlane.f32.xlu2 %v2801_v41 }
 0x786   : > { %v2842_v14 = vpop.xlane.xlu2 %2841 }
 0x787   : > { %3687 = vrcp.f32 %v2842_v14 }
 0x788   : > { %3689 = vpow2.f32 %v2747_v5 }
 0x789   : > { %3691 = vpow2.f32 %v2749_v11  ;;  %v5924_v11 = vld [vmem:[#allocation22_spill] sm:$0xff] }
 0x78a   : > { %3693 = vrcp.f32 %v5577_v18  ;;  %v2636_v14 = vsub.f32 %v5924_v11, %v2557_v56  ;;  %v2045_v11 = vld [vmem:[%s5827_s3 + $0x18] sm:$0xff] }
 0x78b   : > { %3695 = vrcp.f32 %v5490_v32  ;;  %v2635_v32 = vsub.f32 %v5923_v59, %v2557_v56 }
 0x78c   : > { %3697 = vpow2.f32 %v2743_v54  ;;  %v2733_v8 = vmul.f32 1.442695, %v2636_v14  ;;  %v5928_v54 = vld [vmem:[#allocation34_spill] sm:$0xff]  ;;  %v5931_v14 = vld [vmem:[#allocation41_spill] sm:$0xff] }
 0x78d   : > { %v3688_v29 = vpop.eup %3687  ;;  %2865 = vadd.xlane.f32.xlu2 %v2864_v38  ;;  %3699 = vpow2.f32 %v2745_v28  ;;  %v2731_v2 = vmul.f32 1.442695, %v2635_v32  ;;  %v5927_v38 = vld [vmem:[#allocation33_spill] sm:$0xff] }
 0x78e   : > { %v2953_v10 = vmul.f32 %v3688_v29, %v5454_v57  ;;  %v2954_v13 = vmul.f32 %v3688_v29, %v5456_v55  ;;  %v5651_v23 = vpop.eup %3689  ;;  %3701 = vrcp.f32 %v5601_v52  ;;  %v5925_v57 = vld [vmem:[#allocation39_spill] sm:$0xff]  ;;  %v2824_v52 = vpop.xlane.xlu0 %2823 }
 0x78f   : > { %v5653_v18 = vpop.eup %3691  ;;  %3703 = vrcp.f32 %v2830_v6  ;;  %v5930_v6 = vld [vmem:[#allocation24_spill] sm:$0xff] }
 0x790   : > { %v3003_v44 = vpack.c.bf16 %v2953_v10, %v2951_v58  ;;  %v3004_v41 = vpack.c.bf16 %v2954_v13, %v2952_v63  ;;  %v3694_v5 = vpop.eup %3693  ;;  %v2855_v15 = vadd.f32 %v5653_v18, %v5651_v23  ;;  %3705 = vpow2.f32 %v2731_v2 }
 0x791   : > { %v3696_v31 = vpop.eup %3695  ;;  %v2949_v55 = vmul.f32 %v3694_v5, %v5925_v57  ;;  %v2950_v19 = vmul.f32 %v3694_v5, %v5926_v24  ;;  %v2638_v5 = vsub.f32 %v5930_v6, %v2560_v45  ;;  %3707 = vpow2.f32 %v2733_v8 }
 0x792   : > { %3021 = vmatpush.bf16.xpose.msrb.mxu0 %v3003_v44  ;;  %3035 = vmatpush.bf16.xpose.msrb.mxu1 %v3004_v41  ;;  %v2947_v29 = vmul.f32 %v3696_v31, %v5927_v38  ;;  %v2948_v28 = vmul.f32 %v3696_v31, %v5928_v54  ;;  %v5664_v56 = vpop.eup %3697  ;;  %v5929_v44 = vld [vmem:[#allocation23_spill] sm:$0xff]  ;;  %3709 = vrcp.f32 %v5622_v27 }
 0x793   : > { %v5666_v58 = vpop.eup %3699  ;;  %v2637_v41 = vsub.f32 %v5929_v44, %v2560_v45  ;;  %3711 = vrcp.f32 %v2824_v52  ;;  %v2737_v24 = vmul.f32 1.442695, %v2638_v5  ;;  %v5934_v45 = vld [vmem:[#allocation28_spill] sm:$0xff]  ;;  %v3086_v44 = vld [vmem:[%s5829_s5 + $0x8] sm:$0xff] }
 0x794   : > { %v3001_v10 = vpack.c.bf16 %v2949_v55, %v2947_v29  ;;  %v3002_v63 = vpack.c.bf16 %v2950_v19, %v2948_v28  ;;  %v3702_v13 = vpop.eup %3701  ;;  %v2852_v32 = vadd.f32 %v5666_v58, %v5664_v56  ;;  %v5933_v19 = vld [vmem:[#allocation27_spill] sm:$0xff]  ;;  %v2818_v29 = vpop.xlane.xlu1 %2817  ;;  %v5938_v5 = vld [vmem:[#allocation44_spill] sm:$0xff] }
 0x795   : > { %2856 = vadd.xlane.f32.xlu2 %v2855_v15  ;;  %v3704_v59 = vpop.eup %3703  ;;  %v2943_v31 = vmul.f32 %v3702_v13, %v5931_v14  ;;  %v5932_v15 = vld [vmem:[#allocation42_spill] sm:$0xff]  ;;  %v2735_v55 = vmul.f32 1.442695, %v2637_v41  ;;  %v5937_v41 = vld [vmem:[#allocation43_spill] sm:$0xff] }
 0x796   : > { %v2944_v57 = vmul.f32 %v3702_v13, %v5932_v15  ;;  %v2945_v2 = vmul.f32 %v3704_v59, %v5933_v19  ;;  %v2946_v27 = vmul.f32 %v3704_v59, %v5934_v45  ;;  %v5680_v8 = vpop.eup %3705  ;;  %v5940_v14 = vld [vmem:[#allocation30_spill] sm:$0xff] }
 0x797   : > { %5935 = vst [vmem:[#allocation25_spill] sm:$0xff] %v5680_v8  ;;  %v5682_v38 = vpop.eup %3707  ;;  %3713 = vpow2.f32 %v2735_v55 }
 0x798   : > { %5936 = vst [vmem:[#allocation26_spill] sm:$0xff] %v5682_v38  ;;  %v2999_v54 = vpack.c.bf16 %v2945_v2, %v2943_v31  ;;  %v3000_v28 = vpack.c.bf16 %v2946_v27, %v2944_v57  ;;  %3715 = vpow2.f32 %v2737_v24  ;;  %v2843_v13 = vadd.f32 %v5682_v38, %v5680_v8  ;;  %v5942_v27 = vld [vmem:[#allocation35_spill] sm:$0xff] }
 0x799   : > { %3717 = vrcp.f32 %v2818_v29 }
 0x79a   : > { %3022 = vmatpush.bf16.xpose.msrb.mxu0 %v3001_v10  ;;  %3036 = vmatpush.bf16.xpose.msrb.mxu1 %v3002_v63  ;;  %v3710_v10 = vpop.eup %3709  ;;  %v2815_v63 = vpop.xlane.xlu0 %2814 }
 0x79b   : > { %v3712_v52 = vpop.eup %3711  ;;  %v2939_v6 = vmul.f32 %v3710_v10, %v5937_v41  ;;  %v2940_v59 = vmul.f32 %v3710_v10, %v5938_v5  ;;  %3719 = vrcp.f32 %v2815_v63  ;;  %v5944_v10 = vld [vmem:[#allocation31_spill] sm:$0xff] }
 0x79c   : > { %v2942_v31 = vmul.f32 %v3712_v52, %v5940_v14  ;;  %v2809_v5 = vpop.xlane.xlu1 %2808 }
 0x79d   : > { %2853 = vadd.xlane.f32.xlu2 %v2852_v32  ;;  %v5939_v32 = vld [vmem:[#allocation29_spill] sm:$0xff]  ;;  %v5693_v15 = vpop.eup %3713  ;;  %3721 = vrcp.f32 %v2809_v5 }
 0x79e   : > { %2063 = vperm.xlu1 %3528, %v2045_v11   ;;  %v2941_v11 = vmul.f32 %v3712_v52, %v5939_v32  ;;  %v5695_v57 = vpop.eup %3715  ;;  %v2998_v24 = vpack.c.bf16 %v2942_v31, %v2940_v59  ;;  %v5945_v52 = vld [vmem:[#allocation32_spill] sm:$0xff] }
 0x79f   : > { %5941 = vst [vmem:[#allocation21_spill] sm:$0xff] %v5695_v57  ;;  %v3718_v19 = vpop.eup %3717  ;;  %v2846_v45 = vadd.f32 %v5695_v57, %v5693_v15 }
 0x7a0   : > { %v2997_v55 = vpack.c.bf16 %v2941_v11, %v2939_v6  ;;  %v2937_v29 = vmul.f32 %v3718_v19, %v5942_v27  ;;  %v3085_v6 = vld [vmem:[%s5829_s5] sm:$0xff] }
 0x7a1   : > { %v3720_v2 = vpop.eup %3719 }
 0x7a2   : > { %3023 = vmatpush.bf16.xpose.msrb.mxu0 %v2999_v54  ;;  %3037 = vmatpush.bf16.xpose.msrb.mxu1 %v3000_v28  ;;  %v5943_v54 = vld [vmem:[#allocation36_spill] sm:$0xff]  ;;  %v2935_v63 = vmul.f32 %v3720_v2, %v5944_v10 }
 0x7a3   : > { %v2938_v28 = vmul.f32 %v3718_v19, %v5943_v54 }
 0x7a5   : > { %2844 = vadd.xlane.f32.xlu2 %v2843_v13  ;;  %v2936_v13 = vmul.f32 %v3720_v2, %v5945_v52 }
 0x7a6   : > { %3094 = vperm.xlu1 %3528, %v3086_v44   ;;  %v2995_v44 = vpack.c.bf16 %v2937_v29, %v2935_v63  ;;  %v3722_v29 = vpop.eup %3721  ;;  %v5946_v63 = vld [vmem:[#allocation37_spill] sm:$0xff] }
 0x7a7   : > { %v2996_v41 = vpack.c.bf16 %v2938_v28, %v2936_v13  ;;  %v2931_v52 = vmul.f32 %v3722_v29, %v5946_v63 }
 0x7aa   : > { %3024 = vmatpush.bf16.xpose.msrb.mxu0 %v2997_v55  ;;  %3038 = vmatpush.bf16.xpose.msrb.mxu1 %v2998_v24 }
 0x7ad   : > { %2847 = vadd.xlane.f32.xlu2 %v2846_v45 }
 0x7b0   : > { %v5706_v32 = vpop.xlane.xlu2 %2874 }
 0x7b2   : > { %3025 = vmatpush.bf16.xpose.msrb.mxu0 %v2995_v44  ;;  %3039 = vmatpush.bf16.xpose.msrb.mxu1 %v2996_v41  ;;  %v5947_v44 = vld [vmem:[#allocation38_spill] sm:$0xff] }
 0x7b3   : > { %v2932_v41 = vmul.f32 %v3722_v29, %v5947_v44 }
 0x7b8   : > { %v5708_v11 = vpop.xlane.xlu0 %2877 }
 0x7c0   : > { %v2881_v59 = vpop.xlane.xlu1 %2880  ;;  %v5710_v55 = vpop.xlane.xlu0 %2868 }
 0x7c5   : > { %3089 = vperm.xlu2 %3529, %v3085_v6  }
 0x7c8   : > { %v2806_v2 = vpop.xlane.xlu0 %2805 }
 0x7d0   : > { %v2884_v31 = vpop.xlane.xlu2 %2883  ;;  %v2797_v10 = vpop.xlane.xlu0 %2796 }
 0x7d8   : > { %v2887_v14 = vpop.xlane.xlu1 %2886 }
 0x7e0   : > { %v5712_v24 = vpop.xlane.xlu1 %2871 }
 0x7e8   : > { %v2890_v19 = vpop.xlane.xlu2 %2889  ;;  %v5714_v27 = vpop.xlane.xlu1 %2862 }
 0x7f0   : > { %v2812_v45 = vpop.xlane.xlu2 %2811  ;;  %v2800_v38 = vpop.xlane.xlu1 %2799 }
 0x7f1   : > { %3723 = vrcp.f32 %v2812_v45 }
 0x7f2   : > { %3725 = vrcp.f32 %v2806_v2 }
 0x7f7   : > { %v3724_v54 = vpop.eup %3723 }
 0x7f8   : > { %v2803_v28 = vpop.xlane.xlu2 %2802  ;;  %v2933_v13 = vmul.f32 %v3724_v54, %v5597_v21  ;;  %v2934_v6 = vmul.f32 %v3724_v54, %v5599_v47  ;;  %v3726_v57 = vpop.eup %3725 }
 0x7f9   : > { %3727 = vrcp.f32 %v2803_v28  ;;  %v2929_v45 = vmul.f32 %v3726_v57, %v5508_v34  ;;  %v2930_v47 = vmul.f32 %v3726_v57, %v5512_v40  ;;  %v5724_v54 = vpop.xlane.xlu0 %2859  ;;  %v5730_v57 = vpop.xlane.xlu1 %2850 }
 0x7fa   : > { %v2993_v5 = vpack.c.bf16 %v2933_v13, %v2931_v52  ;;  %v2994_v8 = vpack.c.bf16 %v2934_v6, %v2932_v41  ;;  %3729 = vrcp.f32 %v2800_v38  ;;  %v2096_v13 = vpop.f32.mrf.mxu0 }
 0x7fb   : > { %3731 = vrcp.f32 %v2890_v19 }
 0x7fc   : > { %3026 = vmatpush.bf16.xpose.msrb.mxu0 %v2993_v5  ;;  %3040 = vmatpush.bf16.xpose.msrb.mxu1 %v2994_v8  ;;  %3733 = vrcp.f32 %v2797_v10  ;;  %v2115_v8 = vpop.f32.mrf.mxu1 }
 0x7fd   : > { %3735 = vrcp.f32 %v2887_v14 }
 0x7fe   : > { %3737 = vrcp.f32 %v2884_v31 }
 0x7ff   : > { %v3728_v2 = vpop.eup %3727  ;;  %3739 = vrcp.f32 %v2881_v59 }
 0x800   : > { %v2927_v21 = vmul.f32 %v3728_v2, %v5624_v30  ;;  %v2928_v29 = vmul.f32 %v3728_v2, %v5626_v48  ;;  %v3730_v52 = vpop.eup %3729  ;;  %3741 = vrcp.f32 %v5708_v11 }
 0x801   : > { %v3732_v38 = vpop.eup %3731  ;;  %v2925_v34 = vmul.f32 %v3730_v52, %v5603_v26  ;;  %v2926_v30 = vmul.f32 %v3730_v52, %v5605_v50  ;;  %v2866_v26 = vpop.xlane.xlu2 %2865  ;;  %3743 = vrcp.f32 %v5706_v32 }
 0x802   : > { %v2991_v28 = vpack.c.bf16 %v2929_v45, %v2927_v21  ;;  %v2992_v63 = vpack.c.bf16 %v2930_v47, %v2928_v29  ;;  %v3734_v19 = vpop.eup %3733  ;;  %v2985_v48 = vmul.f32 %v3732_v38, %v5585_v39  ;;  %v2986_v40 = vmul.f32 %v3732_v38, %v5589_v43  ;;  %v2059_v45 = vpop.permute.xlu0 %2058 }
 0x803   : > { %v3736_v10 = vpop.eup %3735  ;;  %v2923_v14 = vmul.f32 %v3734_v19, %v5520_v7  ;;  %v2924_v44 = vmul.f32 %v3734_v19, %v5524_v37  ;;  %v2098_v43 = vpop.f32.mrf.mxu0  ;;  %v2097_v37 = vadd.f32 %v2096_v13, %v2059_v45  ;;  %3745 = vrcp.f32 %v5712_v24 }
 0x804   : > { %3027 = vmatpush.bf16.xpose.msrb.mxu0 %v2991_v28  ;;  %3041 = vmatpush.bf16.xpose.msrb.mxu1 %v2992_v63  ;;  %v2983_v41 = vmul.f32 %v3736_v10, %v5544_v51  ;;  %v2984_v6 = vmul.f32 %v3736_v10, %v5548_v4  ;;  %v3738_v39 = vpop.eup %3737  ;;  %v2117_v59 = vpop.f32.mrf.mxu1  ;;  %v2116_v51 = vadd.f32 %v2115_v8, %v2059_v45  ;;  %3747 = vrcp.f32 %v5710_v55 }
 0x805   : > { %v2989_v31 = vpack.c.bf16 %v2925_v34, %v2923_v14  ;;  %v2990_v5 = vpack.c.bf16 %v2926_v30, %v2924_v44  ;;  %v3740_v7 = vpop.eup %3739  ;;  %v2981_v4 = vmul.f32 %v3738_v39, %v5526_v17  ;;  %v2982_v29 = vmul.f32 %v3738_v39, %v5530_v33 }
 0x806   : > { %v3019_v2 = vpack.c.bf16 %v2985_v48, %v2983_v41  ;;  %v3020_v50 = vpack.c.bf16 %v2986_v40, %v2984_v6  ;;  %v2979_v63 = vmul.f32 %v3740_v7, %v5496_v20  ;;  %v2980_v52 = vmul.f32 %v3740_v7, %v5500_v12  ;;  %v3742_v8 = vpop.eup %3741 }
 0x807   : > { %v3744_v33 = vpop.eup %3743  ;;  %v2977_v20 = vmul.f32 %v3742_v8, %v5480_v0  ;;  %v2978_v12 = vmul.f32 %v3742_v8, %v5484_v61  ;;  %3749 = vrcp.f32 %v2866_v26 }
 0x808   : > { %v3017_v11 = vpack.c.bf16 %v2981_v4, %v2979_v63  ;;  %v3018_v13 = vpack.c.bf16 %v2982_v29, %v2980_v52  ;;  %v2975_v32 = vmul.f32 %v3744_v33, %v5470_v1  ;;  %v2976_v10 = vmul.f32 %v3744_v33, %v5473_v9  ;;  %v5949_v4 = vld [vmem:[#allocation25_spill] sm:$0xff] }
 0x809   : > { %v2857_v17 = vpop.xlane.xlu2 %2856  ;;  %v3746_v48 = vpop.eup %3745  ;;  %3751 = vrcp.f32 %v5714_v27 }
 0x80a   : > { %v3015_v34 = vpack.c.bf16 %v2977_v20, %v2975_v32  ;;  %v3016_v30 = vpack.c.bf16 %v2978_v12, %v2976_v10  ;;  %v3748_v40 = vpop.eup %3747  ;;  %v2973_v24 = vmul.f32 %v3746_v48, %v5556_v62  ;;  %v2974_v0 = vmul.f32 %v3746_v48, %v5565_v42  ;;  %v3442_v12 = vld [vmem:[%s5828_s4] sm:$0xff]  ;;  %v5953_v48 = vld [vmem:[#allocation19_spill] sm:$0xff] }
 0x80b   : > { %v2971_v61 = vmul.f32 %v3748_v40, %v5492_v25  ;;  %v2972_v1 = vmul.f32 %v3748_v40, %v5494_v16  ;;  %3753 = vrcp.f32 %v2857_v17  ;;  %v5952_v17 = vld [vmem:[#allocation18_spill] sm:$0xff] }
 0x80c   : > { %3028 = vmatpush.bf16.xpose.msrb.mxu0 %v2989_v31  ;;  %3042 = vmatpush.bf16.xpose.msrb.mxu1 %v2990_v5  ;;  %3755 = vrcp.f32 %v5724_v54 }
 0x80d   : > { %v3013_v55 = vpack.c.bf16 %v2973_v24, %v2971_v61  ;;  %v3014_v9 = vpack.c.bf16 %v2974_v0, %v2972_v1  ;;  %v3750_v44 = vpop.eup %3749 }
 0x80e   : > { %v2969_v6 = vmul.f32 %v3750_v44, %v5637_v22  ;;  %v2970_v31 = vmul.f32 %v3750_v44, %v5639_v35 }
 0x80f   : > { %v3752_v41 = vpop.eup %3751 }
 0x810   : > { %v2064_v21 = vpop.permute.xlu1 %2063  ;;  %v2967_v42 = vmul.f32 %v3752_v41, %v5579_v3  ;;  %v2968_v25 = vmul.f32 %v3752_v41, %v5582_v53 }
 0x811   : > { %v2099_v47 = vadd.f32 %v2098_v43, %v2064_v21  ;;  %v2118_v28 = vadd.f32 %v2117_v59, %v2064_v21  ;;  %v2854_v14 = vpop.xlane.xlu2 %2853  ;;  %v3754_v5 = vpop.eup %3753 }
 0x812   : > { %v3011_v27 = vpack.c.bf16 %v2969_v6, %v2967_v42  ;;  %v3012_v16 = vpack.c.bf16 %v2970_v31, %v2968_v25  ;;  %v3756_v26 = vpop.eup %3755  ;;  %3757 = vrcp.f32 %v2854_v14  ;;  %v2964_v22 = vmul.f32 %v3754_v5, %v5653_v18  ;;  %v5954_v14 = vld [vmem:[#allocation20_spill] sm:$0xff] }
 0x813   : > { %v5742_v38 = vpack.c.bf16 %v2099_v47, %v2097_v37  ;;  %v5744_v19 = vpack.c.bf16 %v2118_v28, %v2116_v51  ;;  %3759 = vrcp.f32 %v5730_v57  ;;  %v2965_v35 = vmul.f32 %v3756_v26, %v5540_v49  ;;  %v5948_v51 = vld [vmem:[#allocation21_spill] sm:$0xff] }
 0x814   : > { %3049 = vmatpush.bf16.xpose.msra.mxu0 %v3019_v2  ;;  %3063 = vmatpush.bf16.xpose.msra.mxu1 %v3020_v50  ;;  %v2963_v2 = vmul.f32 %v3754_v5, %v5651_v23  ;;  %v2966_v54 = vmul.f32 %v3756_v26, %v5542_v46 }
 0x815   : > { %3029 = vmatmul.bf16.vlgmr.msrb.gmra.mxu0 %v5742_v38  ;;  %3043 = vmatmul.bf16.vlgmr.msrb.gmra.mxu1 %v5744_v19 }
 0x816   : > { %v3009_v50 = vpack.c.bf16 %v2965_v35, %v2963_v2  ;;  %v3010_v53 = vpack.c.bf16 %v2966_v54, %v2964_v22 }
 0x818   : > { %v3758_v45 = vpop.eup %3757  ;;  %v3095_v44 = vpop.permute.xlu1 %3094 }
 0x819   : > { %v2845_v62 = vpop.xlane.xlu2 %2844  ;;  %v3760_v39 = vpop.eup %3759  ;;  %v2961_v43 = vmul.f32 %v3758_v45, %v5664_v56  ;;  %v2962_v23 = vmul.f32 %v3758_v45, %v5666_v58  ;;  %v5950_v56 = vld [vmem:[#allocation26_spill] sm:$0xff] }
 0x81a   : > { %v2959_v18 = vmul.f32 %v3760_v39, %v5615_v60  ;;  %v2960_v57 = vmul.f32 %v3760_v39, %v5620_v36 }
 0x81c   : > { %3050 = vmatpush.bf16.xpose.msra.mxu0 %v3017_v11  ;;  %3064 = vmatpush.bf16.xpose.msra.mxu1 %v3018_v13  ;;  %v3007_v49 = vpack.c.bf16 %v2961_v43, %v2959_v18  ;;  %v3008_v59 = vpack.c.bf16 %v2962_v23, %v2960_v57  ;;  %v5951_v13 = vld [vmem:[#allocation17_spill] sm:$0xff] }
 0x821   : > { %v2848_v3 = vpop.xlane.xlu2 %2847 }
 0x822   : > { %3761 = vrcp.f32 %v2848_v3 }
 0x823   : > { %3763 = vrcp.f32 %v2845_v62 }
 0x824   : > { %3051 = vmatpush.bf16.xpose.msra.mxu0 %v3015_v34  ;;  %3065 = vmatpush.bf16.xpose.msra.mxu1 %v3016_v30 }
 0x828   : > { %v3762_v46 = vpop.eup %3761 }
 0x829   : > { %v3764_v7 = vpop.eup %3763  ;;  %v2957_v37 = vmul.f32 %v3762_v46, %v5693_v15  ;;  %v2958_v21 = vmul.f32 %v3762_v46, %v5948_v51  ;;  %v3090_v61 = vpop.permute.xlu2 %3089 }
 0x82a   : > { %v2955_v29 = vmul.f32 %v3764_v7, %v5949_v4  ;;  %v2956_v47 = vmul.f32 %v3764_v7, %v5950_v56 }
 0x82c   : > { %3052 = vmatpush.bf16.xpose.msra.mxu0 %v3013_v55  ;;  %3066 = vmatpush.bf16.xpose.msra.mxu1 %v3014_v9  ;;  %v3005_v58 = vpack.c.bf16 %v2957_v37, %v2955_v29  ;;  %v3006_v28 = vpack.c.bf16 %v2958_v21, %v2956_v47 }
 0x834   : > { %3053 = vmatpush.bf16.xpose.msra.mxu0 %v3011_v27  ;;  %3067 = vmatpush.bf16.xpose.msra.mxu1 %v3012_v16 }
 0x83c   : > { %3054 = vmatpush.bf16.xpose.msra.mxu0 %v3009_v50  ;;  %3068 = vmatpush.bf16.xpose.msra.mxu1 %v3010_v53 }
 0x844   : > { %3055 = vmatpush.bf16.xpose.msra.mxu0 %v3007_v49  ;;  %3069 = vmatpush.bf16.xpose.msra.mxu1 %v3008_v59 }
 0x84c   : > { %3056 = vmatpush.bf16.xpose.msra.mxu0 %v3005_v58  ;;  %3070 = vmatpush.bf16.xpose.msra.mxu1 %v3006_v28 }
 0x853   : > { %3057 = vmatmul.bf16.vlgmr.msra.gmra.mxu0 %v5742_v38  ;;  %3071 = vmatmul.bf16.vlgmr.msra.gmra.mxu1 %v5744_v19 }
 0x892   : > { %v3030_v60 = vpop.f32.mrf.mxu0  ;;  %v3044_v36 = vpop.f32.mrf.mxu1 }
 0x893   : > { %v3045_v63 = vadd.f32 %v3044_v36, %v3030_v60 }
 0x895   : > { %v3077_v8 = vmul.f32 %v3045_v63, %v5951_v13 }
 0x89a   : > { %v3032_v52 = vpop.f32.mrf.mxu0  ;;  %v3046_v11 = vpop.f32.mrf.mxu1 }
 0x89b   : > { %v3047_v15 = vadd.f32 %v3046_v11, %v3032_v52 }
 0x89d   : > { %v3079_v33 = vmul.f32 %v3047_v15, %v5952_v17 }
 0x89f   : > { %v3083_v20 = vpack.c.bf16 %v3079_v33, %v3077_v8 }
 0x8a1   : > { %3112 = vmatpush.bf16.msrb.mxu0 %v3083_v20 }
 0x8a4   : > { %3432 = vmatmul.msk.bf16.vlgmr.msrb.gmra.mxu0 %vm1912_vm8, %v3442_v12 }
 0x8d0   : > { %v3058_v38 = vpop.f32.mrf.mxu0  ;;  %v3072_v19 = vpop.f32.mrf.mxu1 }
 0x8d1   : > { %v3073_v32 = vadd.f32 %v3072_v19, %v3058_v38 }
 0x8d3   : > { %v3078_v40 = vmul.f32 %v3073_v32, %v5953_v48 }
 0x8d8   : > { %v3060_v10 = vpop.f32.mrf.mxu0  ;;  %v3074_v34 = vpop.f32.mrf.mxu1 }
 0x8d9   : > { %v3075_v30 = vadd.f32 %v3074_v34, %v3060_v10 }
 0x8db   : > { %v3080_v24 = vmul.f32 %v3075_v30, %v5954_v14 }
 0x8dd   : > { %v3084_v0 = vpack.c.bf16 %v3080_v24, %v3078_v40 }
 0x8df   : > { %3126 = vmatpush.bf16.msrb.mxu1 %v3084_v0 }
 0x8e2   : > { %3433 = vmatmul.msk.bf16.vlgmr.msrb.gmra.mxu1 %vm1912_vm8, %v3442_v12 }
 0x921   : > { %v3114_v1 = vpop.f32.mrf.mxu0 }
 0x922   : > { %v3115_v55 = vadd.f32 %v3114_v1, %v3090_v61 }
 0x924   : > { %v3133_v9 = vmax.f32 %v3115_v55, 0.0 }
 0x926   : > { %3137 = vst [vmem:[%s285_s11] sm:$0xff] %v3133_v9 }
 0x929   : > { %v3116_v41 = vpop.f32.mrf.mxu0 }
 0x92a   : > { %v3117_v6 = vadd.f32 %v3116_v41, %v3095_v44 }
 0x92c   : > { %v3135_v31 = vmax.f32 %v3117_v6, 0.0 }
 0x92e   : > { %3139 = vst [vmem:[%s285_s11 + $0x10] sm:$0xff] %v3135_v31 }
 0x95f   : > { %v3128_v62 = vpop.f32.mrf.mxu1 }
 0x960   : > { %v3129_v42 = vadd.f32 %v3128_v62, %v3090_v61 }
 0x962   : > { %v3134_v25 = vmax.f32 %v3129_v42, 0.0 }
 0x964   : > { %3138 = vst [vmem:[%s285_s11 + $0x8] sm:$0xff] %v3134_v25 }
 0x967   : > { %v3130_v27 = vpop.f32.mrf.mxu1 }
 0x968   : > { %v3131_v16 = vadd.f32 %v3130_v27, %v3095_v44 }
 0x96a   : > { %v3136_v5 = vmax.f32 %v3131_v16, 0.0 }
 0x96c   : > { %3140 = vst [vmem:[%s285_s11 + $0x18] sm:$0xff] %v3136_v5 }
 0x96d   : > { %3841 = shalt.err (!%p3838_p8)
}
 0x96e   : > { %s3913_s28 = smov 256  }
 0x96f   : > { %3450 = dma.vmem_to_hbm [thread:$0]  (%p4001_p11), %s3155_s17, 512, %s3157_s23, %s3142_s12, %s3913_s28, %s3913_s28, %s3905_s26  }
 0x970 PF: > { %s3171_s18 = sand.u32 1, %s3872_s21   ;;  %p5955_p9 = scmp.ge.s32.totalorder %s3884_s24, 2 }
 0x971   : > { %s3172_s1 = scalar_lea.sflag [#allocation8], %s3171_s18 }
 0x972   : > { %p3461_p10 = pnand %p5955_p9, %p4005_p12 }
 0x974   : > { %p3462_p1 = pneg %p3461_p10 }
 0x976   : > { %3867 = dma.done.wait (%p3462_p1), %s3172_s1, 512  }
 0x977   : > { %3869 = vsyncadd (%p3462_p1), %s3172_s1, 4294966784  ;;  %s5956_s11 = sld [smem:[#allocation15_spill]]  ;;  %p20_p2 = scmp.ge.s32.totalorder %s3974_s27, 4  }
 0x978   : > { %s5957_s23 = sld [smem:[#allocation16_spill]]  ;;  %s5958_s21 = smov %s3876_s22 }
 0x979   : > { %s5960_s24 = smov %s3974_s27  ;;  %22 = sbr.rel (!%p20_p2) target bundleno = 8 (0x8), region = 96 }
 0x97d   : > { %s5959_s22 = smov %s5956_s11 }
 0x97e   :  { %3178 = vsyncpa [#allocation7], 1 }
 0x97f   :  { %3180 = vsyncpa [#allocation7 + $0x1], 1 }
 0x980   :  { %3181 = vsyncpa [#allocation8], 1 }
 0x981   :  { %3183 = vsyncpa [#allocation8 + $0x1], 1 }
 0x982   :  { %3184 = vsyncpa [#allocation9], 1 }
 0x983   :  { %3186 = vsyncpa [#allocation9 + $0x1], 1 }

</bundles_post_ra>
